<compile_context>
chip_gen: v5e
topology: v5e:2x2
jax: 0.10.0
libtpu: 0.0.40
codegen_flags: <defaults>
</compile_context>

<pallas_src>
import math
import functools

import jax
import jax.numpy as jnp
from jax.experimental import pallas as pl
from jax.experimental.pallas import tpu as pltpu


_INV_SQRT2 = 1.0 / math.sqrt(2.0)


def _gelu_exact(x):
    # nn.GELU default (exact, erf-based).
    return 0.5 * x * (1.0 + jax.lax.erf(x * _INV_SQRT2))


def _mlp_dwbn_kernel(H, W, x_ref, w1t_ref, sh1_ref, wdw_ref, sh2_ref,
                     w2t_ref, sh3_ref, mask_ref, o_ref):
    LANE = x_ref.shape[-1]                          # Bt*H*W padded to mult of 128

    x = x_ref[0]                                    # [Cin, LANE]  (lanes dense)

    # ---- fc1 (1x1 conv) with BN1 folded into weights, + GELU ----------------
    h = jnp.dot(w1t_ref[...], x, preferred_element_type=jnp.float32)
    h = _gelu_exact(h + sh1_ref[...])               # [Chid, LANE]

    # ---- depthwise 3x3 conv (padding=1) as 8 lane rolls + precomputed masks -
    acc = h * wdw_ref[4]                            # center tap (dy=0, dx=0)
    for dy in (-1, 0, 1):
        for dx in (-1, 0, 1):
            if dy == 0 and dx == 0:
                continue
            t = (dy + 1) * 3 + (dx + 1)             # tap index into [9, Chid, 1]
            m_idx = t if t < 4 else t - 1           # mask index into [8, 1, LANE]
            off = dy * W + dx                       # fused-lane spatial offset
            # shifted[p] = h[p + off]  (circular; wrapped/edge entries masked)
            shifted = pltpu.roll(h, (-off) % LANE, axis=1)
            acc = acc + (shifted * mask_ref[m_idx]) * wdw_ref[t]
    acc = _gelu_exact(acc + sh2_ref[...])           # BN2 + dw-bias folded into shift

    # ---- fc2 (1x1 conv) with BN3 folded, + GELU -----------------------------
    o = jnp.dot(w2t_ref[...], acc, preferred_element_type=jnp.float32)
    o_ref[0] = _gelu_exact(o + sh3_ref[...])        # [Cout, LANE] lane-dense store


def _pick_bt(B, max_bt=4):
    """Largest Bt <= max_bt dividing B, preferring grid length >= 2 (v7x 2 TCs)."""
    cands = [d for d in range(1, min(B, max_bt) + 1) if B % d == 0]
    pref = [d for d in cands if B // d >= 2]
    return max(pref) if pref else max(cands)


def mlp_dwbn_pallas(x_nchw, params, *, max_bt=4):
    """x_nchw: [B, Cin, H, W] float32. Returns [B, Cout, H, W] float32."""
    B, Cin, H, W = x_nchw.shape
    Chid = params["w1"].shape[1]
    Cout = params["w2"].shape[1]
    HW = H * W

    Bt = _pick_bt(B, max_bt)
    G = B // Bt
    lane_valid = Bt * HW
    LANE = ((lane_valid + 127) // 128) * 128        # lane-dense (mult of 128)
    pad = LANE - lane_valid

    # [B, Cin, H, W] -> [G, Cin, Bt*HW]  (cheap wrapper-side layout plumbing).
    x_fused = jnp.transpose(x_nchw.reshape(G, Bt, Cin, HW),
                            (0, 2, 1, 3)).reshape(G, Cin, lane_valid)
    if pad:
        x_fused = jnp.pad(x_fused, ((0, 0), (0, 0), (0, pad)))

    def fold_bn(gamma, beta, mean, var, eps=1e-5):
        scale = gamma * jax.lax.rsqrt(var + eps)
        shift = beta - mean * scale
        return scale, shift

    s1, t1 = fold_bn(*params["bn1"])
    s2, t2 = fold_bn(*params["bn2"])
    s3, t3 = fold_bn(*params["bn3"])

    # Fold BN scale into conv weights, conv bias into the BN shift (one-time).
    w1t = jnp.transpose(params["w1"] * s1[None, :])                    # [Chid, Cin]
    sh1 = (params["b1"] * s1 + t1).reshape(Chid, 1)
    wdw = (params["wdw"].reshape(9, Chid) * s2[None, :]).reshape(9, Chid, 1)
    sh2 = (params["bdw"] * s2 + t2).reshape(Chid, 1)
    w2t = jnp.transpose(params["w2"] * s3[None, :])                    # [Cout, Chid]
    sh3 = (params["b2"] * s3 + t3).reshape(Cout, 1)

    # Precomputed edge masks: one (1, LANE) row per non-center tap.
    lane = jnp.arange(LANE, dtype=jnp.int32)
    q = lane % HW                                   # per-image pixel index
    col = q % W
    row = q // W
    valid = lane < lane_valid                       # zero out lane padding
    mask_rows = []
    for dy in (-1, 0, 1):
        for dx in (-1, 0, 1):
            if dy == 0 and dx == 0:
                continue
            m = valid
            if dx == -1:
                m = m & (col >= 1)
            elif dx == 1:
                m = m & (col <= W - 2)
            if dy == -1:
                m = m & (row >= 1)
            elif dy == 1:
                m = m & (row <= H - 2)
            mask_rows.append(m)
    mask_arr = jnp.stack(mask_rows).astype(jnp.float32).reshape(8, 1, LANE)

    full2 = lambda r, c: pl.BlockSpec((r, c), lambda g: (0, 0))
    kernel = functools.partial(_mlp_dwbn_kernel, H, W)

    out_fused = pl.pallas_call(
        kernel,
        out_shape=jax.ShapeDtypeStruct((G, Cout, LANE), jnp.float32),
        grid_spec=pltpu.PrefetchScalarGridSpec(
            num_scalar_prefetch=0,
            grid=(G,),
            in_specs=[
                pl.BlockSpec((1, Cin, LANE), lambda g: (g, 0, 0)),     # x (fused)
                full2(Chid, Cin),                                      # w1^T (BN1-folded)
                full2(Chid, 1),                                        # shift1
                pl.BlockSpec((9, Chid, 1), lambda g: (0, 0, 0)),       # dw taps (BN2-folded)
                full2(Chid, 1),                                        # shift2
                full2(Cout, Chid),                                     # w2^T (BN3-folded)
                full2(Cout, 1),                                        # shift3
                pl.BlockSpec((8, 1, LANE), lambda g: (0, 0, 0)),       # edge masks
            ],
            out_specs=pl.BlockSpec((1, Cout, LANE), lambda g: (g, 0, 0)),
        ),
        compiler_params=pltpu.CompilerParams(
            dimension_semantics=("parallel",),
            vmem_limit_bytes=32 * 1024 * 1024,     # fits every generation (<= v7x 64 MiB)
        ),
    )(x_fused, w1t, sh1, wdw, sh2, w2t, sh3, mask_arr)

    # [G, Cout, Bt*HW] -> [B, Cout, H, W]
    out = out_fused[:, :, :lane_valid].reshape(G, Cout, Bt, HW)
    out = jnp.transpose(out, (0, 2, 1, 3)).reshape(B, Cout, H, W)
    return out


def mlp_dwbn_ref(x_nchw, params):
    """Plain-JAX reference (same semantics) for validation."""
    x = jnp.transpose(x_nchw, (0, 2, 3, 1))        # NHWC
    eps = 1e-5

    def bn(h, p):
        gamma, beta, mean, var = p
        return gamma * (h - mean) * jax.lax.rsqrt(var + eps) + beta

    h = jnp.einsum("bhwc,cd->bhwd", x, params["w1"]) + params["b1"]
    h = _gelu_exact(bn(h, params["bn1"]))

    hp = jnp.pad(h, ((0, 0), (1, 1), (1, 1), (0, 0)))
    H, W = x.shape[1], x.shape[2]
    acc = jnp.zeros_like(h)
    for dy in range(3):
        for dx in range(3):
            acc = acc + hp[:, dy:dy + H, dx:dx + W, :] * params["wdw"][dy, dx]
    acc = acc + params["bdw"]
    acc = _gelu_exact(bn(acc, params["bn2"]))

    o = jnp.einsum("bhwc,cd->bhwd", acc, params["w2"]) + params["b2"]
    o = _gelu_exact(bn(o, params["bn3"]))
    return jnp.transpose(o, (0, 3, 1, 2))


def make_params(key, Cin, Chid, Cout):
    ks = jax.random.split(key, 12)
    p = {
        "w1": jax.random.normal(ks[0], (Cin, Chid), jnp.float32) * 0.1,
        "b1": jax.random.normal(ks[1], (Chid,), jnp.float32) * 0.05,
        "wdw": jax.random.normal(ks[2], (3, 3, Chid), jnp.float32) * 0.1,
        "bdw": jax.random.normal(ks[3], (Chid,), jnp.float32) * 0.05,
        "w2": jax.random.normal(ks[4], (Chid, Cout), jnp.float32) * 0.1,
        "b2": jax.random.normal(ks[5], (Cout,), jnp.float32) * 0.05,
    }

    def bn_params(k, C):
        k1, k2, k3, k4 = jax.random.split(k, 4)
        gamma = 1.0 + 0.1 * jax.random.normal(k1, (C,), jnp.float32)
        beta = 0.1 * jax.random.normal(k2, (C,), jnp.float32)
        mean = 0.1 * jax.random.normal(k3, (C,), jnp.float32)
        var = 1.0 + 0.1 * jax.random.uniform(k4, (C,), jnp.float32)
        return (gamma, beta, mean, var)

    p["bn1"] = bn_params(ks[6], Chid)
    p["bn2"] = bn_params(ks[7], Chid)
    p["bn3"] = bn_params(ks[8], Cout)
    return p


if __name__ == "__main__":
    key = jax.random.PRNGKey(0)
    kx, kp = jax.random.split(key)

    # B=4 so batch fusion (Bt=2) still leaves a 2-step parallel grid (v7x 2 TCs).
    B, Cin, H, W = 4, 16, 16, 16
    Chid, Cout = 32, 16       # hidden_features=32, out_features=in_features

    x = jax.random.normal(kx, (B, Cin, H, W), jnp.float32)
    params = make_params(kp, Cin, Chid, Cout)

    # TODO(synk): only the 4-D (NCHW) forward path is implemented; the 3-D
    # token path with optional cls token is a pure reshape/concat around it.
    out = mlp_dwbn_pallas(x, params)
    out = jax.block_until_ready(out)

    ref = jax.block_until_ready(mlp_dwbn_ref(x, params))
    assert out.shape == (B, Cout, H, W)
    assert jnp.allclose(out, ref, atol=1e-4, rtol=1e-4), \
        f"max err {jnp.max(jnp.abs(out - ref))}"

    print("KERNEL_OK")
</pallas_src>

<mosaic_0001>
module attributes {stable_mosaic.version = 11 : i64} {
  func.func @_mlp_dwbn_kernel(%arg0: i32, %arg1: memref<1x16x512xf32, #tpu.memory_space<vmem>>, %arg2: memref<32x16xf32, #tpu.memory_space<vmem>>, %arg3: memref<32x1xf32, #tpu.memory_space<vmem>>, %arg4: memref<9x32x1xf32, #tpu.memory_space<vmem>>, %arg5: memref<32x1xf32, #tpu.memory_space<vmem>>, %arg6: memref<16x32xf32, #tpu.memory_space<vmem>>, %arg7: memref<16x1xf32, #tpu.memory_space<vmem>>, %arg8: memref<8x1x512xf32, #tpu.memory_space<vmem>>, %arg9: memref<1x16x512xf32, #tpu.memory_space<vmem>>) attributes {dimension_semantics = [#tpu.dimension_semantics<parallel>], iteration_bounds = array<i64: 2>, scalar_prefetch = 0 : i64, scratch_operands = 0 : i64, tpu.core_type = #tpu.core_type<tc>, window_params = [{transform_indices = @transform_0, window_bounds = array<i64: 1, 16, 512>}, {pipeline_mode = #tpu.pipeline_mode<synchronous>, transform_indices = @transform_1, window_bounds = array<i64: 32, 16>}, {pipeline_mode = #tpu.pipeline_mode<synchronous>, transform_indices = @transform_2, window_bounds = array<i64: 32, 1>}, {pipeline_mode = #tpu.pipeline_mode<synchronous>, transform_indices = @transform_3, window_bounds = array<i64: 9, 32, 1>}, {pipeline_mode = #tpu.pipeline_mode<synchronous>, transform_indices = @transform_4, window_bounds = array<i64: 32, 1>}, {pipeline_mode = #tpu.pipeline_mode<synchronous>, transform_indices = @transform_5, window_bounds = array<i64: 16, 32>}, {pipeline_mode = #tpu.pipeline_mode<synchronous>, transform_indices = @transform_6, window_bounds = array<i64: 16, 1>}, {pipeline_mode = #tpu.pipeline_mode<synchronous>, transform_indices = @transform_7, window_bounds = array<i64: 8, 1, 512>}, {transform_indices = @transform_8, window_bounds = array<i64: 1, 16, 512>}]} {
    %c0 = arith.constant 0 : index
    %c0_0 = arith.constant 0 : index
    %c0_1 = arith.constant 0 : index
    %0 = vector.load %arg1[%c0, %c0_0, %c0_1] : memref<1x16x512xf32, #tpu.memory_space<vmem>>, vector<1x16x512xf32>
    %1 = vector.shape_cast %0 : vector<1x16x512xf32> to vector<16x512xf32>
    %c0_2 = arith.constant 0 : index
    %c0_3 = arith.constant 0 : index
    %2 = vector.load %arg2[%c0_2, %c0_3] : memref<32x16xf32, #tpu.memory_space<vmem>>, vector<32x16xf32>
    %cst = arith.constant dense<0.000000e+00> : vector<32x512xf32>
    %3 = tpu.matmul %2, %1, %cst {dimension_numbers = #tpu.dot_dimension_numbers<[1], [0], [0], [1], [0, 0, 1, 1], [], []>} : vector<32x16xf32>, vector<16x512xf32>, vector<32x512xf32> -> vector<32x512xf32>
    %c0_4 = arith.constant 0 : index
    %c0_5 = arith.constant 0 : index
    %4 = vector.load %arg3[%c0_4, %c0_5] : memref<32x1xf32, #tpu.memory_space<vmem>>, vector<32x1xf32>
    %5 = vector.broadcast %4 : vector<32x1xf32> to vector<32x512xf32>
    %6 = arith.addf %3, %5 : vector<32x512xf32>
    %cst_6 = arith.constant 5.000000e-01 : f32
    %7 = vector.broadcast %cst_6 : f32 to vector<32x512xf32>
    %8 = arith.mulf %7, %6 : vector<32x512xf32>
    %cst_7 = arith.constant 0.707106769 : f32
    %9 = vector.broadcast %cst_7 : f32 to vector<32x512xf32>
    %10 = arith.mulf %6, %9 : vector<32x512xf32>
    %11 = math.erf %10 : vector<32x512xf32>
    %cst_8 = arith.constant 1.000000e+00 : f32
    %12 = vector.broadcast %cst_8 : f32 to vector<32x512xf32>
    %13 = arith.addf %12, %11 : vector<32x512xf32>
    %14 = arith.mulf %8, %13 : vector<32x512xf32>
    %c4 = arith.constant 4 : index
    %c0_9 = arith.constant 0 : index
    %c0_10 = arith.constant 0 : index
    %15 = vector.load %arg4[%c4, %c0_9, %c0_10] : memref<9x32x1xf32, #tpu.memory_space<vmem>>, vector<1x32x1xf32>
    %16 = vector.shape_cast %15 : vector<1x32x1xf32> to vector<32x1xf32>
    %17 = vector.broadcast %16 : vector<32x1xf32> to vector<32x512xf32>
    %18 = arith.mulf %14, %17 : vector<32x512xf32>
    %c17_i32 = arith.constant 17 : i32
    %19 = tpu.dynamic_rotate %14 by %c17_i32 dim 1 : vector<32x512xf32>, i32 -> vector<32x512xf32>
    %c0_11 = arith.constant 0 : index
    %c0_12 = arith.constant 0 : index
    %c0_13 = arith.constant 0 : index
    %20 = vector.load %arg8[%c0_11, %c0_12, %c0_13] : memref<8x1x512xf32, #tpu.memory_space<vmem>>, vector<1x1x512xf32>
    %21 = vector.shape_cast %20 : vector<1x1x512xf32> to vector<1x512xf32>
    %22 = vector.broadcast %21 : vector<1x512xf32> to vector<32x512xf32>
    %23 = arith.mulf %19, %22 : vector<32x512xf32>
    %c0_14 = arith.constant 0 : index
    %c0_15 = arith.constant 0 : index
    %c0_16 = arith.constant 0 : index
    %24 = vector.load %arg4[%c0_14, %c0_15, %c0_16] : memref<9x32x1xf32, #tpu.memory_space<vmem>>, vector<1x32x1xf32>
    %25 = vector.shape_cast %24 : vector<1x32x1xf32> to vector<32x1xf32>
    %26 = vector.broadcast %25 : vector<32x1xf32> to vector<32x512xf32>
    %27 = arith.mulf %23, %26 : vector<32x512xf32>
    %28 = arith.addf %18, %27 : vector<32x512xf32>
    %c16_i32 = arith.constant 16 : i32
    %29 = tpu.dynamic_rotate %14 by %c16_i32 dim 1 : vector<32x512xf32>, i32 -> vector<32x512xf32>
    %c1 = arith.constant 1 : index
    %c0_17 = arith.constant 0 : index
    %c0_18 = arith.constant 0 : index
    %30 = vector.load %arg8[%c1, %c0_17, %c0_18] : memref<8x1x512xf32, #tpu.memory_space<vmem>>, vector<1x1x512xf32>
    %31 = vector.shape_cast %30 : vector<1x1x512xf32> to vector<1x512xf32>
    %32 = vector.broadcast %31 : vector<1x512xf32> to vector<32x512xf32>
    %33 = arith.mulf %29, %32 : vector<32x512xf32>
    %c1_19 = arith.constant 1 : index
    %c0_20 = arith.constant 0 : index
    %c0_21 = arith.constant 0 : index
    %34 = vector.load %arg4[%c1_19, %c0_20, %c0_21] : memref<9x32x1xf32, #tpu.memory_space<vmem>>, vector<1x32x1xf32>
    %35 = vector.shape_cast %34 : vector<1x32x1xf32> to vector<32x1xf32>
    %36 = vector.broadcast %35 : vector<32x1xf32> to vector<32x512xf32>
    %37 = arith.mulf %33, %36 : vector<32x512xf32>
    %38 = arith.addf %28, %37 : vector<32x512xf32>
    %c15_i32 = arith.constant 15 : i32
    %39 = tpu.dynamic_rotate %14 by %c15_i32 dim 1 : vector<32x512xf32>, i32 -> vector<32x512xf32>
    %c2 = arith.constant 2 : index
    %c0_22 = arith.constant 0 : index
    %c0_23 = arith.constant 0 : index
    %40 = vector.load %arg8[%c2, %c0_22, %c0_23] : memref<8x1x512xf32, #tpu.memory_space<vmem>>, vector<1x1x512xf32>
    %41 = vector.shape_cast %40 : vector<1x1x512xf32> to vector<1x512xf32>
    %42 = vector.broadcast %41 : vector<1x512xf32> to vector<32x512xf32>
    %43 = arith.mulf %39, %42 : vector<32x512xf32>
    %c2_24 = arith.constant 2 : index
    %c0_25 = arith.constant 0 : index
    %c0_26 = arith.constant 0 : index
    %44 = vector.load %arg4[%c2_24, %c0_25, %c0_26] : memref<9x32x1xf32, #tpu.memory_space<vmem>>, vector<1x32x1xf32>
    %45 = vector.shape_cast %44 : vector<1x32x1xf32> to vector<32x1xf32>
    %46 = vector.broadcast %45 : vector<32x1xf32> to vector<32x512xf32>
    %47 = arith.mulf %43, %46 : vector<32x512xf32>
    %48 = arith.addf %38, %47 : vector<32x512xf32>
    %c1_i32 = arith.constant 1 : i32
    %49 = tpu.dynamic_rotate %14 by %c1_i32 dim 1 : vector<32x512xf32>, i32 -> vector<32x512xf32>
    %c3 = arith.constant 3 : index
    %c0_27 = arith.constant 0 : index
    %c0_28 = arith.constant 0 : index
    %50 = vector.load %arg8[%c3, %c0_27, %c0_28] : memref<8x1x512xf32, #tpu.memory_space<vmem>>, vector<1x1x512xf32>
    %51 = vector.shape_cast %50 : vector<1x1x512xf32> to vector<1x512xf32>
    %52 = vector.broadcast %51 : vector<1x512xf32> to vector<32x512xf32>
    %53 = arith.mulf %49, %52 : vector<32x512xf32>
    %c3_29 = arith.constant 3 : index
    %c0_30 = arith.constant 0 : index
    %c0_31 = arith.constant 0 : index
    %54 = vector.load %arg4[%c3_29, %c0_30, %c0_31] : memref<9x32x1xf32, #tpu.memory_space<vmem>>, vector<1x32x1xf32>
    %55 = vector.shape_cast %54 : vector<1x32x1xf32> to vector<32x1xf32>
    %56 = vector.broadcast %55 : vector<32x1xf32> to vector<32x512xf32>
    %57 = arith.mulf %53, %56 : vector<32x512xf32>
    %58 = arith.addf %48, %57 : vector<32x512xf32>
    %c511_i32 = arith.constant 511 : i32
    %59 = tpu.dynamic_rotate %14 by %c511_i32 dim 1 : vector<32x512xf32>, i32 -> vector<32x512xf32>
    %c4_32 = arith.constant 4 : index
    %c0_33 = arith.constant 0 : index
    %c0_34 = arith.constant 0 : index
    %60 = vector.load %arg8[%c4_32, %c0_33, %c0_34] : memref<8x1x512xf32, #tpu.memory_space<vmem>>, vector<1x1x512xf32>
    %61 = vector.shape_cast %60 : vector<1x1x512xf32> to vector<1x512xf32>
    %62 = vector.broadcast %61 : vector<1x512xf32> to vector<32x512xf32>
    %63 = arith.mulf %59, %62 : vector<32x512xf32>
    %c5 = arith.constant 5 : index
    %c0_35 = arith.constant 0 : index
    %c0_36 = arith.constant 0 : index
    %64 = vector.load %arg4[%c5, %c0_35, %c0_36] : memref<9x32x1xf32, #tpu.memory_space<vmem>>, vector<1x32x1xf32>
    %65 = vector.shape_cast %64 : vector<1x32x1xf32> to vector<32x1xf32>
    %66 = vector.broadcast %65 : vector<32x1xf32> to vector<32x512xf32>
    %67 = arith.mulf %63, %66 : vector<32x512xf32>
    %68 = arith.addf %58, %67 : vector<32x512xf32>
    %c497_i32 = arith.constant 497 : i32
    %69 = tpu.dynamic_rotate %14 by %c497_i32 dim 1 : vector<32x512xf32>, i32 -> vector<32x512xf32>
    %c5_37 = arith.constant 5 : index
    %c0_38 = arith.constant 0 : index
    %c0_39 = arith.constant 0 : index
    %70 = vector.load %arg8[%c5_37, %c0_38, %c0_39] : memref<8x1x512xf32, #tpu.memory_space<vmem>>, vector<1x1x512xf32>
    %71 = vector.shape_cast %70 : vector<1x1x512xf32> to vector<1x512xf32>
    %72 = vector.broadcast %71 : vector<1x512xf32> to vector<32x512xf32>
    %73 = arith.mulf %69, %72 : vector<32x512xf32>
    %c6 = arith.constant 6 : index
    %c0_40 = arith.constant 0 : index
    %c0_41 = arith.constant 0 : index
    %74 = vector.load %arg4[%c6, %c0_40, %c0_41] : memref<9x32x1xf32, #tpu.memory_space<vmem>>, vector<1x32x1xf32>
    %75 = vector.shape_cast %74 : vector<1x32x1xf32> to vector<32x1xf32>
    %76 = vector.broadcast %75 : vector<32x1xf32> to vector<32x512xf32>
    %77 = arith.mulf %73, %76 : vector<32x512xf32>
    %78 = arith.addf %68, %77 : vector<32x512xf32>
    %c496_i32 = arith.constant 496 : i32
    %79 = tpu.dynamic_rotate %14 by %c496_i32 dim 1 : vector<32x512xf32>, i32 -> vector<32x512xf32>
    %c6_42 = arith.constant 6 : index
    %c0_43 = arith.constant 0 : index
    %c0_44 = arith.constant 0 : index
    %80 = vector.load %arg8[%c6_42, %c0_43, %c0_44] : memref<8x1x512xf32, #tpu.memory_space<vmem>>, vector<1x1x512xf32>
    %81 = vector.shape_cast %80 : vector<1x1x512xf32> to vector<1x512xf32>
    %82 = vector.broadcast %81 : vector<1x512xf32> to vector<32x512xf32>
    %83 = arith.mulf %79, %82 : vector<32x512xf32>
    %c7 = arith.constant 7 : index
    %c0_45 = arith.constant 0 : index
    %c0_46 = arith.constant 0 : index
    %84 = vector.load %arg4[%c7, %c0_45, %c0_46] : memref<9x32x1xf32, #tpu.memory_space<vmem>>, vector<1x32x1xf32>
    %85 = vector.shape_cast %84 : vector<1x32x1xf32> to vector<32x1xf32>
    %86 = vector.broadcast %85 : vector<32x1xf32> to vector<32x512xf32>
    %87 = arith.mulf %83, %86 : vector<32x512xf32>
    %88 = arith.addf %78, %87 : vector<32x512xf32>
    %c495_i32 = arith.constant 495 : i32
    %89 = tpu.dynamic_rotate %14 by %c495_i32 dim 1 : vector<32x512xf32>, i32 -> vector<32x512xf32>
    %c7_47 = arith.constant 7 : index
    %c0_48 = arith.constant 0 : index
    %c0_49 = arith.constant 0 : index
    %90 = vector.load %arg8[%c7_47, %c0_48, %c0_49] : memref<8x1x512xf32, #tpu.memory_space<vmem>>, vector<1x1x512xf32>
    %91 = vector.shape_cast %90 : vector<1x1x512xf32> to vector<1x512xf32>
    %92 = vector.broadcast %91 : vector<1x512xf32> to vector<32x512xf32>
    %93 = arith.mulf %89, %92 : vector<32x512xf32>
    %c8 = arith.constant 8 : index
    %c0_50 = arith.constant 0 : index
    %c0_51 = arith.constant 0 : index
    %94 = vector.load %arg4[%c8, %c0_50, %c0_51] : memref<9x32x1xf32, #tpu.memory_space<vmem>>, vector<1x32x1xf32>
    %95 = vector.shape_cast %94 : vector<1x32x1xf32> to vector<32x1xf32>
    %96 = vector.broadcast %95 : vector<32x1xf32> to vector<32x512xf32>
    %97 = arith.mulf %93, %96 : vector<32x512xf32>
    %98 = arith.addf %88, %97 : vector<32x512xf32>
    %c0_52 = arith.constant 0 : index
    %c0_53 = arith.constant 0 : index
    %99 = vector.load %arg5[%c0_52, %c0_53] : memref<32x1xf32, #tpu.memory_space<vmem>>, vector<32x1xf32>
    %100 = vector.broadcast %99 : vector<32x1xf32> to vector<32x512xf32>
    %101 = arith.addf %98, %100 : vector<32x512xf32>
    %cst_54 = arith.constant 5.000000e-01 : f32
    %102 = vector.broadcast %cst_54 : f32 to vector<32x512xf32>
    %103 = arith.mulf %102, %101 : vector<32x512xf32>
    %cst_55 = arith.constant 0.707106769 : f32
    %104 = vector.broadcast %cst_55 : f32 to vector<32x512xf32>
    %105 = arith.mulf %101, %104 : vector<32x512xf32>
    %106 = math.erf %105 : vector<32x512xf32>
    %cst_56 = arith.constant 1.000000e+00 : f32
    %107 = vector.broadcast %cst_56 : f32 to vector<32x512xf32>
    %108 = arith.addf %107, %106 : vector<32x512xf32>
    %109 = arith.mulf %103, %108 : vector<32x512xf32>
    %c0_57 = arith.constant 0 : index
    %c0_58 = arith.constant 0 : index
    %110 = vector.load %arg6[%c0_57, %c0_58] : memref<16x32xf32, #tpu.memory_space<vmem>>, vector<16x32xf32>
    %cst_59 = arith.constant dense<0.000000e+00> : vector<16x512xf32>
    %111 = tpu.matmul %110, %109, %cst_59 {dimension_numbers = #tpu.dot_dimension_numbers<[1], [0], [0], [1], [0, 0, 1, 1], [], []>} : vector<16x32xf32>, vector<32x512xf32>, vector<16x512xf32> -> vector<16x512xf32>
    %c0_60 = arith.constant 0 : index
    %c0_61 = arith.constant 0 : index
    %112 = vector.load %arg7[%c0_60, %c0_61] : memref<16x1xf32, #tpu.memory_space<vmem>>, vector<16x1xf32>
    %113 = vector.broadcast %112 : vector<16x1xf32> to vector<16x512xf32>
    %114 = arith.addf %111, %113 : vector<16x512xf32>
    %cst_62 = arith.constant 5.000000e-01 : f32
    %115 = vector.broadcast %cst_62 : f32 to vector<16x512xf32>
    %116 = arith.mulf %115, %114 : vector<16x512xf32>
    %cst_63 = arith.constant 0.707106769 : f32
    %117 = vector.broadcast %cst_63 : f32 to vector<16x512xf32>
    %118 = arith.mulf %114, %117 : vector<16x512xf32>
    %119 = math.erf %118 : vector<16x512xf32>
    %cst_64 = arith.constant 1.000000e+00 : f32
    %120 = vector.broadcast %cst_64 : f32 to vector<16x512xf32>
    %121 = arith.addf %120, %119 : vector<16x512xf32>
    %122 = arith.mulf %116, %121 : vector<16x512xf32>
    %c0_65 = arith.constant 0 : index
    %c0_66 = arith.constant 0 : index
    %c0_67 = arith.constant 0 : index
    %123 = vector.load %arg9[%c0_65, %c0_66, %c0_67] : memref<1x16x512xf32, #tpu.memory_space<vmem>>, vector<1x16x512xf32>
    %124 = vector.shape_cast %123 : vector<1x16x512xf32> to vector<16x512xf32>
    %125 = vector.shape_cast %122 : vector<16x512xf32> to vector<1x16x512xf32>
    tpu.vector_store %arg9[%c0_65, %c0_66, %c0_67], %125 {strides = array<i32>} : memref<1x16x512xf32, #tpu.memory_space<vmem>>, vector<1x16x512xf32>,
    return
  }
  func.func @transform_0(%arg0: i32) -> (i32, i32, i32) {
    %c0_i32 = arith.constant 0 : i32
    %c0_i32_0 = arith.constant 0 : i32
    %c0_i32_1 = arith.constant 0 : i32
    return %arg0, %c0_i32, %c0_i32_0 : i32, i32, i32
  }
  func.func @transform_1(%arg0: i32) -> (i32, i32) {
    %c0_i32 = arith.constant 0 : i32
    %c0_i32_0 = arith.constant 0 : i32
    %c0_i32_1 = arith.constant 0 : i32
    return %c0_i32, %c0_i32_0 : i32, i32
  }
  func.func @transform_2(%arg0: i32) -> (i32, i32) {
    %c0_i32 = arith.constant 0 : i32
    %c0_i32_0 = arith.constant 0 : i32
    %c0_i32_1 = arith.constant 0 : i32
    return %c0_i32, %c0_i32_0 : i32, i32
  }
  func.func @transform_3(%arg0: i32) -> (i32, i32, i32) {
    %c0_i32 = arith.constant 0 : i32
    %c0_i32_0 = arith.constant 0 : i32
    %c0_i32_1 = arith.constant 0 : i32
    %c0_i32_2 = arith.constant 0 : i32
    return %c0_i32, %c0_i32_0, %c0_i32_1 : i32, i32, i32
  }
  func.func @transform_4(%arg0: i32) -> (i32, i32) {
    %c0_i32 = arith.constant 0 : i32
    %c0_i32_0 = arith.constant 0 : i32
    %c0_i32_1 = arith.constant 0 : i32
    return %c0_i32, %c0_i32_0 : i32, i32
  }
  func.func @transform_5(%arg0: i32) -> (i32, i32) {
    %c0_i32 = arith.constant 0 : i32
    %c0_i32_0 = arith.constant 0 : i32
    %c0_i32_1 = arith.constant 0 : i32
    return %c0_i32, %c0_i32_0 : i32, i32
  }
  func.func @transform_6(%arg0: i32) -> (i32, i32) {
    %c0_i32 = arith.constant 0 : i32
    %c0_i32_0 = arith.constant 0 : i32
    %c0_i32_1 = arith.constant 0 : i32
    return %c0_i32, %c0_i32_0 : i32, i32
  }
  func.func @transform_7(%arg0: i32) -> (i32, i32, i32) {
    %c0_i32 = arith.constant 0 : i32
    %c0_i32_0 = arith.constant 0 : i32
    %c0_i32_1 = arith.constant 0 : i32
    %c0_i32_2 = arith.constant 0 : i32
    return %c0_i32, %c0_i32_0, %c0_i32_1 : i32, i32, i32
  }
  func.func @transform_8(%arg0: i32) -> (i32, i32, i32) {
    %c0_i32 = arith.constant 0 : i32
    %c0_i32_0 = arith.constant 0 : i32
    %c0_i32_1 = arith.constant 0 : i32
    return %arg0, %c0_i32, %c0_i32_0 : i32, i32, i32
  }
}

</mosaic_0001>

<bundles_post_ra>
// kernel: tpu_custom_call.1
= control target key start
LH: loop header
LB: loop body
LE: loop exit
PB: predicated region body
PF: predicated region fallthrough
CT: control target
= control target key end

     0   :  { %13 = vsyncpa [#allocation3], 0  ;;  %s7043_s0 = inlined_call_operand.vmem [shape: f32[2,16,512], index: 0, kind: input, shape index: {}]   ;;  %s7044_s1 = inlined_call_operand.vmem [shape: f32[32,16], index: 1, kind: input, shape index: {}]   ;;  %s7045_s2 = inlined_call_operand.vmem [shape: f32[32,1], index: 2, kind: input, shape index: {}]   ;;  %s7046_s3 = inlined_call_operand.vmem [shape: f32[9,32,1], index: 3, kind: input, shape index: {}]   ;;  %s7047_s4 = inlined_call_operand.vmem [shape: f32[32,1], index: 4, kind: input, shape index: {}]   ;;  %s7048_s5 = inlined_call_operand.vmem [shape: f32[16,32], index: 5, kind: input, shape index: {}]   ;;  %s7049_s6 = inlined_call_operand.vmem [shape: f32[16,1], index: 6, kind: input, shape index: {}]   ;;  %s7050_s7 = inlined_call_operand.vmem [shape: f32[8,1,512], index: 7, kind: input, shape index: {}]   ;;  %s7051_s8 = inlined_call_operand.hbm [shape: f32[2,16,512], index: 8, kind: output, shape index: {}]  }
   0x1   :  { %15 = vsyncpa [#allocation3 + $0x1], 0  ;;  %s3943_s27 = smov 0   ;;  %s3945_s28 = smov 0  }
   0x2   :  { %s3947_s29 = smov 0   ;;  %s3949_s30 = smov 0  }
   0x3 LB: > { %s3964_s9 = sadd.s32 4294967295, %s3885_s30   ;;  %s3573_s10 = sadd.s32 4294967294, %s3885_s30   ;;  %s3885_s30 = sphi %s3949_s30, %s7188_s30   ;;  %s3881_s29 = sphi %s3947_s29, %s7187_s29   ;;  %s3877_s28 = sphi %s3945_s28, %s7186_s28   ;;  %s3873_s27 = sphi %s3943_s27, %s7185_s27  }
   0x4   : > { %s3968_s11 = sadd.s32 1, %s3885_s30   ;;  %s201_s12 = sadd.s32 1, %s3881_s29 }
   0x5   : > { %s198_s13 = ssub.s32 %s3885_s30, %s3968_s11  ;;  %p211_p0 = scmp.ne.s32.totalorder %s3881_s29, %s3877_s28 }
   0x6   : > { %p199_p1 = scmp.eq.s32.totalorder %s198_s13, 0  ;;  %p212_p2 = scmp.eq.s32.totalorder %s3964_s9, 1 }
   0x7   : > { %p217_p3 = scmp.ne.s32.totalorder %s3877_s28, %s3873_s27  ;;  %p218_p4 = scmp.eq.s32.totalorder %s3573_s10, 1 }
   0x8   : > { %s3979_s14 = scalar_select %p199_p1, %s3881_s29, %s201_s12  }
   0x9   : > { %p3981_p5 = por %p212_p2, %p211_p0  ;;  %p3985_p6 = por %p218_p4, %p217_p3 }
   0xa   : > { %p3576_p7 = scmp.ge.s32.totalorder %s3885_s30, 1  ;;  %p265_p8 = scmp.lt.s32.totalorder %s3885_s30, 3 }
   0xc   : > { %p266_p9 = pnand %p3576_p7, %p265_p8 }
   0xe   : > { %269 = sbr.rel (%p266_p9) target bundleno = 1170 (0x492), region = 52 }
  0x13   : > { %v316_v0 = vld [vmem:[%s7045_s2] sm:$0xff]  ;;  %p299_p10 = scmp.lt.s32.totalorder %s3964_s9, 1  ;;  %v3887_v1 = vmov 0   ;;  %v318_v2 = vld [vmem:[%s7045_s2 + $0x10] sm:$0xff]  ;;  %v317_v6 = vld [vmem:[%s7045_s2 + $0x8] sm:$0xff]  ;;  %vm340_vm0 = vcmask 130048  }
  0x14   : > { %3740 = vset.pattern.permute.xlu0 %v3887_v1  ;;  %3741 = vset.pattern.permute.xlu1 %v3887_v1  ;;  %v312_v12 = vld [vmem:[%s7044_s1] sm:$0xff]  ;;  %v319_v13 = vld [vmem:[%s7045_s2 + $0x18] sm:$0xff]  ;;  %v3614_v14 = vld [vmem:[%s7046_s3 + $0x90] sm:$0xff]  ;;  %s3888_s10 = smov 16   ;;  %s3889_s12 = smov 17  }
  0x15   : > { %322 = vperm.xlu0 %3740, %v316_v0   ;;  %s300_s19 = scalar_select %p299_p10, %s3964_s9, 1  ;;  %3742 = vset.pattern.permute.xlu2 %v3887_v1  ;;  %v313_v15 = vld [vmem:[%s7044_s1 + $0x8] sm:$0xff]  ;;  %v3615_v16 = vld [vmem:[%s7046_s3 + $0x98] sm:$0xff]  ;;  %v3612_v17 = vld [vmem:[%s7046_s3 + $0x80] sm:$0xff] }
  0x16   : > { %332 = vperm.xlu1 %3741, %v318_v2   ;;  %1180 = vperm.xlu2 %3742, %v3612_v17   ;;  %v1291_v18 = vld [vmem:[%s7046_s3] sm:$0xff]  ;;  %v314_v19 = vld [vmem:[%s7044_s1 + $0x10] sm:$0xff]  ;;  %v3613_v20 = vld [vmem:[%s7046_s3 + $0x88] sm:$0xff]  ;;  %s3890_s18 = smov 15   ;;  %s3893_s24 = smov 113  }
  0x17   : > { %s3688_s20 = sshll.u32 %s300_s19, 6  ;;  %v1292_v21 = vld [vmem:[%s7046_s3 + $0x8] sm:$0xff]  ;;  %v1294_v22 = vld [vmem:[%s7046_s3 + $0x18] sm:$0xff]  ;;  %v3619_v24 = vld [vmem:[%s7046_s3 + $0x30] sm:$0xff]  ;;  %s3891_s19 = smov 1  }
  0x18   : > { %s303_s23 = scalar_lea.vmem %s7043_s0, %s3688_s20  ;;  %v315_v23 = vld [vmem:[%s7044_s1 + $0x18] sm:$0xff]  ;;  %v3618_v25 = vld [vmem:[%s7046_s3 + $0x28] sm:$0xff]  ;;  %v3622_v26 = vld [vmem:[%s7046_s3 + $0x40] sm:$0xff]  ;;  %s3894_s13 = smov 112  }
  0x19   : > { %v308_v3 = vld [vmem:[%s303_s23 + $0x20] sm:$0xff]  ;;  %v309_v4 = vld [vmem:[%s303_s23 + $0x28] sm:$0xff]  ;;  %v310_v5 = vld [vmem:[%s303_s23 + $0x30] sm:$0xff]  ;;  %s296_s20 = sand.u32 1, %s3877_s28  }
  0x1a   : > { %367 = vmatpush.msra.mxu0 %v308_v3  ;;  %396 = vmatpush.msra.mxu1 %v309_v4  ;;  %v311_v7 = vld [vmem:[%s303_s23 + $0x38] sm:$0xff]  ;;  %v304_v8 = vld [vmem:[%s303_s23] sm:$0xff]  ;;  %v305_v9 = vld [vmem:[%s303_s23 + $0x8] sm:$0xff]  ;;  %s3577_s21 = sshll.u32 %s296_s20, 6 }
  0x1b   : > { %425 = vmatpush.msra.mxu2 %v310_v5  ;;  %454 = vmatpush.msra.mxu3 %v311_v7  ;;  %v306_v10 = vld [vmem:[%s303_s23 + $0x10] sm:$0xff]  ;;  %v307_v11 = vld [vmem:[%s303_s23 + $0x18] sm:$0xff]  ;;  %s3892_s23 = smov 127   ;;  %s6919_s22 = scalar_lea.vmem [#allocation2], %s3577_s21 }
  0x1c   : > { %368 = vmatpush.msra.mxu0 %v304_v8  ;;  %397 = vmatpush.msra.mxu1 %v305_v9  ;;  %v3624_v27 = vld [vmem:[%s7046_s3 + $0x50] sm:$0xff]  ;;  %v3625_v28 = vld [vmem:[%s7046_s3 + $0x58] sm:$0xff]  ;;  %v3617_v9 = vld [vmem:[%s7046_s3 + $0x20] sm:$0xff]  ;;  %s3508_s25 = sshll.u32 %s6919_s22, 4  ;;  %s3843_s21 = scalar_lea.hbm %s7051_s8, 128  ;;  %s3509_s25 = int_to_ptr.vmem [resolvable:$true] %s3508_s25 }
  0x1d   : > { %426 = vmatpush.msra.mxu2 %v306_v10  ;;  %455 = vmatpush.msra.mxu3 %v307_v11  ;;  %v1293_v29 = vld [vmem:[%s7046_s3 + $0x10] sm:$0xff] }
  0x1e   : > { %327 = vperm.xlu0 %3740, %v317_v6   ;;  %3580 = vmatmul.msk.f32.vlgmr.msra.gmra.mxu0 %vm340_vm0, %v312_v12 }
  0x1f   : > { %3584 = vmatmul.msk.f32.vlgmr.msra.gmra.mxu1 %vm340_vm0, %v312_v12  ;;  %3588 = vmatmul.msk.f32.vlgmr.msra.gmra.mxu2 %vm340_vm0, %v312_v12 }
  0x20   : > { %3592 = vmatmul.msk.f32.vlgmr.msra.gmra.mxu3 %vm340_vm0, %v312_v12  ;;  %337 = vperm.xlu1 %3741, %v319_v13  }
  0x21   : > { %1185 = vperm.xlu2 %3742, %v3613_v20  }
  0x26   : > { %1190 = vperm.xlu0 %3740, %v3614_v14   ;;  %3581 = vmatmul.msk.f32.gmra.mxu0 %vm340_vm0, %v313_v15 }
  0x27   : > { %3585 = vmatmul.msk.f32.gmra.mxu1 %vm340_vm0, %v313_v15  ;;  %3589 = vmatmul.msk.f32.gmra.mxu2 %vm340_vm0, %v313_v15 }
  0x28   : > { %3593 = vmatmul.msk.f32.gmra.mxu3 %vm340_vm0, %v313_v15  ;;  %1195 = vperm.xlu1 %3741, %v3615_v16  }
  0x29   : > { %1307 = vperm.xlu2 %3742, %v1293_v29  }
  0x2e   : > { %1297 = vperm.xlu0 %3740, %v1291_v18   ;;  %3582 = vmatmul.msk.f32.gmra.mxu0 %vm340_vm0, %v314_v19 }
  0x2f   : > { %3586 = vmatmul.msk.f32.gmra.mxu1 %vm340_vm0, %v314_v19  ;;  %3590 = vmatmul.msk.f32.gmra.mxu2 %vm340_vm0, %v314_v19 }
  0x30   : > { %3594 = vmatmul.msk.f32.gmra.mxu3 %vm340_vm0, %v314_v19  ;;  %1302 = vperm.xlu1 %3741, %v1292_v21  }
  0x31   : > { %1430 = vperm.xlu2 %3742, %v3617_v9  }
  0x36   : > { %1312 = vperm.xlu0 %3740, %v1294_v22   ;;  %3583 = vmatmul.msk.f32.gmra.mxu0 %vm340_vm0, %v315_v23 }
  0x37   : > { %3591 = vmatmul.msk.f32.gmra.mxu2 %vm340_vm0, %v315_v23  ;;  %3587 = vmatmul.msk.f32.gmra.mxu1 %vm340_vm0, %v315_v23 }
  0x38   : > { %3595 = vmatmul.msk.f32.gmra.mxu3 %vm340_vm0, %v315_v23  ;;  %1440 = vperm.xlu1 %3741, %v3619_v24  }
  0x3e   : > { %1435 = vperm.xlu0 %3740, %v3618_v25  }
  0x40   : > { %1563 = vperm.xlu1 %3741, %v3622_v26  }
  0x46   : > { %1573 = vperm.xlu0 %3740, %v3624_v27  }
  0x48   : > { %1578 = vperm.xlu1 %3741, %v3625_v28  }
  0x87   : > { %v323_v30 = vpop.permute.xlu0 %322 }
  0x90   : > { %v4104_v55 = vpop.permute.xlu0 %327 }
  0x9b   : > { %v370_v31 = vpop.f32.mrf.mxu0 }
  0x9c   : > { %v4075_v32 = vadd.f32 %v370_v31, %v323_v30  ;;  %v399_v33 = vpop.f32.mrf.mxu1 }
  0x9d   : > { %v4077_v34 = vadd.f32 %v399_v33, %v323_v30 }
  0x9e   : > { %v4080_v35 = vmul.f32 0.70710677, %v4075_v32 }
  0x9f   : > { %v4083_v36 = vmul.f32 0.70710677, %v4077_v34 }
  0xa0   : > { %v501_v37 = vmul.f32 %v4080_v35, %v4080_v35 }
  0xa1   : > { %v541_v38 = vmul.f32 %v4083_v36, %v4083_v36 }
  0xa2   : > { %v4089_v39 = vmin.f32 %v501_v37, 16.0  ;;  %v428_v40 = vpop.f32.mrf.mxu2 }
  0xa3   : > { %v4091_v41 = vmin.f32 %v541_v38, 16.0  ;;  %v4093_v42 = vadd.f32 %v428_v40, %v323_v30  ;;  %v457_v43 = vpop.f32.mrf.mxu3  ;;  %v373_v52 = vpop.f32.mrf.mxu0 }
  0xa4   : > { %v503_v44 = vmul.f32 2.1237322e-06, %v4089_v39  ;;  %v514_v45 = vmul.f32 3.8918573e-05, %v4089_v39  ;;  %v4097_v46 = vadd.f32 %v457_v43, %v323_v30  ;;  %v4116_v62 = vadd.f32 %v373_v52, %v4104_v55  ;;  %v402_v20 = vpop.f32.mrf.mxu1 }
  0xa5   : > { %v543_v47 = vmul.f32 2.1237322e-06, %v4091_v41  ;;  %v554_v48 = vmul.f32 3.8918573e-05, %v4091_v41  ;;  %v4102_v51 = vmul.f32 0.70710677, %v4093_v42  ;;  %v4145_v33 = vadd.f32 %v402_v20, %v4104_v55 }
  0xa6   : > { %v504_v49 = vadd.f32 0.00028619796, %v503_v44  ;;  %v515_v50 = vadd.f32 0.001143296, %v514_v45  ;;  %v4111_v59 = vmul.f32 0.70710677, %v4097_v46 }
  0xa7   : > { %v544_v53 = vadd.f32 0.00028619796, %v543_v47  ;;  %v555_v54 = vadd.f32 0.001143296, %v554_v48  ;;  %v581_v58 = vmul.f32 %v4102_v51, %v4102_v51  ;;  %v4134_v13 = vmul.f32 0.70710677, %v4116_v62 }
  0xa8   : > { %v505_v56 = vmul.f32 %v504_v49, %v4089_v39  ;;  %v516_v57 = vmul.f32 %v515_v50, %v4089_v39  ;;  %v621_v2 = vmul.f32 %v4111_v59, %v4111_v59 }
  0xa9   : > { %v545_v60 = vmul.f32 %v544_v53, %v4091_v41  ;;  %v556_v61 = vmul.f32 %v555_v54, %v4091_v41  ;;  %v4118_v1 = vmin.f32 %v581_v58, 16.0  ;;  %v661_v43 = vmul.f32 %v4134_v13, %v4134_v13 }
  0xaa   : > { %v506_v63 = vadd.f32 0.0036580483, %v505_v56  ;;  %v517_v0 = vadd.f32 0.014752088, %v516_v57  ;;  %v4131_v12 = vmin.f32 %v621_v2, 16.0 }
  0xab   : > { %v546_v3 = vadd.f32 0.0036580483, %v545_v60  ;;  %v557_v4 = vadd.f32 0.014752088, %v556_v61  ;;  %v583_v7 = vmul.f32 2.1237322e-06, %v4118_v1 }
  0xac   : > { %v507_v5 = vmul.f32 %v506_v63, %v4089_v39  ;;  %v518_v6 = vmul.f32 %v517_v0, %v4089_v39  ;;  %v594_v8 = vmul.f32 3.8918573e-05, %v4118_v1  ;;  %v623_v24 = vmul.f32 2.1237322e-06, %v4131_v12 }
  0xad   : > { %v547_v10 = vmul.f32 %v546_v3, %v4091_v41  ;;  %v558_v11 = vmul.f32 %v557_v4, %v4091_v41  ;;  %v584_v16 = vadd.f32 0.00028619796, %v583_v7  ;;  %v634_v28 = vmul.f32 3.8918573e-05, %v4131_v12  ;;  %v431_v3 = vpop.f32.mrf.mxu2 }
  0xae   : > { %v508_v14 = vadd.f32 0.05243302, %v507_v5  ;;  %v519_v15 = vadd.f32 0.112945676, %v518_v6  ;;  %v595_v19 = vadd.f32 0.001143296, %v594_v8 }
  0xaf   : > { %v548_v17 = vadd.f32 0.05243302, %v547_v10  ;;  %v559_v18 = vadd.f32 0.112945676, %v558_v11  ;;  %v585_v23 = vmul.f32 %v584_v16, %v4118_v1  ;;  %v624_v48 = vadd.f32 0.00028619796, %v623_v24 }
  0xb0   : > { %v509_v21 = vmul.f32 %v508_v14, %v4089_v39  ;;  %v520_v22 = vmul.f32 %v519_v15, %v4089_v39  ;;  %v596_v27 = vmul.f32 %v595_v19, %v4118_v1  ;;  %v635_v53 = vadd.f32 0.001143296, %v634_v28 }
  0xb1   : > { %v549_v25 = vmul.f32 %v548_v17, %v4091_v41  ;;  %v560_v26 = vmul.f32 %v559_v18, %v4091_v41  ;;  %v586_v31 = vadd.f32 0.0036580483, %v585_v23  ;;  %v4158_v56 = vmul.f32 0.70710677, %v4145_v33 }
  0xb2   : > { %v510_v29 = vadd.f32 0.18741608, %v509_v21  ;;  %v521_v30 = vadd.f32 0.4994258, %v520_v22  ;;  %v597_v40 = vadd.f32 0.014752088, %v596_v27  ;;  %v636_v60 = vmul.f32 %v635_v53, %v4131_v12 }
  0xb3   : > { %v550_v37 = vadd.f32 0.18741608, %v549_v25  ;;  %v561_v38 = vadd.f32 0.4994258, %v560_v26  ;;  %v587_v47 = vmul.f32 %v586_v31, %v4118_v1  ;;  %v4165_v63 = vmin.f32 %v661_v43, 16.0 }
  0xb4   : > { %v511_v44 = vmul.f32 %v510_v29, %v4089_v39  ;;  %v522_v45 = vmul.f32 %v521_v30, %v4089_v39  ;;  %v598_v52 = vmul.f32 %v597_v40, %v4118_v1  ;;  %v625_v39 = vmul.f32 %v624_v48, %v4131_v12 }
  0xb5   : > { %v551_v49 = vmul.f32 %v550_v37, %v4091_v41  ;;  %v562_v50 = vmul.f32 %v561_v38, %v4091_v41  ;;  %v4168_v41 = vmul.f32 0.5, %v4075_v32  ;;  %v588_v2 = vadd.f32 0.05243302, %v587_v47 }
  0xb6   : > { %v4155_v54 = vadd.f32 1.0, %v522_v45  ;;  %v599_v58 = vadd.f32 0.112945676, %v598_v52  ;;  %v512_v61 = vadd.f32 1.1283791, %v511_v44  ;;  %v4172_v4 = vmul.f32 0.5, %v4077_v34 }
  0xb7   : > { %v4160_v57 = vadd.f32 1.0, %v562_v50  ;;  %v552_v0 = vadd.f32 1.1283791, %v551_v49  ;;  %v4175_v5 = vmul.f32 0.5, %v4093_v42  ;;  %v4178_v6 = vmul.f32 0.5, %v4097_v46 }
  0xb8   : > { %3743 = vrcp.f32 %v4155_v54  ;;  %v701_v7 = vmul.f32 %v4158_v56, %v4158_v56  ;;  %v533_v32 = vand.u32 2147483647, %v4155_v54  ;;  %v600_v8 = vmul.f32 %v599_v58, %v4118_v1 }
  0xb9   : > { %3745 = vrcp.f32 %v4160_v57  ;;  %v626_v9 = vadd.f32 0.0036580483, %v625_v39  ;;  %v637_v10 = vadd.f32 0.014752088, %v636_v60  ;;  %v513_v11 = vmul.f32 %v512_v61, %v4080_v35 }
  0xba   : > { %v535_v34 = vand.u32 2147483648, %v4155_v54  ;;  %v663_v14 = vmul.f32 2.1237322e-06, %v4165_v63  ;;  %v4188_v42 = vadd.f32 %v431_v3, %v4104_v55  ;;  %vm529_vm1 = vweird.f32 %v4155_v54 }
  0xbb   : > { %v553_v46 = vmul.f32 %v552_v0, %v4083_v36  ;;  %v589_v15 = vmul.f32 %v588_v2, %v4118_v1  ;;  %v601_v16 = vadd.f32 0.4994258, %v600_v8  ;;  %v638_v17 = vmul.f32 %v637_v10, %v4131_v12 }
  0xbc   : > { %vm569_vm2 = vweird.f32 %v4160_v57  ;;  %v627_v35 = vmul.f32 %v626_v9, %v4131_v12  ;;  %v664_v19 = vadd.f32 0.00028619796, %v663_v14  ;;  %v674_v20 = vmul.f32 3.8918573e-05, %v4165_v63  ;;  %v460_v9 = vpop.f32.mrf.mxu3 }
  0xbd   : > { %vm4198_vm3 = vcmp.eq.f32.partialorder %v533_v32, 8.507059e+37  ;;  %v573_v36 = vand.u32 2147483647, %v4160_v57  ;;  %v602_v24 = vmul.f32 %v601_v16, %v4118_v1  ;;  %v536_v25 = vor.u32 1.1754944e-38, %v535_v34 }
  0xbe   : > { %v3744_v18 = vpop.eup %3743  ;;  %v575_v27 = vand.u32 2147483648, %v4160_v57  ;;  %v639_v28 = vadd.f32 0.112945676, %v638_v17  ;;  %v590_v30 = vadd.f32 0.18741608, %v589_v15  ;;  %v665_v37 = vmul.f32 %v664_v19, %v4165_v63 }
  0xbf   : > { %v3746_v21 = vpop.eup %3745  ;;  %v525_v22 = vmul.f32 %v3744_v18, %v4155_v54  ;;  %v4206_v31 = vadd.f32 1.0, %v602_v24  ;;  %v628_v40 = vadd.f32 0.05243302, %v627_v35  ;;  %v675_v44 = vadd.f32 0.001143296, %v674_v20 }
  0xc0   : > { %v565_v26 = vmul.f32 %v3746_v21, %v4160_v57  ;;  %v640_v43 = vmul.f32 %v639_v28, %v4131_v12  ;;  %vm530_vm4 = vweird.f32 %v3744_v18  ;;  %vm4210_vm5 = vcmp.eq.f32.partialorder %v573_v36, 8.507059e+37 }
  0xc1   : > { %v526_v29 = vsub.f32 1.0, %v525_v22  ;;  %3747 = vrcp.f32 %v4206_v31  ;;  %vm570_vm6 = vweird.f32 %v3746_v21  ;;  %v4215_v50 = vmin.f32 %v701_v7, 16.0  ;;  %vm531_vm7 = vmor %vm529_vm1, %vm530_vm4 }
  0xc2   : > { %v566_v38 = vsub.f32 1.0, %v565_v26  ;;  %v641_v49 = vadd.f32 0.4994258, %v640_v43  ;;  %v576_v53 = vor.u32 1.1754944e-38, %v575_v27  ;;  %v666_v58 = vadd.f32 0.0036580483, %v665_v37  ;;  %vm571_vm8 = vmor %vm569_vm2, %vm570_vm6 }
  0xc3   : > { %v527_v45 = vmul.f32 %v3744_v18, %v526_v29  ;;  %v676_v39 = vmul.f32 %v675_v44, %v4165_v63  ;;  %v591_v61 = vmul.f32 %v590_v30, %v4118_v1  ;;  %v629_v0 = vmul.f32 %v628_v40, %v4131_v12 }
  0xc4   : > { %v567_v48 = vmul.f32 %v3746_v21, %v566_v38  ;;  %v642_v2 = vmul.f32 %v641_v49, %v4131_v12  ;;  %v615_v7 = vand.u32 2147483648, %v4206_v31  ;;  %v667_v32 = vmul.f32 %v666_v58, %v4165_v63 }
  0xc5   : > { %v528_v52 = vadd.f32 %v3744_v18, %v527_v45  ;;  %v677_v8 = vadd.f32 0.014752088, %v676_v39  ;;  %v703_v1 = vmul.f32 2.1237322e-06, %v4215_v50  ;;  %v630_v19 = vadd.f32 0.18741608, %v629_v0 }
  0xc6   : > { %v568_v60 = vadd.f32 %v3746_v21, %v567_v48  ;;  %v4229_v34 = vadd.f32 1.0, %v642_v2  ;;  %v668_v16 = vadd.f32 0.05243302, %v667_v32  ;;  %v4237_v20 = vadd.f32 %v460_v9, %v4104_v55 }
  0xc7   : > { %v532_v3 = vsel %vm531_vm7, %v3744_v18, %v528_v52  ;;  %v3748_v14 = vpop.eup %3747  ;;  %v678_v17 = vmul.f32 %v677_v8, %v4165_v63  ;;  %v592_v22 = vadd.f32 1.1283791, %v591_v61  ;;  %vm609_vm9 = vweird.f32 %v4206_v31 }
  0xc8   : > { %v537_v54 = vsel %vm4198_vm3, %v536_v25, %v532_v3  ;;  %v572_v10 = vsel %vm571_vm8, %v3746_v21, %v568_v60  ;;  %v605_v35 = vmul.f32 %v3748_v14, %v4206_v31  ;;  %3749 = vrcp.f32 %v4229_v34 }
  0xc9   : > { %v538_v15 = vmul.f32 %v537_v54, %v513_v11  ;;  %v577_v57 = vsel %vm4210_vm5, %v576_v53, %v572_v10  ;;  %v613_v36 = vand.u32 2147483647, %v4206_v31  ;;  %v669_v24 = vmul.f32 %v668_v16, %v4165_v63  ;;  %v4274_v54 = vpop.permute.xlu1 %332  ;;  %v376_v10 = vpop.f32.mrf.mxu0 }
  0xca   : > { %v578_v18 = vmul.f32 %v577_v57, %v553_v46  ;;  %v606_v23 = vsub.f32 1.0, %v605_v35  ;;  %v616_v46 = vor.u32 1.1754944e-38, %v615_v7  ;;  %v679_v26 = vadd.f32 0.112945676, %v678_v17  ;;  %v3620_v57 = vld [vmem:[%s7046_s3 + $0x38] sm:$0xff] }
  0xcb   : > { %v3596_v21 = vclamps-f32 %v538_v15, 1.0  ;;  %v704_v27 = vadd.f32 0.00028619796, %v703_v1  ;;  %vm610_vm10 = vweird.f32 %v3748_v14  ;;  %v631_v55 = vmul.f32 %v630_v19, %v4131_v12  ;;  %1445 = vperm.xlu2 %3742, %v3620_v57  }
  0xcc   : > { %v3597_v11 = vclamps-f32 %v578_v18, 1.0  ;;  %v607_v29 = vmul.f32 %v3748_v14, %v606_v23  ;;  %v680_v37 = vmul.f32 %v679_v26, %v4165_v63  ;;  %v714_v40 = vmul.f32 3.8918573e-05, %v4215_v50  ;;  %vm611_vm11 = vmor %vm609_vm9, %vm610_vm10 }
  0xcd   : > { %v1141_v25 = vadd.f32 1.0, %v3596_v21  ;;  %v705_v38 = vmul.f32 %v704_v27, %v4215_v50  ;;  %v670_v45 = vadd.f32 0.18741608, %v669_v24  ;;  %v4254_v47 = vmul.f32 0.70710677, %v4188_v42 }
  0xce   : > { %v1142_v28 = vadd.f32 1.0, %v3597_v11  ;;  %v608_v44 = vadd.f32 %v3748_v14, %v607_v29  ;;  %v3750_v48 = vpop.eup %3749  ;;  %v593_v12 = vmul.f32 %v592_v22, %v4102_v51  ;;  %v715_v52 = vadd.f32 0.001143296, %v714_v40 }
  0xcf   : > { %v4245_v30 = vmul.f32 %v1141_v25, %v4168_v41  ;;  %v681_v41 = vadd.f32 0.4994258, %v680_v37  ;;  %v706_v49 = vadd.f32 0.0036580483, %v705_v38  ;;  %vm614_vm12 = vcmp.eq.f32.partialorder %v613_v36, 8.507059e+37 }
  0xd0   : > { %v4251_v43 = vmul.f32 %v1142_v28, %v4172_v4  ;;  %v612_v4 = vsel %vm611_vm11, %v3748_v14, %v608_v44  ;;  %v632_v53 = vadd.f32 1.1283791, %v631_v55  ;;  %v645_v58 = vmul.f32 %v3750_v48, %v4229_v34 }
  0xd1   : > { %7083 = vst [vmem:[#allocation5_spill] sm:$0xff] %v4245_v30  ;;  %1347 = vrot.lane.b32.xlu1 %v4245_v30, %s3888_s10  ;;  %v617_v51 = vsel %vm614_vm12, %v616_v46, %v612_v4  ;;  %v653_v31 = vand.u32 2147483647, %v4229_v34  ;;  %v682_v39 = vmul.f32 %v681_v41, %v4165_v63  ;;  %v716_v60 = vmul.f32 %v715_v52, %v4215_v50 }
  0xd2   : > { %7084 = vst [vmem:[#allocation6_spill] sm:$0xff] %v4251_v43  ;;  %1222 = vrot.lane.b32.xlu0 %v4251_v43, %s3889_s12  ;;  %v618_v61 = vmul.f32 %v617_v51, %v593_v12  ;;  %v646_v0 = vsub.f32 1.0, %v645_v58  ;;  %v707_v2 = vmul.f32 %v706_v49, %v4215_v50  ;;  %v741_v3 = vmul.f32 %v4254_v47, %v4254_v47 }
  0xd3   : > { %v655_v7 = vand.u32 2147483648, %v4229_v34  ;;  %v671_v32 = vmul.f32 %v670_v45, %v4165_v63  ;;  %v4272_v8 = vadd.f32 1.0, %v682_v39  ;;  %v717_v9 = vadd.f32 0.014752088, %v716_v60 }
  0xd4   : > { %v3598_v1 = vclamps-f32 %v618_v61, 1.0  ;;  %v647_v14 = vmul.f32 %v3750_v48, %v646_v0  ;;  %vm650_vm13 = vweird.f32 %v3750_v48  ;;  %v4276_v15 = vmin.f32 %v741_v3, 16.0 }
  0xd5   : > { %v633_v16 = vmul.f32 %v632_v53, %v4111_v59  ;;  %vm649_vm14 = vweird.f32 %v4229_v34  ;;  %3751 = vrcp.f32 %v4272_v8  ;;  %v4285_v63 = vmul.f32 0.70710677, %v4237_v20 }
  0xd6   : > { %v648_v17 = vadd.f32 %v3750_v48, %v647_v14  ;;  %v708_v18 = vadd.f32 0.05243302, %v707_v2  ;;  %v718_v35 = vmul.f32 %v717_v9, %v4215_v50  ;;  %v4289_v19 = vadd.f32 %v376_v10, %v4274_v54  ;;  %vm651_vm15 = vmor %vm649_vm14, %vm650_vm13 }
  0xd7   : > { %vm654_vm0 = vcmp.eq.f32.partialorder %v653_v31, 8.507059e+37  ;;  %v656_v21 = vor.u32 1.1754944e-38, %v655_v7  ;;  %v743_v59 = vmul.f32 2.1237322e-06, %v4276_v15  ;;  %v754_v34 = vmul.f32 3.8918573e-05, %v4276_v15 }
  0xd8   : > { %v1143_v22 = vadd.f32 1.0, %v3598_v1  ;;  %v652_v11 = vsel %vm651_vm15, %v3750_v48, %v648_v17  ;;  %v672_v23 = vadd.f32 1.1283791, %v671_v32  ;;  %v719_v36 = vadd.f32 0.112945676, %v718_v35 }
  0xd9   : > { %1488 = vrot.lane.b32.xlu1 %v4251_v43, %s3890_s18  ;;  %v657_v24 = vsel %vm654_vm0, %v656_v21, %v652_v11  ;;  %v744_v25 = vadd.f32 0.00028619796, %v743_v59  ;;  %v755_v46 = vadd.f32 0.001143296, %v754_v34  ;;  %v781_v26 = vmul.f32 %v4285_v63, %v4285_v63 }
  0xda   : > { %1480 = vrot.lane.b32.xlu0 %v4245_v30, %s3890_s18  ;;  %v658_v27 = vmul.f32 %v657_v24, %v633_v16  ;;  %v709_v28 = vmul.f32 %v708_v18, %v4215_v50  ;;  %v720_v29 = vmul.f32 %v719_v36, %v4215_v50  ;;  %v4302_v55 = vmul.f32 0.70710677, %v4289_v19  ;;  %v405_v24 = vpop.f32.mrf.mxu1 }
  0xdb   : > { %v3752_v37 = vpop.eup %3751  ;;  %vm689_vm1 = vweird.f32 %v4272_v8  ;;  %v745_v38 = vmul.f32 %v744_v25, %v4276_v15  ;;  %v756_v40 = vmul.f32 %v755_v46, %v4276_v15  ;;  %v4307_v44 = vmin.f32 %v781_v26, 16.0 }
  0xdc   : > { %v4310_v45 = vmul.f32 %v1143_v22, %v4175_v5  ;;  %v3599_v48 = vclamps-f32 %v658_v27, 1.0  ;;  %v685_v12 = vmul.f32 %v3752_v37, %v4272_v8  ;;  %v693_v41 = vand.u32 2147483647, %v4272_v8 }
  0xdd   : > { %v721_v49 = vadd.f32 0.4994258, %v720_v29  ;;  %v746_v52 = vadd.f32 0.0036580483, %v745_v38  ;;  %v757_v4 = vadd.f32 0.014752088, %v756_v40  ;;  %v821_v53 = vmul.f32 %v4302_v55, %v4302_v55 }
  0xde   : > { %v686_v58 = vsub.f32 1.0, %v685_v12  ;;  %v695_v51 = vand.u32 2147483648, %v4272_v8  ;;  %v710_v31 = vadd.f32 0.18741608, %v709_v28  ;;  %v783_v39 = vmul.f32 2.1237322e-06, %v4307_v44 }
  0xdf   : > { %v722_v5 = vmul.f32 %v721_v49, %v4215_v50  ;;  %v747_v60 = vmul.f32 %v746_v52, %v4276_v15  ;;  %v758_v61 = vmul.f32 %v757_v4, %v4276_v15  ;;  %v794_v0 = vmul.f32 3.8918573e-05, %v4307_v44 }
  0xe0   : > { %v1144_v2 = vadd.f32 1.0, %v3599_v48  ;;  %v687_v3 = vmul.f32 %v3752_v37, %v686_v58  ;;  %vm690_vm2 = vweird.f32 %v3752_v37  ;;  %v784_v7 = vadd.f32 0.00028619796, %v783_v39 }
  0xe1   : > { %1230 = vrot.lane.b32.xlu1 %v4310_v45, %s3889_s12  ;;  %v4326_v32 = vadd.f32 1.0, %v722_v5  ;;  %v748_v9 = vadd.f32 0.05243302, %v747_v60  ;;  %v759_v10 = vadd.f32 0.112945676, %v758_v61  ;;  %v4328_v1 = vmin.f32 %v821_v53, 16.0  ;;  %vm691_vm3 = vmor %vm689_vm1, %vm690_vm2  ;;  %v434_v5 = vpop.f32.mrf.mxu2 }
  0xe2   : > { %1621 = vrot.lane.b32.xlu0 %v4251_v43, %s3891_s19  ;;  %v688_v14 = vadd.f32 %v3752_v37, %v687_v3  ;;  %v711_v57 = vmul.f32 %v710_v31, %v4215_v50  ;;  %v785_v16 = vmul.f32 %v784_v7, %v4307_v44  ;;  %v795_v17 = vadd.f32 0.001143296, %v794_v0 }
  0xe3   : > { %vm694_vm4 = vcmp.eq.f32.partialorder %v693_v41, 8.507059e+37  ;;  %v696_v18 = vor.u32 1.1754944e-38, %v695_v51  ;;  %3753 = vrcp.f32 %v4326_v32  ;;  %v823_v35 = vmul.f32 2.1237322e-06, %v4328_v1 }
  0xe4   : > { %v692_v21 = vsel %vm691_vm3, %v3752_v37, %v688_v14  ;;  %v749_v59 = vmul.f32 %v748_v9, %v4276_v15  ;;  %v760_v34 = vmul.f32 %v759_v10, %v4276_v15  ;;  %v786_v22 = vadd.f32 0.0036580483, %v785_v16 }
  0xe5   : > { %v4339_v50 = vmul.f32 %v1144_v2, %v4178_v6  ;;  %v4342_v11 = vmul.f32 0.5, %v4116_v62  ;;  %v697_v8 = vsel %vm694_vm4, %v696_v18, %v692_v21  ;;  %v796_v36 = vmul.f32 %v795_v17, %v4307_v44 }
  0xe6   : > { %v673_v25 = vmul.f32 %v672_v23, %v4134_v13  ;;  %v712_v46 = vadd.f32 1.1283791, %v711_v57  ;;  %v761_v26 = vadd.f32 0.4994258, %v760_v34  ;;  %v787_v27 = vmul.f32 %v786_v22, %v4307_v44 }
  0xe7   : > { %v797_v28 = vadd.f32 0.014752088, %v796_v36  ;;  %v824_v29 = vadd.f32 0.00028619796, %v823_v35  ;;  %v834_v37 = vmul.f32 3.8918573e-05, %v4328_v1  ;;  %v4352_v40 = vadd.f32 %v405_v24, %v4274_v54  ;;  %v463_v35 = vpop.f32.mrf.mxu3 }
  0xe8   : > { %v698_v6 = vmul.f32 %v697_v8, %v673_v25  ;;  %v750_v62 = vadd.f32 0.18741608, %v749_v59  ;;  %v762_v38 = vmul.f32 %v761_v26, %v4276_v15  ;;  %v788_v23 = vadd.f32 0.05243302, %v787_v27 }
  0xe9   : > { %1371 = vrot.lane.b32.xlu1 %v4339_v50, %s3888_s10  ;;  %v3754_v13 = vpop.eup %3753  ;;  %v798_v48 = vmul.f32 %v797_v28, %v4307_v44  ;;  %v825_v12 = vmul.f32 %v824_v29, %v4328_v1  ;;  %v835_v41 = vadd.f32 0.001143296, %v834_v37  ;;  %v4359_v49 = vmul.f32 0.5, %v4145_v33  ;;  %v3623_v29 = vld [vmem:[%s7046_s3 + $0x48] sm:$0xff] }
  0xea   : > { %1363 = vrot.lane.b32.xlu0 %v4310_v45, %s3888_s10  ;;  %v725_v52 = vmul.f32 %v3754_v13, %v4326_v32  ;;  %v733_v4 = vand.u32 2147483647, %v4326_v32  ;;  %v4364_v53 = vmul.f32 0.5, %v4237_v20  ;;  %v713_v58 = vmul.f32 %v712_v46, %v4158_v56  ;;  %1568 = vperm.xlu2 %3742, %v3623_v29  }
  0xeb   : > { %v4367_v51 = vadd.f32 1.0, %v762_v38  ;;  %v799_v31 = vadd.f32 0.112945676, %v798_v48  ;;  %v826_v39 = vadd.f32 0.0036580483, %v825_v12  ;;  %v3600_v60 = vclamps-f32 %v698_v6, 1.0 }
  0xec   : > { %v726_v61 = vsub.f32 1.0, %v725_v52  ;;  %v836_v0 = vmul.f32 %v835_v41, %v4328_v1  ;;  %v4371_v33 = vmul.f32 0.70710677, %v4352_v40  ;;  %v735_v2 = vand.u32 2147483648, %v4326_v32 }
  0xed   : > { %v751_v3 = vmul.f32 %v750_v62, %v4276_v15  ;;  %3755 = vrcp.f32 %v4367_v51  ;;  %v789_v56 = vmul.f32 %v788_v23, %v4307_v44  ;;  %vm730_vm5 = vweird.f32 %v3754_v13 }
  0xee   : > { %v727_v20 = vmul.f32 %v3754_v13, %v726_v61  ;;  %v800_v7 = vmul.f32 %v799_v31, %v4307_v44  ;;  %v4379_v9 = vadd.f32 %v434_v5, %v4274_v54  ;;  %vm729_vm6 = vweird.f32 %v4326_v32 }
  0xef   : > { %vm4382_vm7 = vcmp.eq.f32.partialorder %v733_v4, 8.507059e+37  ;;  %v827_v14 = vmul.f32 %v826_v39, %v4328_v1  ;;  %v837_v15 = vadd.f32 0.014752088, %v836_v0  ;;  %v1145_v57 = vadd.f32 1.0, %v3600_v60  ;;  %vm731_vm8 = vmor %vm729_vm6, %vm730_vm5 }
  0xf0   : > { %v728_v16 = vadd.f32 %v3754_v13, %v727_v20  ;;  %v801_v17 = vadd.f32 0.4994258, %v800_v7  ;;  %v861_v18 = vmul.f32 %v4371_v33, %v4371_v33  ;;  %v736_v32 = vor.u32 1.1754944e-38, %v735_v2 }
  0xf1   : > { %1629 = vrot.lane.b32.xlu1 %v4310_v45, %s3891_s19  ;;  %v752_v21 = vadd.f32 1.1283791, %v751_v3  ;;  %v790_v59 = vadd.f32 0.18741608, %v789_v56  ;;  %v838_v34 = vmul.f32 %v837_v15, %v4328_v1  ;;  %v828_v36 = vadd.f32 0.05243302, %v827_v14 }
  0xf2   : > { %1504 = vrot.lane.b32.xlu0 %v4339_v50, %s3890_s18  ;;  %v732_v22 = vsel %vm731_vm8, %v3754_v13, %v728_v16  ;;  %v802_v8 = vmul.f32 %v801_v17, %v4307_v44  ;;  %v4395_v24 = vmin.f32 %v861_v18, 16.0  ;;  %v4400_v27 = vmul.f32 0.70710677, %v4379_v9  ;;  %1214 = vrot.lane.b32.xlu2 %v4245_v30, %s3889_s12 }
  0xf3   : > { %v3756_v25 = vpop.eup %3755  ;;  %v737_v46 = vsel %vm4382_vm7, %v736_v32, %v732_v22  ;;  %v839_v26 = vadd.f32 0.112945676, %v838_v34  ;;  %v4403_v28 = vadd.f32 %v463_v35, %v4274_v54  ;;  %v4409_v37 = vmul.f32 %v1145_v57, %v4342_v11 }
  0xf4   : > { %v738_v6 = vmul.f32 %v737_v46, %v713_v58  ;;  %v765_v62 = vmul.f32 %v3756_v25, %v4367_v51  ;;  %v773_v38 = vand.u32 2147483647, %v4367_v51  ;;  %v775_v13 = vand.u32 2147483648, %v4367_v51 }
  0xf5   : > { %v4414_v23 = vadd.f32 1.0, %v802_v8  ;;  %v840_v54 = vmul.f32 %v839_v26, %v4328_v1  ;;  %v863_v48 = vmul.f32 2.1237322e-06, %v4395_v24  ;;  %v791_v52 = vmul.f32 %v790_v59, %v4307_v44 }
  0xf6   : > { %v3601_v12 = vclamps-f32 %v738_v6, 1.0  ;;  %v766_v41 = vsub.f32 1.0, %v765_v62  ;;  %v874_v11 = vmul.f32 3.8918573e-05, %v4395_v24  ;;  %vm769_vm9 = vweird.f32 %v4367_v51 }
  0xf7   : > { %3757 = vrcp.f32 %v4414_v23  ;;  %v829_v4 = vmul.f32 %v828_v36, %v4328_v1  ;;  %v901_v58 = vmul.f32 %v4400_v27, %v4400_v27  ;;  %vm770_vm10 = vweird.f32 %v3756_v25 }
  0xf8   : > { %v1146_v31 = vadd.f32 1.0, %v3601_v12  ;;  %v767_v39 = vmul.f32 %v3756_v25, %v766_v41  ;;  %v841_v5 = vadd.f32 0.4994258, %v840_v54  ;;  %vm4427_vm11 = vcmp.eq.f32.partialorder %v773_v38, 8.507059e+37  ;;  %vm4437_vm12 = vmor %vm769_vm9, %vm770_vm10 }
  0xf9   : > { %v776_v60 = vor.u32 1.1754944e-38, %v775_v13  ;;  %v864_v61 = vadd.f32 0.00028619796, %v863_v48  ;;  %v875_v0 = vadd.f32 0.001143296, %v874_v11  ;;  %v4443_v57 = vmin.f32 %v901_v58, 16.0 }
  0xfa   : > { %1216 = vrot.lane.b32.xlu0 %v4409_v37, %s3889_s12  ;;  %v4432_v2 = vmul.f32 %v1146_v31, %v4359_v49  ;;  %v768_v3 = vadd.f32 %v3756_v25, %v767_v39  ;;  %v792_v56 = vadd.f32 1.1283791, %v791_v52  ;;  %v842_v20 = vmul.f32 %v841_v5, %v4328_v1  ;;  %1355 = vrot.lane.b32.xlu2 %v4251_v43, %s3888_s10 }
  0xfb   : > { %v830_v10 = vadd.f32 0.18741608, %v829_v4  ;;  %v865_v14 = vmul.f32 %v864_v61, %v4395_v24  ;;  %v876_v15 = vmul.f32 %v875_v0, %v4395_v24  ;;  %v813_v16 = vand.u32 2147483647, %v4414_v23 }
  0xfc   : > { %7089 = vst [vmem:[#allocation7_spill] sm:$0xff] %v4432_v2  ;;  %v772_v49 = vsel %vm4437_vm12, %v3756_v25, %v768_v3  ;;  %v4448_v17 = vadd.f32 1.0, %v842_v20  ;;  %v4451_v51 = vmul.f32 0.70710677, %v4403_v28  ;;  %1224 = vrot.lane.b32.xlu1 %v4432_v2, %s3889_s12  ;;  %v753_v35 = vmul.f32 %v752_v21, %v4254_v47 }
  0xfd   : > { %v3758_v18 = vpop.eup %3757  ;;  %v866_v32 = vadd.f32 0.0036580483, %v865_v14  ;;  %v877_v59 = vadd.f32 0.014752088, %v876_v15  ;;  %v903_v34 = vmul.f32 2.1237322e-06, %v4443_v57  ;;  %v777_v22 = vsel %vm4427_vm11, %v776_v60, %v772_v49  ;;  %v379_v15 = vpop.f32.mrf.mxu0 }
  0xfe   : > { %v793_v8 = vmul.f32 %v792_v56, %v4285_v63  ;;  %v805_v36 = vmul.f32 %v3758_v18, %v4414_v23  ;;  %3759 = vrcp.f32 %v4448_v17  ;;  %vm809_vm13 = vweird.f32 %v4414_v23 }
  0xff   : > { %v815_v25 = vand.u32 2147483648, %v4414_v23  ;;  %v831_v46 = vmul.f32 %v830_v10, %v4328_v1  ;;  %v867_v47 = vmul.f32 %v866_v32, %v4395_v24  ;;  %v878_v26 = vmul.f32 %v877_v59, %v4395_v24  ;;  %v4497_v23 = vpop.permute.xlu1 %337 }
 0x100   : > { %v806_v21 = vsub.f32 1.0, %v805_v36  ;;  %v904_v29 = vadd.f32 0.00028619796, %v903_v34  ;;  %v941_v6 = vmul.f32 %v4451_v51, %v4451_v51  ;;  %v778_v63 = vmul.f32 %v777_v22, %v753_v35 }
 0x101   : > { %vm4473_vm14 = vcmp.eq.f32.partialorder %v813_v16, 8.507059e+37  ;;  %v868_v38 = vadd.f32 0.05243302, %v867_v47  ;;  %v914_v1 = vmul.f32 3.8918573e-05, %v4443_v57  ;;  %vm810_vm15 = vweird.f32 %v3758_v18 }
 0x102   : > { %1357 = vrot.lane.b32.xlu0 %v4432_v2, %s3888_s10  ;;  %v807_v13 = vmul.f32 %v3758_v18, %v806_v21  ;;  %v879_v54 = vadd.f32 0.112945676, %v878_v26  ;;  %v905_v48 = vmul.f32 %v904_v29, %v4443_v57  ;;  %v816_v12 = vor.u32 1.1754944e-38, %v815_v25  ;;  %vm811_vm1 = vmor %vm809_vm13, %vm810_vm15  ;;  %1613 = vrot.lane.b32.xlu2 %v4245_v30, %s3891_s19 }
 0x103   : > { %vm849_vm0 = vweird.f32 %v4448_v17  ;;  %v853_v41 = vand.u32 2147483647, %v4448_v17  ;;  %v915_v52 = vadd.f32 0.001143296, %v914_v1  ;;  %v869_v58 = vmul.f32 %v868_v38, %v4395_v24 }
 0x104   : > { %v3760_v11 = vpop.eup %3759  ;;  %v808_v4 = vadd.f32 %v3758_v18, %v807_v13  ;;  %v880_v31 = vmul.f32 %v879_v54, %v4395_v24  ;;  %v4483_v39 = vmin.f32 %v941_v6, 16.0  ;;  %1482 = vrot.lane.b32.xlu1 %v4409_v37, %s3890_s18  ;;  %v855_v44 = vand.u32 2147483648, %v4448_v17 }
 0x105   : > { %v845_v5 = vmul.f32 %v3760_v11, %v4448_v17  ;;  %v906_v60 = vadd.f32 0.0036580483, %v905_v48  ;;  %v916_v61 = vmul.f32 %v915_v52, %v4443_v57  ;;  %v3602_v0 = vclamps-f32 %v778_v63, 1.0  ;;  %v408_v48 = vpop.f32.mrf.mxu1 }
 0x106   : > { %v812_v3 = vsel %vm811_vm1, %v3758_v18, %v808_v4  ;;  %v881_v56 = vadd.f32 0.4994258, %v880_v31  ;;  %v943_v20 = vmul.f32 2.1237322e-06, %v4483_v39  ;;  %vm850_vm2 = vweird.f32 %v3760_v11 }
 0x107   : > { %v817_v7 = vsel %vm4473_vm14, %v816_v12, %v812_v3  ;;  %v846_v10 = vsub.f32 1.0, %v845_v5  ;;  %v917_v14 = vadd.f32 0.014752088, %v916_v61  ;;  %v832_v16 = vadd.f32 1.1283791, %v831_v46  ;;  %vm4506_vm3 = vmor %vm849_vm0, %vm850_vm2 }
 0x108   : > { %v818_v49 = vmul.f32 %v817_v7, %v793_v8  ;;  %v870_v35 = vadd.f32 0.18741608, %v869_v58  ;;  %v882_v32 = vmul.f32 %v881_v56, %v4395_v24  ;;  %v907_v59 = vmul.f32 %v906_v60, %v4443_v57 }
 0x109   : > { %v847_v18 = vmul.f32 %v3760_v11, %v846_v10  ;;  %v918_v34 = vmul.f32 %v917_v14, %v4443_v57  ;;  %v944_v22 = vadd.f32 0.00028619796, %v943_v20  ;;  %vm4510_vm4 = vcmp.eq.f32.partialorder %v853_v41, 8.507059e+37 }
 0x10a   : > { %1615 = vrot.lane.b32.xlu0 %v4409_v37, %s3891_s19  ;;  %v3603_v36 = vclamps-f32 %v818_v49, 1.0  ;;  %v883_v46 = vadd.f32 1.0, %v882_v32  ;;  %v4515_v47 = vadd.f32 %v379_v15, %v4497_v23  ;;  %v1147_v21 = vadd.f32 1.0, %v3602_v0  ;;  %1238 = vrot.lane.b32.xlu2 %v4339_v50, %s3889_s12 }
 0x10b   : > { %v848_v26 = vadd.f32 %v3760_v11, %v847_v18  ;;  %v856_v29 = vor.u32 1.1754944e-38, %v855_v44  ;;  %v919_v6 = vadd.f32 0.112945676, %v918_v34  ;;  %v871_v62 = vmul.f32 %v870_v35, %v4395_v24  ;;  %v437_v35 = vpop.f32.mrf.mxu2 }
 0x10c   : > { %v1148_v63 = vadd.f32 1.0, %v3603_v36  ;;  %3761 = vrcp.f32 %v883_v46  ;;  %v954_v17 = vmul.f32 3.8918573e-05, %v4483_v39  ;;  %1623 = vrot.lane.b32.xlu1 %v4432_v2, %s3891_s19  ;;  %v908_v1 = vadd.f32 0.05243302, %v907_v59 }
 0x10d   : > { %v852_v38 = vsel %vm4506_vm3, %v3760_v11, %v848_v26  ;;  %v920_v13 = vmul.f32 %v919_v6, %v4443_v57  ;;  %v945_v54 = vmul.f32 %v944_v22, %v4483_v39  ;;  %v475_v24 = vmul.f32 0.5, %v4188_v42 }
 0x10e   : > { %v4529_v12 = vmul.f32 %v1148_v63, %v4364_v53  ;;  %v833_v41 = vmul.f32 %v832_v16, %v4302_v55  ;;  %v857_v52 = vsel %vm4510_vm4, %v856_v29, %v852_v38  ;;  %v955_v11 = vadd.f32 0.001143296, %v954_v17 }
 0x10f   : > { %v921_v4 = vadd.f32 0.4994258, %v920_v13  ;;  %v4534_v58 = vmul.f32 %v1147_v21, %v475_v24  ;;  %v4537_v31 = vmul.f32 0.70710677, %v4515_v47  ;;  %v4540_v5 = vadd.f32 %v408_v48, %v4497_v23 }
 0x110   : > { %7098 = vst [vmem:[#allocation8_spill] sm:$0xff] %v4529_v12  ;;  %v872_v42 = vadd.f32 1.1283791, %v871_v62  ;;  %v909_v53 = vmul.f32 %v908_v1, %v4443_v57  ;;  %v946_v44 = vadd.f32 0.0036580483, %v945_v54  ;;  %v858_v61 = vmul.f32 %v857_v52, %v833_v41 }
 0x111   : > { %v922_v55 = vmul.f32 %v921_v4, %v4443_v57  ;;  %v956_v0 = vmul.f32 %v955_v11, %v4483_v39  ;;  %v981_v3 = vmul.f32 %v4537_v31, %v4537_v31  ;;  %v4550_v56 = vmul.f32 0.70710677, %v4540_v5 }
 0x112   : > { %1240 = vrot.lane.b32.xlu0 %v4529_v12, %s3889_s12  ;;  %v3762_v60 = vpop.eup %3761  ;;  %v4553_v20 = vmul.f32 0.5, %v4289_v19  ;;  %vm889_vm5 = vweird.f32 %v883_v46  ;;  %v893_v10 = vand.u32 2147483647, %v883_v46  ;;  %v895_v14 = vand.u32 2147483648, %v883_v46  ;;  %1496 = vrot.lane.b32.xlu2 %v4310_v45, %s3890_s18 }
 0x113   : > { %v885_v7 = vmul.f32 %v3762_v60, %v883_v46  ;;  %v4555_v15 = vadd.f32 1.0, %v922_v55  ;;  %v957_v49 = vadd.f32 0.014752088, %v956_v0  ;;  %v4557_v16 = vmin.f32 %v981_v3, 16.0 }
 0x114   : > { %1365 = vrot.lane.b32.xlu1 %v4534_v58, %s3888_s10  ;;  %vm890_vm6 = vweird.f32 %v3762_v60  ;;  %v947_v19 = vmul.f32 %v946_v44, %v4483_v39  ;;  %v1021_v18 = vmul.f32 %v4550_v56, %v4550_v56  ;;  %v3604_v59 = vclamps-f32 %v858_v61, 1.0 }
 0x115   : > { %v886_v32 = vsub.f32 1.0, %v885_v7  ;;  %v873_v34 = vmul.f32 %v872_v42, %v4371_v33  ;;  %v910_v22 = vadd.f32 0.18741608, %v909_v53  ;;  %3763 = vrcp.f32 %v4555_v15  ;;  %vm4574_vm7 = vmor %vm889_vm5, %vm890_vm6 }
 0x116   : > { %v958_v25 = vmul.f32 %v957_v49, %v4483_v39  ;;  %v983_v8 = vmul.f32 2.1237322e-06, %v4557_v16  ;;  %v4571_v21 = vadd.f32 %v437_v35, %v4497_v23  ;;  %vm4578_vm8 = vcmp.eq.f32.partialorder %v893_v10, 8.507059e+37 }
 0x117   : > { %v887_v36 = vmul.f32 %v3762_v60, %v886_v32  ;;  %v896_v33 = vor.u32 1.1754944e-38, %v895_v14  ;;  %v994_v6 = vmul.f32 3.8918573e-05, %v4557_v16  ;;  %v4583_v63 = vmin.f32 %v1021_v18, 16.0 }
 0x118   : > { %v948_v17 = vadd.f32 0.05243302, %v947_v19  ;;  %v959_v38 = vadd.f32 0.112945676, %v958_v25  ;;  %v984_v46 = vadd.f32 0.00028619796, %v983_v8  ;;  %v911_v13 = vmul.f32 %v910_v22, %v4443_v57 }
 0x119   : > { %v888_v62 = vadd.f32 %v3762_v60, %v887_v36  ;;  %v1149_v1 = vadd.f32 1.0, %v3604_v59  ;;  %v995_v54 = vadd.f32 0.001143296, %v994_v6  ;;  %v1023_v48 = vmul.f32 2.1237322e-06, %v4583_v63 }
 0x11a   : > { %1498 = vrot.lane.b32.xlu0 %v4534_v58, %s3890_s18  ;;  %v960_v41 = vmul.f32 %v959_v38, %v4483_v39  ;;  %v1034_v52 = vmul.f32 3.8918573e-05, %v4583_v63  ;;  %v4594_v4 = vmul.f32 0.70710677, %v4571_v21  ;;  %v985_v53 = vmul.f32 %v984_v46, %v4557_v16  ;;  %1637 = vrot.lane.b32.xlu2 %v4339_v50, %s3891_s19 }
 0x11b   : > { %v892_v24 = vsel %vm4574_vm7, %v3762_v60, %v888_v62  ;;  %v3764_v11 = vpop.eup %3763  ;;  %v996_v57 = vmul.f32 %v995_v54, %v4557_v16  ;;  %v1024_v55 = vadd.f32 0.00028619796, %v1023_v48  ;;  %vm929_vm9 = vweird.f32 %v4555_v15 }
 0x11c   : > { %v897_v42 = vsel %vm4578_vm8, %v896_v33, %v892_v24  ;;  %1506 = vrot.lane.b32.xlu1 %v4529_v12, %s3890_s18  ;;  %v925_v44 = vmul.f32 %v3764_v11, %v4555_v15  ;;  %v933_v60 = vand.u32 2147483647, %v4555_v15  ;;  %v949_v61 = vmul.f32 %v948_v17, %v4483_v39 }
 0x11d   : > { %v898_v0 = vmul.f32 %v897_v42, %v873_v34  ;;  %v935_v3 = vand.u32 2147483648, %v4555_v15  ;;  %v961_v7 = vadd.f32 0.4994258, %v960_v41  ;;  %v997_v10 = vadd.f32 0.014752088, %v996_v57 }
 0x11e   : > { %v926_v14 = vsub.f32 1.0, %v925_v44  ;;  %vm930_vm10 = vweird.f32 %v3764_v11  ;;  %v986_v49 = vadd.f32 0.0036580483, %v985_v53  ;;  %v1035_v35 = vadd.f32 0.001143296, %v1034_v52 }
 0x11f   : > { %v962_v32 = vmul.f32 %v961_v7, %v4483_v39  ;;  %v998_v19 = vmul.f32 %v997_v10, %v4557_v16  ;;  %v1025_v18 = vmul.f32 %v1024_v55, %v4583_v63  ;;  %v1061_v59 = vmul.f32 %v4594_v4, %v4594_v4  ;;  %vm4622_vm11 = vmor %vm929_vm9, %vm930_vm10  ;;  %v4651_v10 = vpop.permute.xlu0 %1190 }
 0x120   : > { %v4617_v34 = vmul.f32 %v1149_v1, %v4553_v20  ;;  %v912_v22 = vadd.f32 1.1283791, %v911_v13  ;;  %v927_v36 = vmul.f32 %v3764_v11, %v926_v14  ;;  %v1036_v25 = vmul.f32 %v1035_v35, %v4583_v63 }
 0x121   : > { %v3605_v8 = vclamps-f32 %v898_v0, 1.0  ;;  %v950_v29 = vadd.f32 0.18741608, %v949_v61  ;;  %v4626_v33 = vadd.f32 1.0, %v962_v32  ;;  %v999_v6 = vadd.f32 0.112945676, %v998_v19 }
 0x122   : > { %1639 = vrot.lane.b32.xlu0 %v4529_v12, %s3891_s19  ;;  %v928_v62 = vadd.f32 %v3764_v11, %v927_v36  ;;  %v936_v17 = vor.u32 1.1754944e-38, %v935_v3  ;;  %v987_v20 = vmul.f32 %v986_v49, %v4557_v16  ;;  %v1037_v38 = vadd.f32 0.014752088, %v1036_v25  ;;  %1349 = vrot.lane.b32.xlu2 %v4409_v37, %s3888_s10 }
 0x123   : > { %vm934_vm12 = vcmp.eq.f32.partialorder %v933_v60, 8.507059e+37  ;;  %3765 = vrcp.f32 %v4626_v33  ;;  %v1026_v46 = vadd.f32 0.0036580483, %v1025_v18  ;;  %v4630_v1 = vmin.f32 %v1061_v59, 16.0 }
 0x124   : > { %1218 = vrot.lane.b32.xlu1 %v4617_v34, %s3889_s12  ;;  %v478_v15 = vmul.f32 0.5, %v4352_v40  ;;  %v932_v13 = vsel %vm4622_vm11, %v3764_v11, %v928_v62  ;;  %v1000_v54 = vmul.f32 %v999_v6, %v4557_v16  ;;  %v1150_v48 = vadd.f32 1.0, %v3605_v8 }
 0x125   : > { %v913_v24 = vmul.f32 %v912_v22, %v4400_v27  ;;  %v951_v41 = vmul.f32 %v950_v29, %v4483_v39  ;;  %v1063_v52 = vmul.f32 2.1237322e-06, %v4630_v1  ;;  %v937_v42 = vsel %vm934_vm12, %v936_v17, %v932_v13  ;;  %v466_v27 = vpop.f32.mrf.mxu3  ;;  %v4663_v22 = vpop.permute.xlu1 %1195 }
 0x126   : > { %v988_v53 = vadd.f32 0.05243302, %v987_v20  ;;  %v1001_v57 = vadd.f32 0.4994258, %v1000_v54  ;;  %v1038_v55 = vmul.f32 %v1037_v38, %v4583_v63  ;;  %v1027_v44 = vmul.f32 %v1026_v46, %v4583_v63 }
 0x127   : > { %v1074_v60 = vmul.f32 3.8918573e-05, %v4630_v1  ;;  %v4649_v39 = vmul.f32 %v1150_v48, %v478_v15  ;;  %v938_v0 = vmul.f32 %v937_v42, %v913_v24  ;;  %v952_v3 = vadd.f32 1.1283791, %v951_v41 }
 0x128   : > { %v1002_v40 = vmul.f32 %v1001_v57, %v4557_v16  ;;  %v1039_v11 = vadd.f32 0.112945676, %v1038_v55  ;;  %v1064_v7 = vadd.f32 0.00028619796, %v1063_v52  ;;  %vm969_vm13 = vweird.f32 %v4626_v33 }
 0x129   : > { %v3766_v61 = vpop.eup %3765  ;;  %v975_v49 = vand.u32 2147483648, %v4626_v33  ;;  %v989_v35 = vmul.f32 %v988_v53, %v4557_v16  ;;  %v1028_v19 = vadd.f32 0.05243302, %v1027_v44  ;;  %v4661_v59 = vadd.f32 %v466_v27, %v4497_v23 }
 0x12a   : > { %1351 = vrot.lane.b32.xlu0 %v4617_v34, %s3888_s10  ;;  %v965_v14 = vmul.f32 %v3766_v61, %v4626_v33  ;;  %v4657_v32 = vadd.f32 1.0, %v1002_v40  ;;  %v1040_v18 = vmul.f32 %v1039_v11, %v4583_v63  ;;  %vm970_vm14 = vweird.f32 %v3766_v61  ;;  %1490 = vrot.lane.b32.xlu2 %v4432_v2, %s3890_s18 }
 0x12b   : > { %v973_v25 = vand.u32 2147483647, %v4626_v33  ;;  %v1075_v8 = vadd.f32 0.001143296, %v1074_v60  ;;  %v3606_v26 = vclamps-f32 %v938_v0, 1.0  ;;  %v976_v6 = vor.u32 1.1754944e-38, %v975_v49  ;;  %vm4673_vm15 = vmor %vm969_vm13, %vm970_vm14 }
 0x12c   : > { %1359 = vrot.lane.b32.xlu1 %v4649_v39, %s3888_s10  ;;  %v966_v36 = vsub.f32 1.0, %v965_v14  ;;  %3767 = vrcp.f32 %v4657_v32  ;;  %v990_v23 = vadd.f32 0.18741608, %v989_v35  ;;  %v1041_v62 = vadd.f32 0.4994258, %v1040_v18 }
 0x12d   : > { %v1029_v20 = vmul.f32 %v1028_v19, %v4583_v63  ;;  %v1065_v38 = vmul.f32 %v1064_v7, %v4630_v1  ;;  %v1076_v46 = vmul.f32 %v1075_v8, %v4630_v1  ;;  %v4681_v15 = vmul.f32 0.70710677, %v4661_v59  ;;  %v4714_v7 = vpop.permute.xlu1 %1302 }
 0x12e   : > { %v967_v29 = vmul.f32 %v3766_v61, %v966_v36  ;;  %v953_v13 = vmul.f32 %v952_v3, %v4451_v51  ;;  %vm974_vm0 = vcmp.eq.f32.partialorder %v973_v25, 8.507059e+37  ;;  %v1042_v33 = vmul.f32 %v1041_v62, %v4583_v63  ;;  %v4712_v3 = vpop.permute.xlu2 %1180 }
 0x12f   : > { %v479_v48 = vmul.f32 0.5, %v4379_v9  ;;  %v1151_v24 = vadd.f32 1.0, %v3606_v26  ;;  %v1077_v41 = vadd.f32 0.014752088, %v1076_v46  ;;  %v1101_v52 = vmul.f32 %v4681_v15, %v4681_v15  ;;  %v4702_v9 = vpop.permute.xlu0 %1297  ;;  %7108 = vst [vmem:[#allocation10_spill] sm:$0xff] %v4712_v3 }
 0x130   : > { %v968_v54 = vadd.f32 %v3766_v61, %v967_v29  ;;  %v991_v53 = vmul.f32 %v990_v23, %v4557_v16  ;;  %v4693_v57 = vadd.f32 1.0, %v1042_v33  ;;  %v1030_v44 = vadd.f32 0.18741608, %v1029_v20  ;;  %7107 = vst [vmem:[#allocation9_spill] sm:$0xff] %v4702_v9 }
 0x131   : > { %v1066_v40 = vadd.f32 0.0036580483, %v1065_v38  ;;  %v1078_v11 = vmul.f32 %v1077_v41, %v4630_v1  ;;  %v4707_v27 = vmin.f32 %v1101_v52, 16.0  ;;  %v480_v0 = vmul.f32 0.5, %v4403_v28 }
 0x132   : > { %1492 = vrot.lane.b32.xlu0 %v4649_v39, %s3890_s18  ;;  %v972_v42 = vsel %vm4673_vm15, %v3766_v61, %v968_v54  ;;  %v4695_v55 = vpop.eup %3767  ;;  %3769 = vrcp.f32 %v4693_v57  ;;  %v4709_v61 = vmul.f32 %v1151_v24, %v479_v48  ;;  %v992_v18 = vadd.f32 1.1283791, %v991_v53  ;;  %1232 = vrot.lane.b32.xlu2 %v4534_v58, %s3889_s12 }
 0x133   : > { %v977_v51 = vsel %vm974_vm0, %v976_v6, %v972_v42  ;;  %v1005_v16 = vmul.f32 %v4695_v55, %v4657_v32  ;;  %v1079_v35 = vadd.f32 0.112945676, %v1078_v11  ;;  %v1103_v19 = vmul.f32 2.1237322e-06, %v4707_v27 }
 0x134   : > { %1617 = vrot.lane.b32.xlu1 %v4617_v34, %s3891_s19  ;;  %v978_v60 = vmul.f32 %v977_v51, %v953_v13  ;;  %v1031_v36 = vmul.f32 %v1030_v44, %v4583_v63  ;;  %v1067_v25 = vmul.f32 %v1066_v40, %v4630_v1  ;;  %vm1009_vm1 = vweird.f32 %v4657_v32 }
 0x135   : > { %v1006_v49 = vsub.f32 1.0, %v1005_v16  ;;  %v1080_v26 = vmul.f32 %v1079_v35, %v4630_v1  ;;  %v1104_v29 = vadd.f32 0.00028619796, %v1103_v19  ;;  %vm1010_vm2 = vweird.f32 %v4695_v55 }
 0x136   : > { %v3607_v14 = vclamps-f32 %v978_v60, 1.0  ;;  %v1013_v6 = vand.u32 2147483647, %v4657_v32  ;;  %v1114_v23 = vmul.f32 3.8918573e-05, %v4707_v27  ;;  %v1015_v17 = vand.u32 2147483648, %v4657_v32  ;;  %vm4735_vm3 = vmor %vm1009_vm1, %vm1010_vm2 }
 0x137   : > { %v1007_v28 = vmul.f32 %v4695_v55, %v1006_v49  ;;  %v1081_v20 = vadd.f32 0.4994258, %v1080_v26  ;;  %v1105_v38 = vmul.f32 %v1104_v29, %v4707_v27  ;;  %v1032_v13 = vadd.f32 1.1283791, %v1031_v36  ;;  %v4746_v51 = vpop.permute.xlu0 %1312  ;;  %v4755_v49 = vpop.permute.xlu1 %1440 }
 0x138   : > { %v1152_v8 = vadd.f32 1.0, %v3607_v14  ;;  %v3770_v63 = vpop.eup %3769  ;;  %v1115_v33 = vadd.f32 0.001143296, %v1114_v23  ;;  %vm1049_vm4 = vweird.f32 %v4693_v57  ;;  %v1055_v32 = vand.u32 2147483648, %v4693_v57  ;;  %v4753_v14 = vpop.permute.xlu2 %1185 }
 0x139   : > { %v1008_v46 = vadd.f32 %v4695_v55, %v1007_v28  ;;  %v1045_v54 = vmul.f32 %v3770_v63, %v4693_v57  ;;  %v1068_v24 = vadd.f32 0.05243302, %v1067_v25  ;;  %v1082_v41 = vmul.f32 %v1081_v20, %v4630_v1 }
 0x13a   : > { %1234 = vrot.lane.b32.xlu0 %v4709_v61, %s3889_s12  ;;  %v4727_v62 = vmul.f32 %v1152_v8, %v480_v0  ;;  %vm1050_vm5 = vweird.f32 %v3770_v63  ;;  %v1053_v42 = vand.u32 2147483647, %v4693_v57  ;;  %v1116_v53 = vmul.f32 %v1115_v33, %v4707_v27  ;;  %1373 = vrot.lane.b32.xlu2 %v4529_v12, %s3888_s10 }
 0x13b   : > { %v1046_v52 = vsub.f32 1.0, %v1045_v54  ;;  %v1016_v44 = vor.u32 1.1754944e-38, %v1015_v17  ;;  %v4748_v40 = vadd.f32 1.0, %v1082_v41  ;;  %v1106_v11 = vadd.f32 0.0036580483, %v1105_v38  ;;  %vm1051_vm7 = vmor %vm1049_vm4, %vm1050_vm5 }
 0x13c   : > { %7109 = vst [vmem:[#allocation11_spill] sm:$0xff] %v4727_v62  ;;  %1242 = vrot.lane.b32.xlu1 %v4727_v62, %s3889_s12  ;;  %v1012_v60 = vsel %vm4735_vm3, %v4695_v55, %v1008_v46  ;;  %vm1014_vm6 = vcmp.eq.f32.partialorder %v1013_v6, 8.507059e+37  ;;  %v1117_v0 = vadd.f32 0.014752088, %v1116_v53  ;;  %v993_v35 = vmul.f32 %v992_v18, %v4537_v31 }
 0x13d   : > { %v1047_v16 = vmul.f32 %v3770_v63, %v1046_v52  ;;  %v1033_v19 = vmul.f32 %v1032_v13, %v4550_v56  ;;  %v1056_v36 = vor.u32 1.1754944e-38, %v1055_v32  ;;  %3771 = vrcp.f32 %v4748_v40 }
 0x13e   : > { %vm1054_vm8 = vcmp.eq.f32.partialorder %v1053_v42, 8.507059e+37  ;;  %v1069_v25 = vmul.f32 %v1068_v24, %v4630_v1  ;;  %v1118_v8 = vmul.f32 %v1117_v0, %v4707_v27  ;;  %v1017_v28 = vsel %vm1014_vm6, %v1016_v44, %v1012_v60 }
 0x13f   : > { %v1048_v55 = vadd.f32 %v3770_v63, %v1047_v16  ;;  %v1107_v26 = vmul.f32 %v1106_v11, %v4707_v27  ;;  %v1018_v57 = vmul.f32 %v1017_v28, %v993_v35  ;;  %v4779_v33 = vpop.permute.xlu0 %1435  ;;  %v4782_v52 = vpop.permute.xlu1 %1563  ;;  %vm1089_vm9 = vweird.f32 %v4748_v40 }
 0x140   : > { %v1119_v31 = vadd.f32 0.112945676, %v1118_v8  ;;  %v1070_v6 = vadd.f32 0.18741608, %v1069_v25  ;;  %v4774_v13 = vpop.permute.xlu2 %1307  ;;  %7112 = vst [vmem:[#allocation12_spill] sm:$0xff] %v4782_v52 }
 0x141   : > { %v1052_v29 = vsel %vm1051_vm7, %v3770_v63, %v1048_v55  ;;  %v1108_v20 = vadd.f32 0.05243302, %v1107_v26  ;;  %v482_v63 = vmul.f32 0.5, %v4540_v5  ;;  %v3608_v48 = vclamps-f32 %v1018_v57, 1.0 }
 0x142   : > { %1375 = vrot.lane.b32.xlu0 %v4727_v62, %s3888_s10  ;;  %v1057_v56 = vsel %vm1054_vm8, %v1056_v36, %v1052_v29  ;;  %v1120_v23 = vmul.f32 %v1119_v31, %v4707_v27  ;;  %v1071_v24 = vmul.f32 %v1070_v6, %v4630_v1  ;;  %v1095_v5 = vand.u32 2147483648, %v4748_v40  ;;  %1631 = vrot.lane.b32.xlu2 %v4534_v58, %s3891_s19 }
 0x143   : > { %v1058_v18 = vmul.f32 %v1057_v56, %v1033_v19  ;;  %v3772_v17 = vpop.eup %3771  ;;  %v1109_v42 = vmul.f32 %v1108_v20, %v4707_v27  ;;  %v1093_v11 = vand.u32 2147483647, %v4748_v40  ;;  %v481_v1 = vmul.f32 0.5, %v4515_v47 }
 0x144   : > { %1500 = vrot.lane.b32.xlu1 %v4709_v61, %s3890_s18  ;;  %v1085_v46 = vmul.f32 %v3772_v17, %v4748_v40  ;;  %v1121_v54 = vadd.f32 0.4994258, %v1120_v23  ;;  %vm1090_vm10 = vweird.f32 %v3772_v17  ;;  %v1153_v35 = vadd.f32 1.0, %v3608_v48 }
 0x145   : > { %v3609_v38 = vclamps-f32 %v1058_v18, 1.0  ;;  %vm1091_vm11 = vmor %vm1089_vm9, %vm1090_vm10  ;;  %v1072_v19 = vadd.f32 1.1283791, %v1071_v24  ;;  %v1110_v36 = vadd.f32 0.18741608, %v1109_v42  ;;  %v1096_v55 = vor.u32 1.1754944e-38, %v1095_v5 }
 0x146   : > { %v1086_v41 = vsub.f32 1.0, %v1085_v46  ;;  %v1122_v53 = vmul.f32 %v1121_v54, %v4707_v27  ;;  %vm1094_vm12 = vcmp.eq.f32.partialorder %v1093_v11, 8.507059e+37  ;;  %v4800_v8 = vmul.f32 %v1153_v35, %v481_v1 }
 0x147   : > { %v1154_v32 = vadd.f32 1.0, %v3609_v38  ;;  %v1073_v47 = vmul.f32 %v1072_v19, %v4594_v4  ;;  %v1111_v28 = vmul.f32 %v1110_v36, %v4707_v27  ;;  %v4804_v26 = vpop.permute.xlu0 %1573  ;;  %v4806_v31 = vpop.permute.xlu1 %1578 }
 0x148   : > { %v1087_v44 = vmul.f32 %v3772_v17, %v1086_v41  ;;  %v1123_v60 = vadd.f32 1.0, %v1122_v53  ;;  %v4796_v25 = vpop.permute.xlu2 %1430  ;;  %v483_v41 = vmul.f32 0.5, %v4571_v21 }
 0x149   : > { %v4794_v16 = vmul.f32 %v1154_v32, %v482_v63  ;;  %7113 = vst [vmem:[#allocation13_spill] sm:$0xff] %v4796_v25  ;;  %v1112_v6 = vadd.f32 1.1283791, %v1111_v28 }
 0x14a   : > { %1633 = vrot.lane.b32.xlu0 %v4709_v61, %s3891_s19  ;;  %v1088_v0 = vadd.f32 %v3772_v17, %v1087_v44  ;;  %3773 = vrcp.f32 %v1123_v60  ;;  %1226 = vrot.lane.b32.xlu2 %v4649_v39, %s3889_s12  ;;  %v1135_v23 = vand.u32 2147483648, %v1123_v60  ;;  %vm1129_vm13 = vweird.f32 %v1123_v60 }
 0x14b   : > { %v1133_v4 = vand.u32 2147483647, %v1123_v60  ;;  %v1113_v63 = vmul.f32 %v1112_v6, %v4681_v15 }
 0x14c   : > { %1641 = vrot.lane.b32.xlu1 %v4727_v62, %s3891_s19  ;;  %v1092_v40 = vsel %vm1091_vm11, %v3772_v17, %v1088_v0  ;;  %v1136_v46 = vor.u32 1.1754944e-38, %v1135_v23  ;;  %v484_v0 = vmul.f32 0.5, %v4661_v59 }
 0x14d   : > { %v1097_v29 = vsel %vm1094_vm12, %v1096_v55, %v1092_v40  ;;  %vm1134_vm0 = vcmp.eq.f32.partialorder %v1133_v4, 8.507059e+37  ;;  %v4854_v40 = vld [vmem:[%s7050_s7] sm:$0xf] }
 0x14e   : > { %v1098_v18 = vmul.f32 %v1097_v29, %v1073_v47  ;;  %v4862_v47 = vperm.slane %v4854_v40, 2 }
 0x14f   : > { %v4819_v48 = vpop.permute.xlu0 %1222  ;;  %v4821_v32 = vpop.permute.xlu1 %1347 }
 0x150   : > { %v3774_v56 = vpop.eup %3773  ;;  %v4812_v27 = vpop.permute.xlu2 %1445  ;;  %v3610_v38 = vclamps-f32 %v1098_v18, 1.0  ;;  %7114 = vst [vmem:[#allocation14_spill] sm:$0xff] %v4819_v48  ;;  %v4875_v18 = vld [vmem:[%s7050_s7 + $0x4] sm:$0xf] }
 0x151   : > { %v1125_v57 = vmul.f32 %v3774_v56, %v1123_v60  ;;  %vm1130_vm14 = vweird.f32 %v3774_v56  ;;  %7115 = vst [vmem:[#allocation15_spill] sm:$0xff] %v4821_v32  ;;  %v1246_v60 = vlaneseq  ;;  %v4880_v6 = vperm.slane %v4875_v18, 2 }
 0x152   : > { %1228 = vrot.lane.b32.xlu0 %v4794_v16, %s3889_s12  ;;  %vm1131_vm15 = vmor %vm1129_vm13, %vm1130_vm14  ;;  %1484 = vrot.lane.b32.xlu2 %v4617_v34, %s3890_s18  ;;  %v1155_v42 = vadd.f32 1.0, %v3610_v38 }
 0x153   : > { %v1126_v17 = vsub.f32 1.0, %v1125_v57  ;;  %v4845_v36 = vand.u32 127, %v1246_v60  ;;  %v4911_v60 = vld [vmem:[%s7050_s7 + $0x8] sm:$0xf] }
 0x154   : > { %1353 = vrot.lane.b32.xlu1 %v4800_v8, %s3888_s10  ;;  %v4830_v15 = vmul.f32 %v1155_v42, %v483_v41 }
 0x155   : > { %v1127_v20 = vmul.f32 %v3774_v56, %v1126_v17  ;;  %vm1248_vm1 = vcmp.lt.s32.totalorder %v4845_v36, 17  ;;  %vm1379_vm2 = vcmp.lt.s32.totalorder %v4845_v36, 16  ;;  %vm1512_vm3 = vcmp.lt.s32.totalorder %v4845_v36, 15 }
 0x156   : > { %vm1645_vm4 = vcmp.lt.s32.totalorder %v4845_v36, 1  ;;  %vm1778_vm5 = vcmp.lt.s32.totalorder %v4845_v36, 127  ;;  %vm1911_vm6 = vcmp.lt.s32.totalorder %v4845_v36, 113  ;;  %vm2044_vm7 = vcmp.lt.s32.totalorder %v4845_v36, 112 }
 0x157   : > { %v1128_v54 = vadd.f32 %v3774_v56, %v1127_v20  ;;  %v4836_v1 = vpop.permute.xlu0 %1480  ;;  %v4838_v21 = vpop.permute.xlu1 %1488  ;;  %vm2177_vm8 = vcmp.lt.s32.totalorder %v4845_v36, 111 }
 0x158   : > { %v4826_v5 = vpop.permute.xlu2 %1568  ;;  %7116 = vst [vmem:[#allocation16_spill] sm:$0xff] %v4836_v1 }
 0x159   : > { %v1132_v24 = vsel %vm1131_vm15, %v3774_v56, %v1128_v54  ;;  %7117 = vst [vmem:[#allocation17_spill] sm:$0xff] %v4838_v21 }
 0x15a   : > { %1486 = vrot.lane.b32.xlu0 %v4800_v8, %s3890_s18  ;;  %v1137_v53 = vsel %vm1134_vm0, %v1136_v46, %v1132_v24  ;;  %1625 = vrot.lane.b32.xlu2 %v4649_v39, %s3891_s19  ;;  %v1200_v46 = vmul.f32 %v4712_v3, %v4310_v45 }
 0x15b   : > { %v1138_v44 = vmul.f32 %v1137_v53, %v1113_v63  ;;  %v4900_v53 = vperm.slane %v4875_v18, 0 }
 0x15c   : > { %1494 = vrot.lane.b32.xlu1 %v4794_v16, %s3890_s18 }
 0x15d   : > { %v3611_v11 = vclamps-f32 %v1138_v44, 1.0  ;;  %v4903_v44 = vperm.slane %v4875_v18, 3 }
 0x15f   : > { %v1156_v35 = vadd.f32 1.0, %v3611_v11  ;;  %v4859_v59 = vpop.permute.xlu0 %1621  ;;  %v1231_v28 = vpop.permute.xlu1 %1230  ;;  %v4906_v11 = vperm.slane %v4854_v40, 0 }
 0x160   : > { %v4841_v19 = vpop.permute.xlu2 %1214  ;;  %v1253_v29 = vsel %vm1248_vm1, %v4819_v48, %v1231_v28  ;;  %v1198_v48 = vmul.f32 %v4712_v3, %v4245_v30 }
 0x161   : > { %7118 = vst [vmem:[#allocation18_spill] sm:$0xff] %v4841_v19  ;;  %v4847_v55 = vmul.f32 %v1156_v35, %v484_v0  ;;  %v1277_v57 = vmul.f32 %v4862_v47, %v1253_v29  ;;  %v4919_v35 = vperm.slane %v4854_v40, 3  ;;  %v4922_v29 = vperm.slane %v4911_v60, 0 }
 0x162   : > { %1627 = vrot.lane.b32.xlu0 %v4794_v16, %s3891_s19  ;;  %1367 = vrot.lane.b32.xlu2 %v4709_v61, %s3888_s10 }
 0x163   : > { %v1317_v23 = vmul.f32 %v4702_v9, %v1277_v57 }
 0x164   : > { %1236 = vrot.lane.b32.xlu1 %v4830_v15, %s3889_s12 }
 0x165   : > { %v1333_v24 = vadd.f32 %v1317_v23, %v1200_v46 }
 0x167   : > { %v1364_v17 = vpop.permute.xlu0 %1363  ;;  %v1372_v4 = vpop.permute.xlu1 %1371 }
 0x168   : > { %v4867_v56 = vpop.permute.xlu2 %1355  ;;  %v1380_v38 = vsel %vm1379_vm2, %v1364_v17, %v1372_v4  ;;  %v1392_v0 = vsel %vm1379_vm2, %v1372_v4, %v4821_v32 }
 0x169   : > { %7119 = vst [vmem:[#allocation19_spill] sm:$0xff] %v4867_v56  ;;  %v1384_v20 = vsel %vm1379_vm2, %v4867_v56, %v1364_v17  ;;  %v1407_v46 = vmul.f32 %v4900_v53, %v1392_v0  ;;  %v1201_v0 = vmul.f32 %v4712_v3, %v4339_v50 }
 0x16a   : > { %1369 = vrot.lane.b32.xlu0 %v4830_v15, %s3888_s10  ;;  %1508 = vrot.lane.b32.xlu2 %v4727_v62, %s3890_s18  ;;  %v1409_v54 = vmul.f32 %v4880_v6, %v1384_v20 }
 0x16c   : > { %1377 = vrot.lane.b32.xlu1 %v4847_v55, %s3888_s10  ;;  %v1450_v41 = vmul.f32 %v4796_v25, %v1409_v54  ;;  %v1410_v54 = vmul.f32 %v4903_v44, %v1380_v38 }
 0x16e   : > { %v1466_v42 = vadd.f32 %v1450_v41, %v1333_v24 }
 0x16f   : > { %v1505_v57 = vpop.permute.xlu0 %1504  ;;  %v1630_v23 = vpop.permute.xlu1 %1629 }
 0x170   : > { %v4893_v63 = vpop.permute.xlu2 %1613  ;;  %v1525_v17 = vsel %vm1512_vm3, %v1505_v57, %v4836_v1  ;;  %v4930_v4 = vsel %vm1645_vm4, %v4859_v59, %v1630_v23 }
 0x171   : > { %7120 = vst [vmem:[#allocation20_spill] sm:$0xff] %v4893_v63  ;;  %v1540_v56 = vmul.f32 %v4922_v29, %v1525_v17 }
 0x172   : > { %1510 = vrot.lane.b32.xlu0 %v4847_v55, %s3890_s18  ;;  %1220 = vrot.lane.b32.xlu2 %v4800_v8, %s3889_s12  ;;  %7121 = vst [vmem:[#allocation21_spill] sm:$0xff] %v4930_v4 }
 0x173   : > { %v1581_v3 = vmul.f32 %v4782_v52, %v1540_v56 }
 0x174   : > { %1635 = vrot.lane.b32.xlu1 %v4830_v15, %s3891_s19 }
 0x177   : > { %v4959_v63 = vpop.permute.xlu1 %1224 }
 0x178   : > { %v1239_v20 = vpop.permute.xlu2 %1238 }
 0x179   : > { %v1261_v24 = vsel %vm1248_vm1, %v1239_v20, %v4841_v19  ;;  %v1249_v41 = vsel %vm1248_vm1, %v1231_v28, %v1239_v20  ;;  %v1448_v28 = vmul.f32 %v4796_v25, %v1407_v46  ;;  %v1451_v20 = vmul.f32 %v4796_v25, %v1410_v54 }
 0x17a   : > { %v1275_v32 = vmul.f32 %v4906_v11, %v1261_v24  ;;  %v1278_v1 = vmul.f32 %v4919_v35, %v1249_v41  ;;  %1361 = vrot.lane.b32.xlu2 %v4794_v16, %s3888_s10  ;;  %v4953_v24 = vperm.slane %v4911_v60, 2  ;;  %v4956_v19 = vperm.slane %v4911_v60, 3 }
 0x17c   : > { %v1315_v38 = vmul.f32 %v4702_v9, %v1275_v32  ;;  %v1318_v4 = vmul.f32 %v4702_v9, %v1278_v1  ;;  %v1217_v32 = vpop.permute.xlu0 %1216 }
 0x17d   : > { %v1258_v1 = vsel %vm1248_vm1, %v1217_v32, %v4959_v63 }
 0x17e   : > { %v1331_v17 = vadd.f32 %v1315_v38, %v1198_v48  ;;  %v1334_v41 = vadd.f32 %v1318_v4, %v1201_v0 }
 0x180   : > { %v1497_v46 = vpop.permute.xlu2 %1496  ;;  %v1464_v9 = vadd.f32 %v1448_v28, %v1331_v17  ;;  %v1467_v54 = vadd.f32 %v1451_v20, %v1334_v41 }
 0x181   : > { %v1517_v48 = vsel %vm1512_vm3, %v4838_v21, %v1497_v46  ;;  %v1513_v4 = vsel %vm1512_vm3, %v1497_v46, %v1505_v57  ;;  %v1483_v21 = vpop.permute.xlu1 %1482  ;;  %v3628_v46 = vld [vmem:[%s7046_s3 + $0x68] sm:$0xff] }
 0x182   : > { %v1542_v0 = vmul.f32 %v4953_v24, %v1517_v48  ;;  %v1543_v56 = vmul.f32 %v4956_v19, %v1513_v4  ;;  %v4971_v38 = vadd.f32 %v1581_v3, %v1464_v9  ;;  %1619 = vrot.lane.b32.xlu2 %v4800_v8, %s3891_s19  ;;  %v4989_v3 = vperm.slane %v4854_v40, 1  ;;  %1701 = vperm.xlu1 %3741, %v3628_v46  }
 0x184   : > { %7122 = vst [vmem:[#allocation22_spill] sm:$0xff] %v4971_v38  ;;  %v1583_v25 = vmul.f32 %v4782_v52, %v1542_v0  ;;  %v1584_v28 = vmul.f32 %v4782_v52, %v1543_v56  ;;  %v1358_v41 = vpop.permute.xlu0 %1357  ;;  %v1203_v56 = vmul.f32 %v4753_v14, %v4432_v2 }
 0x185   : > { %7127 = vst [vmem:[#allocation27_spill] sm:$0xff] %v4989_v3 }
 0x186   : > { %v4977_v20 = vadd.f32 %v1583_v25, %v1466_v42  ;;  %v4979_v17 = vadd.f32 %v1584_v28, %v1467_v54  ;;  %v1280_v25 = vmul.f32 %v4989_v3, %v1258_v1  ;;  %v3627_v42 = vld [vmem:[%s7046_s3 + $0x60] sm:$0xff]  ;;  %v5008_v1 = vperm.slane %v4875_v18, 1 }
 0x187   : > { %1696 = vperm.xlu0 %3740, %v3627_v42   ;;  %v3630_v42 = vld [vmem:[%s7046_s3 + $0x78] sm:$0xff] }
 0x188   : > { %7123 = vst [vmem:[#allocation23_spill] sm:$0xff] %v4977_v20  ;;  %v4981_v57 = vpop.permute.xlu2 %1637  ;;  %v1320_v4 = vmul.f32 %v4714_v7, %v1280_v25 }
 0x189   : > { %7124 = vst [vmem:[#allocation24_spill] sm:$0xff] %v4979_v17  ;;  %v4986_v9 = vsel %vm1645_vm4, %v1630_v23, %v4981_v57  ;;  %v5000_v54 = vpop.permute.xlu1 %1623 }
 0x18a   : > { %7125 = vst [vmem:[#allocation25_spill] sm:$0xff] %v4981_v57  ;;  %1244 = vrot.lane.b32.xlu2 %v4847_v55, %s3889_s12  ;;  %v1336_v46 = vadd.f32 %v1320_v4, %v1203_v56  ;;  %1746 = vrot.lane.b32.xlu1 %v4245_v30, %s3892_s23  ;;  %v5029_v4 = vperm.slane %v4911_v60, 1  ;;  %s3895_s12 = smov 111  }
 0x18b   : > { %7126 = vst [vmem:[#allocation26_spill] sm:$0xff] %v4986_v9 }
 0x18c   : > { %v1616_v23 = vpop.permute.xlu0 %1615  ;;  %7129 = vst [vmem:[#allocation29_spill] sm:$0xff] %v5008_v1 }
 0x18d   : > { %v5005_v40 = vsel %vm1645_vm4, %v1616_v23, %v5000_v54  ;;  %7130 = vst [vmem:[#allocation30_spill] sm:$0xff] %v5029_v4 }
 0x18e   : > { %7128 = vst [vmem:[#allocation28_spill] sm:$0xff] %v5005_v40 }
 0x18f   : > { %1711 = vperm.xlu0 %3740, %v3630_v42  }
 0x190   : > { %v1350_v48 = vpop.permute.xlu2 %1349 }
 0x191   : > { %v1389_v0 = vsel %vm1379_vm2, %v1350_v48, %v1358_v41  ;;  %v1366_v17 = vpop.permute.xlu1 %1365 }
 0x192   : > { %v1412_v28 = vmul.f32 %v5008_v1, %v1389_v0  ;;  %1502 = vrot.lane.b32.xlu2 %v4830_v15, %s3890_s18  ;;  %v1385_v20 = vsel %vm1379_vm2, %v1358_v41, %v1366_v17  ;;  %1752 = vrot.lane.b32.xlu1 %v4800_v8, %s3892_s23  ;;  %s3689_s18 = sshll.u32 %s3964_s9, 6 }
 0x193   : > { %v1413_v38 = vmul.f32 %v4880_v6, %v1385_v20  ;;  %v1204_v20 = vmul.f32 %v4753_v14, %v4534_v58 }
 0x194   : > { %v1453_v18 = vmul.f32 %v4779_v33, %v1412_v28  ;;  %v1241_v52 = vpop.permute.xlu0 %1240 }
 0x195   : > { %v1262_v0 = vsel %vm1248_vm1, %v1241_v52, %v1217_v32 }
 0x196   : > { %v1469_v25 = vadd.f32 %v1453_v18, %v1336_v46 }
 0x197   : > { %1750 = vrot.lane.b32.xlu0 %v4617_v34, %s3892_s23 }
 0x198   : > { %v1491_v56 = vpop.permute.xlu2 %1490 }
 0x199   : > { %v1522_v28 = vsel %vm1512_vm3, %v1483_v21, %v1491_v56  ;;  %v1507_v41 = vpop.permute.xlu1 %1506 }
 0x19a   : > { %v1545_v42 = vmul.f32 %v5029_v4, %v1522_v28  ;;  %1643 = vrot.lane.b32.xlu2 %v4847_v55, %s3891_s19  ;;  %v1526_v28 = vsel %vm1512_vm3, %v1507_v41, %v1483_v21  ;;  %1768 = vrot.lane.b32.xlu1 %v4830_v15, %s3892_s23 }
 0x19c   : > { %v1586_v30 = vmul.f32 %v4826_v5, %v1545_v42  ;;  %v1499_v60 = vpop.permute.xlu0 %1498 }
 0x19d   : > { %v1518_v46 = vsel %vm1512_vm3, %v1491_v56, %v1499_v60  ;;  %v1514_v18 = vsel %vm1512_vm3, %v1499_v60, %v1507_v41  ;;  %v1279_v56 = vmul.f32 %v4906_v11, %v1262_v0 }
 0x19e   : > { %v5041_v32 = vadd.f32 %v1586_v30, %v1469_v25  ;;  %v3629_v30 = vld [vmem:[%s7046_s3 + $0x70] sm:$0xff]  ;;  %v1546_v41 = vmul.f32 %v4953_v24, %v1518_v46 }
 0x19f   : > { %v1319_v9 = vmul.f32 %v4714_v7, %v1279_v56  ;;  %1756 = vrot.lane.b32.xlu0 %v4432_v2, %s3892_s23 }
 0x1a0   : > { %7131 = vst [vmem:[#allocation31_spill] sm:$0xff] %v5041_v32  ;;  %v1233_v42 = vpop.permute.xlu2 %1232  ;;  %v1454_v32 = vmul.f32 %v4779_v33, %v1413_v38  ;;  %v1587_v0 = vmul.f32 %v4826_v5, %v1546_v41 }
 0x1a1   : > { %v1254_v40 = vsel %vm1248_vm1, %v4959_v63, %v1233_v42  ;;  %v1250_v25 = vsel %vm1248_vm1, %v1233_v42, %v1241_v52  ;;  %v1219_v42 = vpop.permute.xlu1 %1218 }
 0x1a2   : > { %v1281_v60 = vmul.f32 %v4862_v47, %v1254_v40  ;;  %v1282_v21 = vmul.f32 %v4919_v35, %v1250_v25  ;;  %1706 = vperm.xlu2 %3742, %v3629_v30   ;;  %v1202_v30 = vmul.f32 %v4753_v14, %v4409_v37  ;;  %v1205_v25 = vmul.f32 %v4753_v14, %v4529_v12 }
 0x1a3   : > { %1774 = vrot.lane.b32.xlu1 %v4727_v62, %s3892_s23 }
 0x1a4   : > { %v1321_v63 = vmul.f32 %v4714_v7, %v1281_v60  ;;  %v1322_v40 = vmul.f32 %v4714_v7, %v1282_v21  ;;  %v1640_v46 = vpop.permute.xlu0 %1639  ;;  %v1547_v7 = vmul.f32 %v4956_v19, %v1514_v18  ;;  %v1335_v41 = vadd.f32 %v1319_v9, %v1202_v30 }
 0x1a5   : > { %v5077_v38 = vsel %vm1645_vm4, %v1640_v46, %v1616_v23 }
 0x1a6   : > { %v1337_v52 = vadd.f32 %v1321_v63, %v1204_v20  ;;  %7132 = vst [vmem:[#allocation32_spill] sm:$0xff] %v5077_v38  ;;  %v1544_v20 = vmul.f32 %v4922_v29, %v1526_v28  ;;  %v1338_v23 = vadd.f32 %v1322_v40, %v1205_v25  ;;  %v1588_v9 = vmul.f32 %v4826_v5, %v1547_v7 }
 0x1a7   : > { %1766 = vrot.lane.b32.xlu0 %v4709_v61, %s3892_s23 }
 0x1a8   : > { %v1374_v56 = vpop.permute.xlu2 %1373  ;;  %v1470_v60 = vadd.f32 %v1454_v32, %v1337_v52 }
 0x1a9   : > { %v1393_v21 = vsel %vm1379_vm2, %v1374_v56, %v1350_v48  ;;  %v1381_v63 = vsel %vm1379_vm2, %v1366_v17, %v1374_v56  ;;  %v1585_v48 = vmul.f32 %v4826_v5, %v1544_v20  ;;  %v5101_v52 = vpop.permute.xlu1 %1359  ;;  %v1207_v20 = vmul.f32 %v4651_v10, %v4649_v39 }
 0x1aa   : > { %v1411_v2 = vmul.f32 %v4900_v53, %v1393_v21  ;;  %v1414_v38 = vmul.f32 %v4903_v44, %v1381_v63  ;;  %v5089_v57 = vadd.f32 %v1587_v0, %v1470_v60  ;;  %1748 = vrot.lane.b32.xlu2 %v4409_v37, %s3892_s23 }
 0x1ab   : > { %1909 = vrot.lane.b32.xlu1 %v4847_v55, %s3893_s24 }
 0x1ac   : > { %v1452_v14 = vmul.f32 %v4779_v33, %v1411_v2  ;;  %v1455_v32 = vmul.f32 %v4779_v33, %v1414_v38  ;;  %v1352_v28 = vpop.permute.xlu0 %1351 }
 0x1ad   : > { %v1390_v2 = vsel %vm1379_vm2, %v1352_v28, %v5101_v52 }
 0x1ae   : > { %v1471_v17 = vadd.f32 %v1455_v32, %v1338_v23  ;;  %v1468_v18 = vadd.f32 %v1452_v14, %v1335_v41 }
 0x1af   : > { %1901 = vrot.lane.b32.xlu0 %v4830_v15, %s3893_s24 }
 0x1b0   : > { %v1632_v33 = vpop.permute.xlu2 %1631  ;;  %v5106_v40 = vadd.f32 %v1585_v48, %v1468_v18  ;;  %v5108_v0 = vadd.f32 %v1588_v9, %v1471_v17 }
 0x1b1   : > { %v5113_v5 = vsel %vm1645_vm4, %v5000_v54, %v1632_v33  ;;  %v5117_v30 = vsel %vm1645_vm4, %v1632_v33, %v1640_v46  ;;  %v1618_v25 = vpop.permute.xlu1 %1617  ;;  %v1416_v54 = vmul.f32 %v5008_v1, %v1390_v2 }
 0x1b2   : > { %1754 = vrot.lane.b32.xlu2 %v4251_v43, %s3892_s23 }
 0x1b3   : > { %v1457_v21 = vmul.f32 %v4755_v49, %v1416_v54  ;;  %1772 = vrot.lane.b32.xlu1 %v4529_v12, %s3892_s23 }
 0x1b4   : > { %v1493_v38 = vpop.permute.xlu0 %1492 }
 0x1b7   : > { %1764 = vrot.lane.b32.xlu0 %v4534_v58, %s3892_s23 }
 0x1b8   : > { %v1227_v56 = vpop.permute.xlu2 %1226 }
 0x1b9   : > { %v1259_v60 = vsel %vm1248_vm1, %v1219_v42, %v1227_v56  ;;  %v1243_v23 = vpop.permute.xlu1 %1242 }
 0x1ba   : > { %v1284_v46 = vmul.f32 %v4989_v3, %v1259_v60  ;;  %1776 = vrot.lane.b32.xlu2 %v4847_v55, %s3892_s23  ;;  %v1263_v48 = vsel %vm1248_vm1, %v1243_v23, %v1219_v42 }
 0x1bb   : > { %v1283_v33 = vmul.f32 %v4906_v11, %v1263_v48  ;;  %1907 = vrot.lane.b32.xlu1 %v4727_v62, %s3893_s24  ;;  %v3635_v48 = vld [vmem:[%s7046_s3 + $0xb8] sm:$0xff] }
 0x1bc   : > { %v1324_v7 = vmul.f32 %v4774_v13, %v1284_v46  ;;  %v1235_v63 = vpop.permute.xlu0 %1234 }
 0x1bd   : > { %v1255_v14 = vsel %vm1248_vm1, %v1227_v56, %v1235_v63  ;;  %v1251_v32 = vsel %vm1248_vm1, %v1235_v63, %v1243_v23  ;;  %v1323_v54 = vmul.f32 %v4774_v13, %v1283_v33 }
 0x1be   : > { %v1340_v41 = vadd.f32 %v1324_v7, %v1207_v20 }
 0x1bf   : > { %1899 = vrot.lane.b32.xlu0 %v4709_v61, %s3893_s24 }
 0x1c0   : > { %v1485_v9 = vpop.permute.xlu2 %1484  ;;  %v1473_v17 = vadd.f32 %v1457_v21, %v1340_v41  ;;  %v1206_v41 = vmul.f32 %v4651_v10, %v4617_v34 }
 0x1c1   : > { %v1523_v18 = vsel %vm1512_vm3, %v1485_v9, %v1493_v38  ;;  %v1501_v46 = vpop.permute.xlu1 %1500 }
 0x1c2   : > { %v1549_v2 = vmul.f32 %v5029_v4, %v1523_v18  ;;  %1885 = vrot.lane.b32.xlu2 %v4800_v8, %s3893_s24  ;;  %v1519_v7 = vsel %vm1512_vm3, %v1493_v38, %v1501_v46  ;;  %v1286_v38 = vmul.f32 %v4919_v35, %v1251_v32 }
 0x1c3   : > { %2042 = vrot.lane.b32.xlu1 %v4847_v55, %s3894_s13 }
 0x1c4   : > { %v1590_v56 = vmul.f32 %v4804_v26, %v1549_v2  ;;  %v1376_v60 = vpop.permute.xlu0 %1375 }
 0x1c5   : > { %v1394_v20 = vsel %vm1379_vm2, %v1376_v60, %v1352_v28  ;;  %v1339_v28 = vadd.f32 %v1323_v54, %v1206_v41 }
 0x1c6   : > { %v5156_v42 = vadd.f32 %v1590_v56, %v1473_v17  ;;  %v1415_v63 = vmul.f32 %v4900_v53, %v1394_v20  ;;  %v1285_v17 = vmul.f32 %v4862_v47, %v1255_v14 }
 0x1c7   : > { %2034 = vrot.lane.b32.xlu0 %v4830_v15, %s3894_s13 }
 0x1c8   : > { %v1626_v21 = vpop.permute.xlu2 %1625  ;;  %v1456_v18 = vmul.f32 %v4755_v49, %v1415_v63  ;;  %v1325_v33 = vmul.f32 %v4774_v13, %v1285_v17  ;;  %v1208_v63 = vmul.f32 %v4651_v10, %v4709_v61  ;;  %v1550_v17 = vmul.f32 %v4953_v24, %v1519_v7 }
 0x1c9   : > { %v5168_v23 = vsel %vm1645_vm4, %v1618_v25, %v1626_v21  ;;  %v1642_v20 = vpop.permute.xlu1 %1641 }
 0x1ca   : > { %1844 = vperm.xlu2 %3742, %v3635_v48   ;;  %v1472_v2 = vadd.f32 %v1456_v18, %v1339_v28  ;;  %v5191_v32 = vsel %vm1645_vm4, %v1642_v20, %v1618_v25  ;;  %v1326_v48 = vmul.f32 %v4774_v13, %v1286_v38  ;;  %v1209_v25 = vmul.f32 %v4651_v10, %v4727_v62  ;;  %v3640_v13 = vld [vmem:[%s7046_s3 + $0xd8] sm:$0xff] }
 0x1cb   : > { %1760 = vrot.lane.b32.xlu1 %v4794_v16, %s3892_s23 }
 0x1cc   : > { %v1634_v56 = vpop.permute.xlu0 %1633  ;;  %v1342_v38 = vadd.f32 %v1326_v48, %v1209_v25 }
 0x1cd   : > { %v5183_v14 = vsel %vm1645_vm4, %v1626_v21, %v1634_v56  ;;  %v5187_v54 = vsel %vm1645_vm4, %v1634_v56, %v1642_v20  ;;  %v1341_v56 = vadd.f32 %v1325_v33, %v1208_v63 }
 0x1cf   : > { %1977 = vperm.xlu0 %3740, %v3640_v13  }
 0x1d0   : > { %v1368_v41 = vpop.permute.xlu2 %1367 }
 0x1d1   : > { %v1386_v21 = vsel %vm1379_vm2, %v5101_v52, %v1368_v41  ;;  %v1382_v28 = vsel %vm1379_vm2, %v1368_v41, %v1376_v60  ;;  %v1591_v60 = vmul.f32 %v4804_v26, %v1550_v17  ;;  %v1354_v63 = vpop.permute.xlu1 %1353 }
 0x1d2   : > { %v1417_v18 = vmul.f32 %v4880_v6, %v1386_v21  ;;  %v1418_v20 = vmul.f32 %v4903_v44, %v1382_v28  ;;  %1883 = vrot.lane.b32.xlu2 %v4617_v34, %s3893_s24 }
 0x1d3   : > { %1881 = vrot.lane.b32.xlu1 %v4409_v37, %s3893_s24 }
 0x1d4   : > { %v1458_v7 = vmul.f32 %v4755_v49, %v1417_v18  ;;  %v1459_v52 = vmul.f32 %v4755_v49, %v1418_v20  ;;  %v1229_v41 = vpop.permute.xlu0 %1228 }
 0x1d6   : > { %v1475_v10 = vadd.f32 %v1459_v52, %v1342_v38  ;;  %v1474_v33 = vadd.f32 %v1458_v7, %v1341_v56  ;;  %v3634_v38 = vld [vmem:[%s7046_s3 + $0xb0] sm:$0xff] }
 0x1d7   : > { %1770 = vrot.lane.b32.xlu0 %v4339_v50, %s3892_s23 }
 0x1d8   : > { %v1509_v21 = vpop.permute.xlu2 %1508  ;;  %v5216_v28 = vadd.f32 %v1591_v60, %v1474_v33 }
 0x1d9   : > { %v1527_v48 = vsel %vm1512_vm3, %v1509_v21, %v1485_v9  ;;  %v1515_v18 = vsel %vm1512_vm3, %v1501_v46, %v1509_v21  ;;  %v5236_v13 = vpop.permute.xlu1 %1494 }
 0x1da   : > { %v1548_v49 = vmul.f32 %v4922_v29, %v1527_v48  ;;  %v1551_v17 = vmul.f32 %v4956_v19, %v1515_v18  ;;  %2018 = vrot.lane.b32.xlu2 %v4800_v8, %s3894_s13  ;;  %v1211_v48 = vmul.f32 %v4663_v22, %v4794_v16 }
 0x1db   : > { %2016 = vrot.lane.b32.xlu1 %v4617_v34, %s3894_s13 }
 0x1dc   : > { %v1589_v25 = vmul.f32 %v4804_v26, %v1548_v49  ;;  %v1592_v20 = vmul.f32 %v4804_v26, %v1551_v17  ;;  %v1487_v56 = vpop.permute.xlu0 %1486 }
 0x1dd   : > { %v1524_v26 = vsel %vm1512_vm3, %v1487_v56, %v5236_v13 }
 0x1de   : > { %v5232_v9 = vadd.f32 %v1589_v25, %v1472_v2  ;;  %v5234_v46 = vadd.f32 %v1592_v20, %v1475_v10  ;;  %v1553_v49 = vmul.f32 %v5029_v4, %v1524_v26 }
 0x1df   : > { %1905 = vrot.lane.b32.xlu0 %v4529_v12, %s3893_s24 }
 0x1e0   : > { %v1221_v7 = vpop.permute.xlu2 %1220 }
 0x1e1   : > { %v1260_v52 = vsel %vm1248_vm1, %v1221_v7, %v1229_v41  ;;  %v1237_v33 = vpop.permute.xlu1 %1236 }
 0x1e2   : > { %v1288_v2 = vmul.f32 %v4989_v3, %v1260_v52  ;;  %1839 = vperm.xlu2 %3742, %v3634_v38   ;;  %v1256_v21 = vsel %vm1248_vm1, %v1229_v41, %v1237_v33  ;;  %v1594_v41 = vmul.f32 %v4806_v31, %v1553_v49 }
 0x1e3   : > { %v1289_v38 = vmul.f32 %v4862_v47, %v1256_v21  ;;  %2151 = vrot.lane.b32.xlu1 %v4800_v8, %s3895_s12 }
 0x1e4   : > { %v1328_v60 = vmul.f32 %v4746_v51, %v1288_v2  ;;  %v1628_v10 = vpop.permute.xlu0 %1627 }
 0x1e5   : > { %v1329_v2 = vmul.f32 %v4746_v51, %v1289_v38 }
 0x1e6   : > { %v1344_v25 = vadd.f32 %v1328_v60, %v1211_v48 }
 0x1e7   : > { %2040 = vrot.lane.b32.xlu0 %v4727_v62, %s3894_s13  ;;  %v7134_v62 = vld [vmem:[#allocation25_spill] sm:$0xff] }
 0x1e8   : > { %v1362_v18 = vpop.permute.xlu2 %1361 }
 0x1e9   : > { %v1391_v17 = vsel %vm1379_vm2, %v1354_v63, %v1362_v18  ;;  %v1378_v48 = vpop.permute.xlu1 %1377 }
 0x1ea   : > { %v1420_v20 = vmul.f32 %v5008_v1, %v1391_v17  ;;  %1762 = vrot.lane.b32.xlu2 %v4310_v45, %s3892_s23  ;;  %v1395_v49 = vsel %vm1379_vm2, %v1378_v48, %v1354_v63  ;;  %v1212_v17 = vmul.f32 %v4663_v22, %v4830_v15  ;;  %v3633_v63 = vld [vmem:[%s7046_s3 + $0xa8] sm:$0xff] }
 0x1eb   : > { %1834 = vperm.xlu1 %3741, %v3633_v63   ;;  %v1419_v63 = vmul.f32 %v4900_v53, %v1395_v49 }
 0x1ec   : > { %v1461_v52 = vmul.f32 %v4812_v27, %v1420_v20  ;;  %v1370_v60 = vpop.permute.xlu0 %1369 }
 0x1ed   : > { %v1387_v47 = vsel %vm1379_vm2, %v1362_v18, %v1370_v60  ;;  %v1383_v21 = vsel %vm1379_vm2, %v1370_v60, %v1378_v48  ;;  %v1345_v18 = vadd.f32 %v1329_v2, %v1212_v17  ;;  %v3626_v60 = vld [vmem:[%s7050_s7 + $0xc] sm:$0xf]  ;;  %v7133_v17 = vld [vmem:[#allocation20_spill] sm:$0xff] }
 0x1ee   : > { %v1477_v26 = vadd.f32 %v1461_v52, %v1344_v25  ;;  %v1421_v25 = vmul.f32 %v4880_v6, %v1387_v47  ;;  %v5303_v2 = vperm.slane %v3626_v60, 1  ;;  %v1422_v1 = vmul.f32 %v4903_v44, %v1383_v21  ;;  %v3645_v21 = vld [vmem:[%s7046_s3 + $0xf8] sm:$0xff] }
 0x1ef   : > { %2175 = vrot.lane.b32.xlu0 %v4847_v55, %s3895_s12  ;;  %v5318_v3 = vperm.slane %v3626_v60, 2  ;;  %v5320_v43 = vperm.slane %v3626_v60, 3 }
 0x1f0   : > { %v5278_v20 = vpop.permute.xlu2 %1619  ;;  %v5280_v4 = vadd.f32 %v1594_v41, %v1477_v26  ;;  %v1462_v52 = vmul.f32 %v4812_v27, %v1421_v25  ;;  %v1654_v25 = vsel %vm1645_vm4, %v7133_v17, %v4859_v59  ;;  %v1658_v59 = vsel %vm1645_vm4, %v7134_v62, %v7133_v17 }
 0x1f1   : > { %v5286_v38 = vsel %vm1645_vm4, %v5278_v20, %v1628_v10  ;;  %v5301_v26 = vpop.permute.xlu1 %1635 }
 0x1f2   : > { %1897 = vrot.lane.b32.xlu2 %v4534_v58, %s3893_s24  ;;  %v5297_v6 = vadd.f32 %v1462_v52, %v1345_v18  ;;  %v1653_v47 = vsel %vm1645_vm4, %v1628_v10, %v5301_v26  ;;  %v5314_v18 = vperm.slane %v3626_v60, 0 }
 0x1f3   : > { %1758 = vrot.lane.b32.xlu1 %v4649_v39, %s3892_s23 }
 0x1f4   : > { %v1511_v41 = vpop.permute.xlu0 %1510  ;;  %v1673_v60 = vmul.f32 %v5314_v18, %v1658_v59 }
 0x1f5   : > { %v1528_v48 = vsel %vm1512_vm3, %v1511_v41, %v1487_v56 }
 0x1f6   : > { %v1552_v44 = vmul.f32 %v4922_v29, %v1528_v48  ;;  %v1674_v29 = vmul.f32 %v5303_v2, %v1654_v25  ;;  %v7135_v48 = vld [vmem:[#allocation21_spill] sm:$0xff]  ;;  %v7138_v25 = vld [vmem:[#allocation32_spill] sm:$0xff] }
 0x1f7   : > { %2110 = vperm.xlu0 %3740, %v3645_v21  }
 0x1f8   : > { %v1245_v52 = vpop.permute.xlu2 %1244  ;;  %v1593_v17 = vmul.f32 %v4806_v31, %v1552_v44 }
 0x1f9   : > { %v1264_v56 = vsel %vm1248_vm1, %v1245_v52, %v1221_v7  ;;  %v1252_v10 = vsel %vm1248_vm1, %v1237_v33, %v1245_v52  ;;  %v1210_v7 = vmul.f32 %v4663_v22, %v4800_v8  ;;  %v1213_v33 = vmul.f32 %v4663_v22, %v4847_v55  ;;  %v7137_v52 = vld [vmem:[#allocation28_spill] sm:$0xff]  ;;  %v1702_v59 = vpop.permute.xlu1 %1701 }
 0x1fa   : > { %v1287_v12 = vmul.f32 %v4906_v11, %v1264_v56  ;;  %v1290_v53 = vmul.f32 %v4919_v35, %v1252_v10  ;;  %2032 = vrot.lane.b32.xlu2 %v4709_v61, %s3894_s13  ;;  %v1460_v11 = vmul.f32 %v4812_v27, %v1419_v63  ;;  %v1463_v35 = vmul.f32 %v4812_v27, %v1422_v1 }
 0x1fb   : > { %v1675_v8 = vmul.f32 %v5318_v3, %v7135_v48  ;;  %v1678_v27 = vmul.f32 %v5303_v2, %v7137_v52  ;;  %v1679_v1 = vmul.f32 %v5318_v3, %v5113_v5  ;;  %v1677_v63 = vmul.f32 %v5314_v18, %v7138_v25  ;;  %v7139_v25 = vld [vmem:[#allocation22_spill] sm:$0xff]  ;;  %1895 = vrot.lane.b32.xlu1 %v4310_v45, %s3893_s24 }
 0x1fc   : > { %v1327_v49 = vmul.f32 %v4746_v51, %v1287_v12  ;;  %v1330_v62 = vmul.f32 %v4746_v51, %v1290_v53  ;;  %v7136_v12 = vld [vmem:[#allocation26_spill] sm:$0xff]  ;;  %v1680_v56 = vmul.f32 %v5320_v43, %v5117_v30  ;;  %v1697_v10 = vpop.permute.xlu0 %1696 }
 0x1fd   : > { %v1676_v22 = vmul.f32 %v5320_v43, %v7136_v12 }
 0x1fe   : > { %v1343_v51 = vadd.f32 %v1327_v49, %v1210_v7  ;;  %v1346_v55 = vadd.f32 %v1330_v62, %v1213_v33  ;;  %v1714_v33 = vmul.f32 %v1697_v10, %v1673_v60  ;;  %v5363_v49 = vmul.f32 %v1697_v10, %v1674_v29  ;;  %v7140_v29 = vld [vmem:[#allocation23_spill] sm:$0xff] }
 0x1ff   : > { %v1716_v62 = vmul.f32 %v1697_v10, %v1675_v8  ;;  %v1717_v48 = vmul.f32 %v1697_v10, %v1676_v22  ;;  %v1720_v22 = vmul.f32 %v1702_v59, %v1679_v1  ;;  %1893 = vrot.lane.b32.xlu0 %v4794_v16, %s3893_s24 }
 0x200   : > { %v1503_v53 = vpop.permute.xlu2 %1502  ;;  %v1476_v21 = vadd.f32 %v1460_v11, %v1343_v51  ;;  %v1479_v7 = vadd.f32 %v1463_v35, %v1346_v55  ;;  %v5373_v11 = vadd.f32 %v1714_v33, %v7139_v25  ;;  %v1686_v35 = vmul.f32 %v5303_v2, %v5286_v38 }
 0x201   : > { %v1520_v44 = vsel %vm1512_vm3, %v5236_v13, %v1503_v53  ;;  %v1516_v5 = vsel %vm1512_vm3, %v1503_v53, %v1511_v41  ;;  %v5378_v60 = vadd.f32 %v1716_v62, %v7140_v29  ;;  %v7141_v13 = vld [vmem:[#allocation24_spill] sm:$0xff]  ;;  %v1718_v41 = vmul.f32 %v1702_v59, %v1677_v63 }
 0x202   : > { %v1554_v12 = vmul.f32 %v4953_v24, %v1520_v44  ;;  %v1555_v30 = vmul.f32 %v4956_v19, %v1516_v5  ;;  %v1609_v52 = vadd.f32 %v1593_v17, %v1476_v21  ;;  %v5381_v51 = vadd.f32 %v1717_v48, %v7141_v13  ;;  %2167 = vrot.lane.b32.xlu2 %v4830_v15, %s3895_s12  ;;  %v7143_v15 = vld [vmem:[#allocation31_spill] sm:$0xff] }
 0x203   : > { %v1719_v24 = vmul.f32 %v1702_v59, %v1678_v27  ;;  %v1687_v55 = vmul.f32 %v5318_v3, %v1653_v47  ;;  %v1721_v17 = vmul.f32 %v1702_v59, %v1680_v56  ;;  %v5389_v38 = vadd.f32 %v1718_v41, %v5106_v40  ;;  %v5405_v27 = vpop.permute.xlu1 %1746  ;;  %2030 = vrot.lane.b32.xlu1 %v4534_v58, %s3894_s13 }
 0x204   : > { %7142 = vst [vmem:[#allocation20_spill] sm:$0xff] %v5381_v51  ;;  %v1595_v8 = vmul.f32 %v4806_v31, %v1554_v12  ;;  %v1596_v19 = vmul.f32 %v4806_v31, %v1555_v30  ;;  %v5400_v31 = vadd.f32 %v1720_v22, %v5089_v57  ;;  %v1712_v40 = vpop.permute.xlu0 %1711  ;;  %v3639_v57 = vld [vmem:[%s7046_s3 + $0xd0] sm:$0xff]  ;;  %v1682_v48 = vmul.f32 %v5303_v2, %v5168_v23 }
 0x205   : > { %v5397_v53 = vadd.f32 %v1719_v24, %v7143_v15  ;;  %v5403_v47 = vadd.f32 %v1721_v17, %v5108_v0  ;;  %v1727_v56 = vmul.f32 %v1712_v40, %v1686_v35  ;;  %v1728_v59 = vmul.f32 %v1712_v40, %v1687_v55  ;;  %v3650_v15 = vld [vmem:[%s7046_s3 + $0x118] sm:$0xff] }
 0x206   : > { %v1611_v63 = vadd.f32 %v1595_v8, %v5297_v6  ;;  %v1612_v10 = vadd.f32 %v1596_v19, %v1479_v7  ;;  %v1681_v12 = vmul.f32 %v5314_v18, %v5191_v32  ;;  %v1684_v30 = vmul.f32 %v5320_v43, %v5187_v54  ;;  %v7144_v54 = vld [vmem:[#allocation5_spill] sm:$0xff] }
 0x207   : > { %v5419_v33 = vadd.f32 %v1727_v56, %v5280_v4  ;;  %2014 = vrot.lane.b32.xlu0 %v4409_v37, %s3894_s13  ;;  %v1683_v4 = vmul.f32 %v5318_v3, %v5183_v14 }
 0x208   : > { %v1644_v1 = vpop.permute.xlu2 %1643  ;;  %v5421_v44 = vadd.f32 %v1728_v59, %v1611_v63 }
 0x209   : > { %v1661_v6 = vsel %vm1645_vm4, %v1644_v1, %v5278_v20  ;;  %v1649_v21 = vsel %vm1645_vm4, %v5301_v26, %v1644_v1 }
 0x20a   : > { %v1685_v0 = vmul.f32 %v5314_v18, %v1661_v6  ;;  %v1688_v7 = vmul.f32 %v5320_v43, %v1649_v21  ;;  %1972 = vperm.xlu2 %3742, %v3639_v57   ;;  %v7146_v57 = vld [vmem:[#allocation11_spill] sm:$0xff] }
 0x20b   : > { %v5441_v35 = vpop.permute.xlu1 %1752  ;;  %2165 = vrot.lane.b32.xlu1 %v4709_v61, %s3895_s12  ;;  %v5479_v61 = vld [vmem:[%s7050_s7 + $0x10] sm:$0xf] }
 0x20c   : > { %v1726_v5 = vmul.f32 %v1712_v40, %v1685_v0  ;;  %v1729_v20 = vmul.f32 %v1712_v40, %v1688_v7  ;;  %v5439_v25 = vpop.permute.xlu0 %1750  ;;  %v5482_v2 = vperm.slane %v5479_v61, 3  ;;  %v5485_v18 = vperm.slane %v5479_v61, 2  ;;  %v7145_v40 = vld [vmem:[#allocation8_spill] sm:$0xff] }
 0x20d   : > { %v5525_v0 = vperm.slane %v5479_v61, 1 }
 0x20e   : > { %v5427_v26 = vadd.f32 %v1726_v5, %v1609_v52  ;;  %v5429_v62 = vadd.f32 %v1729_v20, %v1612_v10 }
 0x20f   : > { %2149 = vrot.lane.b32.xlu0 %v4617_v34, %s3895_s12  ;;  %v3638_v34 = vld [vmem:[%s7046_s3 + $0xc8] sm:$0xff] }
 0x210   : > { %v1707_v52 = vpop.permute.xlu2 %1706 }
 0x211   : > { %v1722_v29 = vmul.f32 %v1707_v52, %v1681_v12  ;;  %v1723_v13 = vmul.f32 %v1707_v52, %v1682_v48  ;;  %v1724_v41 = vmul.f32 %v1707_v52, %v1683_v4  ;;  %v1725_v8 = vmul.f32 %v1707_v52, %v1684_v30  ;;  %v3644_v30 = vld [vmem:[%s7046_s3 + $0xf0] sm:$0xff] }
 0x212   : > { %1879 = vrot.lane.b32.xlu2 %v7144_v54, %s3893_s24 }
 0x213   : > { %v5444_v23 = vadd.f32 %v1722_v29, %v5232_v9  ;;  %v5447_v3 = vadd.f32 %v1723_v13, %v5156_v42  ;;  %v5450_v14 = vadd.f32 %v1724_v41, %v5216_v28  ;;  %v5453_v43 = vadd.f32 %v1725_v8, %v5234_v46  ;;  %v5461_v9 = vpop.permute.xlu1 %1768  ;;  %v3632_v46 = vld [vmem:[%s7046_s3 + $0xa0] sm:$0xff]  ;;  %1967 = vperm.xlu1 %3741, %v3638_v34  }
 0x214   : > { %v1757_v32 = vpop.permute.xlu0 %1756 }
 0x217   : > { %1829 = vperm.xlu0 %3740, %v3632_v46  }
 0x218   : > { %v1749_v42 = vpop.permute.xlu2 %1748 }
 0x219   : > { %v5466_v28 = vsel %vm1778_vm5, %v1749_v42, %v1757_v32 }
 0x21a   : > { %1903 = vrot.lane.b32.xlu2 %v4339_v50, %s3893_s24 }
 0x21b   : > { %v1775_v24 = vpop.permute.xlu1 %1774  ;;  %1891 = vrot.lane.b32.xlu1 %v4649_v39, %s3893_s24 }
 0x21c   : > { %v5487_v19 = vpop.permute.xlu0 %1766  ;;  %v1793_v17 = vsel %vm1778_vm5, %v1775_v24, %v5439_v25 }
 0x21d   : > { %v1781_v55 = vsel %vm1778_vm5, %v5487_v19, %v1775_v24  ;;  %v5501_v10 = vmul.f32 %v5482_v2, %v1793_v17 }
 0x21e   : > { %v5498_v63 = vmul.f32 %v5485_v18, %v1781_v55  ;;  %v3637_v55 = vld [vmem:[%s7046_s3 + $0xc0] sm:$0xff] }
 0x21f   : > { %2243 = vperm.xlu0 %3740, %v3650_v15   ;;  %v5570_v15 = vld [vmem:[%s7050_s7 + $0x14] sm:$0xf] }
 0x220   : > { %v5489_v22 = vpop.permute.xlu2 %1754 }
 0x222   : > { %2038 = vrot.lane.b32.xlu2 %v7145_v40, %s3894_s13 }
 0x223   : > { %v1910_v56 = vpop.permute.xlu1 %1909  ;;  %2028 = vrot.lane.b32.xlu1 %v4310_v45, %s3894_s13 }
 0x224   : > { %v5510_v1 = vpop.permute.xlu0 %1901 }
 0x227   : > { %2026 = vrot.lane.b32.xlu0 %v4794_v16, %s3894_s13 }
 0x228   : > { %v1777_v59 = vpop.permute.xlu2 %1776 }
 0x229   : > { %v1794_v6 = vsel %vm1778_vm5, %v1777_v59, %v5441_v35  ;;  %v1782_v21 = vsel %vm1778_vm5, %v5461_v9, %v1777_v59 }
 0x22a   : > { %2173 = vrot.lane.b32.xlu2 %v7146_v57, %s3895_s12  ;;  %v1820_v41 = vmul.f32 %v5485_v18, %v1782_v21  ;;  %v1821_v8 = vmul.f32 %v5482_v2, %v1794_v6  ;;  %v1915_v57 = vsel %vm1911_vm6, %v5510_v1, %v1910_v56 }
 0x22b   : > { %v1773_v5 = vpop.permute.xlu1 %1772  ;;  %2163 = vrot.lane.b32.xlu1 %v4534_v58, %s3895_s12 }
 0x22c   : > { %v1765_v7 = vpop.permute.xlu0 %1764  ;;  %v1792_v12 = vsel %vm1778_vm5, %v1773_v5, %v1749_v42 }
 0x22d   : > { %v1784_v48 = vsel %vm1778_vm5, %v1757_v32, %v1765_v7  ;;  %v1780_v4 = vsel %vm1778_vm5, %v1765_v7, %v1773_v5  ;;  %v5545_v13 = vmul.f32 %v5482_v2, %v1792_v12  ;;  %v7147_v5 = vld [vmem:[#allocation7_spill] sm:$0xff]  ;;  %v5600_v12 = vperm.slane %v5479_v61, 0 }
 0x22e   : > { %v5539_v52 = vmul.f32 %v5525_v0, %v1784_v48  ;;  %v5542_v29 = vmul.f32 %v5485_v18, %v1780_v4 }
 0x22f   : > { %2147 = vrot.lane.b32.xlu0 %v4409_v37, %s3895_s12  ;;  %v3643_v37 = vld [vmem:[%s7046_s3 + $0xe8] sm:$0xff] }
 0x230   : > { %v5527_v20 = vpop.permute.xlu2 %1885 }
 0x231   : > { %v1927_v7 = vsel %vm1911_vm6, %v1910_v56, %v5527_v20 }
 0x232   : > { %2105 = vperm.xlu2 %3742, %v3644_v30  }
 0x233   : > { %v5555_v42 = vpop.permute.xlu1 %1907  ;;  %2100 = vperm.xlu1 %3741, %v3643_v37  }
 0x234   : > { %v5553_v32 = vpop.permute.xlu0 %1899 }
 0x237   : > { %1962 = vperm.xlu0 %3740, %v3637_v55  }
 0x238   : > { %v1845_v46 = vpop.permute.xlu2 %1844 }
 0x239   : > { %v1861_v34 = vmul.f32 %v1845_v46, %v1820_v41  ;;  %v1862_v24 = vmul.f32 %v1845_v46, %v1821_v8 }
 0x23a   : > { %2012 = vrot.lane.b32.xlu2 %v7144_v54, %s3894_s13 }
 0x23b   : > { %v1877_v17 = vadd.f32 %v1861_v34, %v5421_v44  ;;  %v1878_v58 = vadd.f32 %v1862_v24, %v5429_v62  ;;  %v5574_v6 = vpop.permute.xlu1 %2042  ;;  %v5580_v44 = vperm.slane %v5570_v15, 2  ;;  %v5583_v62 = vperm.slane %v5570_v15, 3  ;;  %2024 = vrot.lane.b32.xlu1 %v4649_v39, %s3894_s13 }
 0x23c   : > { %v5572_v59 = vpop.permute.xlu0 %2034 }
 0x23d   : > { %v1953_v48 = vmul.f32 %v5580_v44, %v1915_v57  ;;  %v1954_v4 = vmul.f32 %v5583_v62, %v1927_v7 }
 0x23f   : > { %1889 = vrot.lane.b32.xlu0 %v7147_v5, %s3893_s24 }
 0x240   : > { %v5576_v21 = vpop.permute.xlu2 %1883 }
 0x242   : > { %2036 = vrot.lane.b32.xlu2 %v4339_v50, %s3894_s13 }
 0x243   : > { %v1761_v41 = vpop.permute.xlu1 %1760  ;;  %2161 = vrot.lane.b32.xlu1 %v4310_v45, %s3895_s12 }
 0x244   : > { %v5602_v30 = vpop.permute.xlu0 %1977  ;;  %v1786_v24 = vsel %vm1778_vm5, %v1761_v41, %v5461_v9  ;;  %v1790_v55 = vsel %vm1778_vm5, %v5441_v35, %v1761_v41 }
 0x245   : > { %v1994_v8 = vmul.f32 %v5602_v30, %v1953_v48  ;;  %v1995_v34 = vmul.f32 %v5602_v30, %v1954_v4  ;;  %v1818_v61 = vmul.f32 %v5600_v12, %v1790_v55  ;;  %v1819_v37 = vmul.f32 %v5525_v0, %v1786_v24  ;;  %v7148_v55 = vld [vmem:[#allocation6_spill] sm:$0xff] }
 0x247   : > { %v5616_v57 = vadd.f32 %v1994_v8, %v1877_v17  ;;  %v5618_v7 = vadd.f32 %v1995_v34, %v1878_v58  ;;  %v1859_v51 = vmul.f32 %v1845_v46, %v1818_v61  ;;  %v1860_v48 = vmul.f32 %v1845_v46, %v1819_v37  ;;  %2159 = vrot.lane.b32.xlu0 %v4794_v16, %s3895_s12  ;;  %v3649_v16 = vld [vmem:[%s7046_s3 + $0x110] sm:$0xff]  ;;  %v3648_v46 = vld [vmem:[%s7046_s3 + $0x108] sm:$0xff] }
 0x248   : > { %v5604_v56 = vpop.permute.xlu2 %2018 }
 0x249   : > { %v5623_v4 = vadd.f32 %v1859_v51, %v5427_v26  ;;  %v5626_v9 = vadd.f32 %v1860_v48, %v5419_v33  ;;  %v3642_v26 = vld [vmem:[%s7046_s3 + $0xe0] sm:$0xff] }
 0x24a   : > { %2171 = vrot.lane.b32.xlu2 %v7145_v40, %s3895_s12 }
 0x24b   : > { %v5632_v17 = vpop.permute.xlu1 %1881  ;;  %2233 = vperm.xlu1 %3741, %v3648_v46  }
 0x24c   : > { %v1771_v35 = vpop.permute.xlu0 %1770 }
 0x24d   : > { %v1791_v40 = vsel %vm1778_vm5, %v1771_v35, %v5405_v27 }
 0x24e   : > { %v5647_v45 = vmul.f32 %v5482_v2, %v1791_v40  ;;  %v5701_v40 = vld [vmem:[%s7050_s7 + $0x18] sm:$0xf] }
 0x24f   : > { %2095 = vperm.xlu0 %3740, %v3642_v26  }
 0x250   : > { %v5634_v58 = vpop.permute.xlu2 %1839 }
 0x251   : > { %v1857_v51 = vmul.f32 %v5634_v58, %v5498_v63  ;;  %v1858_v33 = vmul.f32 %v5634_v58, %v5501_v10 }
 0x252   : > { %2238 = vperm.xlu2 %3742, %v3649_v16  }
 0x253   : > { %v5656_v63 = vadd.f32 %v1857_v51, %v5450_v14  ;;  %v5659_v10 = vadd.f32 %v1858_v33, %v5453_v43  ;;  %v5663_v2 = vpop.permute.xlu1 %2016  ;;  %2022 = vrot.lane.b32.xlu1 %v7147_v5, %s3894_s13 }
 0x254   : > { %v5661_v41 = vpop.permute.xlu0 %1905 }
 0x257   : > { %1887 = vrot.lane.b32.xlu0 %v7148_v55, %s3893_s24  ;;  %s3496_s24 = scalar_lea.sflag [#allocation3], %s296_s20 }
 0x258   : > { %v1763_v8 = vpop.permute.xlu2 %1762 }
 0x259   : > { %v1783_v34 = vsel %vm1778_vm5, %v5489_v22, %v1763_v8  ;;  %v1779_v24 = vsel %vm1778_vm5, %v1763_v8, %v1771_v35  ;;  %v1810_v35 = vmul.f32 %v5600_v12, %v5466_v28  ;;  %v5711_v8 = vperm.slane %v5701_v40, 2  ;;  %v2281_v28 = vld [vmem:[%s7047_s4 + $0x18] sm:$0xff] }
 0x25a   : > { %v5671_v14 = vmul.f32 %v5525_v0, %v1783_v34  ;;  %v5674_v43 = vmul.f32 %v5485_v18, %v1779_v24  ;;  %2145 = vrot.lane.b32.xlu2 %v7144_v54, %s3895_s12  ;;  %v3647_v18 = vld [vmem:[%s7046_s3 + $0x100] sm:$0xff]  ;;  %v2280_v54 = vld [vmem:[%s7047_s4 + $0x10] sm:$0xff]  ;;  %v5718_v24 = vperm.slane %v5701_v40, 3 }
 0x25b   : > { %v5684_v37 = vpop.permute.xlu1 %2151  ;;  %2294 = vperm.xlu1 %3741, %v2280_v54  }
 0x25c   : > { %v5682_v61 = vpop.permute.xlu0 %2040 }
 0x25f   : > { %2228 = vperm.xlu0 %3740, %v3647_v18  }
 0x260   : > { %v5686_v48 = vpop.permute.xlu2 %1897 }
 0x262   : > { %2169 = vrot.lane.b32.xlu2 %v4339_v50, %s3895_s12 }
 0x263   : > { %v1835_v33 = vpop.permute.xlu1 %1834 }
 0x264   : > { %v5703_v51 = vpop.permute.xlu0 %2175  ;;  %v1851_v26 = vmul.f32 %v1835_v33, %v1810_v35  ;;  %v1852_v50 = vmul.f32 %v1835_v33, %v5539_v52  ;;  %v1853_v46 = vmul.f32 %v1835_v33, %v5542_v29  ;;  %v1854_v34 = vmul.f32 %v1835_v33, %v5545_v13  ;;  %v2279_v29 = vld [vmem:[%s7047_s4 + $0x8] sm:$0xff] }
 0x265   : > { %v2048_v13 = vsel %vm2044_vm7, %v5572_v59, %v5574_v6  ;;  %2289 = vperm.xlu1 %3741, %v2279_v29  }
 0x266   : > { %v5721_v18 = vadd.f32 %v1851_v26, %v5389_v38  ;;  %v5724_v54 = vadd.f32 %v1852_v50, %v5397_v53  ;;  %v5727_v52 = vadd.f32 %v1853_v46, %v5400_v31  ;;  %v2060_v38 = vsel %vm2044_vm7, %v5574_v6, %v5604_v56 }
 0x267   : > { %v5741_v53 = vadd.f32 %v1854_v34, %v5403_v47  ;;  %2155 = vrot.lane.b32.xlu0 %v7147_v5, %s3895_s12  ;;  %v2086_v31 = vmul.f32 %v5711_v8, %v2048_v13  ;;  %v2087_v35 = vmul.f32 %v5718_v24, %v2060_v38  ;;  %v2278_v38 = vld [vmem:[%s7047_s4] sm:$0xff] }
 0x268   : > { %v5706_v16 = vpop.permute.xlu2 %2032 }
 0x26a   : > { %2299 = vperm.xlu2 %3742, %v2281_v28  }
 0x26b   : > { %v1759_v26 = vpop.permute.xlu1 %1758 }
 0x26c   : > { %v5747_v33 = vpop.permute.xlu0 %2110  ;;  %v1785_v47 = vsel %vm1778_vm5, %v1759_v26, %v5487_v19  ;;  %v1789_v5 = vsel %vm1778_vm5, %v5439_v25, %v1759_v26  ;;  %v3024_v19 = vld [vmem:[%s7049_s6] sm:$0xff]  ;;  %v5795_v26 = vperm.slane %v5570_v15, 1 }
 0x26d   : > { %v2127_v46 = vmul.f32 %v5747_v33, %v2086_v31  ;;  %v2128_v6 = vmul.f32 %v5747_v33, %v2087_v35  ;;  %v1814_v28 = vmul.f32 %v5600_v12, %v1789_v5  ;;  %v1815_v34 = vmul.f32 %v5525_v0, %v1785_v47  ;;  %3028 = vperm.xlu1 %3741, %v3024_v19  }
 0x26e   : > { %v1914_v0 = vsel %vm1911_vm6, %v5553_v32, %v5555_v42 }
 0x26f   : > { %v5762_v29 = vadd.f32 %v2127_v46, %v5616_v57  ;;  %v5765_v13 = vadd.f32 %v2128_v6, %v5618_v7  ;;  %v1855_v25 = vmul.f32 %v5634_v58, %v1814_v28  ;;  %v1856_v31 = vmul.f32 %v5634_v58, %v1815_v34  ;;  %2284 = vperm.xlu0 %3740, %v2278_v38  }
 0x270   : > { %v5749_v50 = vpop.permute.xlu2 %2167  ;;  %v1926_v57 = vsel %vm1911_vm6, %v5555_v42, %v5576_v21  ;;  %v5792_v58 = vperm.slane %v5570_v15, 0  ;;  %v1949_v46 = vmul.f32 %v5580_v44, %v1914_v0 }
 0x271   : > { %7149 = vst [vmem:[#allocation25_spill] sm:$0xff] %v5749_v50  ;;  %v5786_v7 = vadd.f32 %v1855_v25, %v5444_v23  ;;  %v5789_v35 = vadd.f32 %v1856_v31, %v5447_v3  ;;  %v1950_v42 = vmul.f32 %v5583_v62, %v1926_v57  ;;  %v7152_v31 = vld [vmem:[#allocation14_spill] sm:$0xff] }
 0x272   : > { %7150 = vst [vmem:[#allocation21_spill] sm:$0xff] %v5762_v29  ;;  %2157 = vrot.lane.b32.xlu2 %v4649_v39, %s3895_s12  ;;  %v3025_v50 = vld [vmem:[%s7049_s6 + $0x8] sm:$0xff] }
 0x273   : > { %7151 = vst [vmem:[#allocation26_spill] sm:$0xff] %v5765_v13  ;;  %v5799_v39 = vpop.permute.xlu1 %1895 }
 0x274   : > { %v1894_v6 = vpop.permute.xlu0 %1893 }
 0x275   : > { %v1919_v3 = vsel %vm1911_vm6, %v1894_v6, %v5510_v1  ;;  %v1923_v47 = vsel %vm1911_vm6, %v5527_v20, %v1894_v6  ;;  %v7153_v20 = vld [vmem:[#allocation18_spill] sm:$0xff] }
 0x276   : > { %v1951_v28 = vmul.f32 %v5792_v58, %v1923_v47  ;;  %v1952_v34 = vmul.f32 %v5795_v26, %v1919_v3  ;;  %v1257_v0 = vsel %vm1248_vm1, %v7153_v20, %v7152_v31  ;;  %v7155_v3 = vld [vmem:[#allocation19_spill] sm:$0xff]  ;;  %v7161_v31 = vld [vmem:[#allocation29_spill] sm:$0xff] }
 0x277   : > { %v7156_v47 = vld [vmem:[#allocation15_spill] sm:$0xff] }
 0x278   : > { %v5801_v23 = vpop.permute.xlu2 %1972  ;;  %v1992_v1 = vmul.f32 %v5602_v30, %v1951_v28  ;;  %v1993_v25 = vmul.f32 %v5602_v30, %v1952_v34  ;;  %v7158_v28 = vld [vmem:[#allocation16_spill] sm:$0xff] }
 0x279   : > { %v1990_v15 = vmul.f32 %v5801_v23, %v1949_v46  ;;  %v1991_v5 = vmul.f32 %v5801_v23, %v1950_v42 }
 0x27a   : > { %2020 = vrot.lane.b32.xlu2 %v7148_v55, %s3894_s13  ;;  %v5828_v57 = vadd.f32 %v1992_v1, %v5623_v4  ;;  %v7160_v1 = vld [vmem:[#allocation10_spill] sm:$0xff] }
 0x27b   : > { %v5814_v38 = vadd.f32 %v1990_v15, %v5656_v63  ;;  %v5817_v19 = vadd.f32 %v1991_v5, %v5659_v10  ;;  %v5831_v63 = vadd.f32 %v1993_v25, %v5626_v9  ;;  %v7154_v10 = vld [vmem:[#allocation27_spill] sm:$0xff]  ;;  %v5836_v6 = vpop.permute.xlu1 %2030  ;;  %v1388_v15 = vsel %vm1379_vm2, %v7156_v47, %v7155_v3  ;;  %v7157_v5 = vld [vmem:[#allocation17_spill] sm:$0xff] }
 0x27c   : > { %v1276_v46 = vmul.f32 %v7154_v10, %v1257_v0  ;;  %v5834_v42 = vpop.permute.xlu0 %2014  ;;  %v1521_v4 = vsel %vm1512_vm3, %v7158_v28, %v7157_v5  ;;  %v7159_v9 = vld [vmem:[#allocation9_spill] sm:$0xff]  ;;  %v1199_v25 = vmul.f32 %v7160_v1, %v7148_v55  ;;  %v1408_v20 = vmul.f32 %v7161_v31, %v1388_v15  ;;  %v7162_v0 = vld [vmem:[#allocation30_spill] sm:$0xff] }
 0x27d   : > { %v1541_v10 = vmul.f32 %v7162_v0, %v1521_v4  ;;  %v7163_v5 = vld [vmem:[#allocation13_spill] sm:$0xff]  ;;  %v1787_v15 = vsel %vm1778_vm5, %v5405_v27, %v5489_v22  ;;  %v1913_v4 = vsel %vm1911_vm6, %v5686_v48, %v5661_v41 }
 0x27e   : > { %v1316_v34 = vmul.f32 %v7159_v9, %v1276_v46  ;;  %v1449_v28 = vmul.f32 %v7163_v5, %v1408_v20  ;;  %v7164_v46 = vld [vmem:[#allocation12_spill] sm:$0xff]  ;;  %v1945_v31 = vmul.f32 %v5580_v44, %v1913_v4 }
 0x27f   : > { %v1582_v9 = vmul.f32 %v7164_v46, %v1541_v10 }
 0x280   : > { %v5838_v30 = vpop.permute.xlu2 %1879  ;;  %v1332_v29 = vadd.f32 %v1316_v34, %v1199_v25  ;;  %v1925_v34 = vsel %vm1911_vm6, %v5661_v41, %v5632_v17  ;;  %v1806_v25 = vmul.f32 %v5600_v12, %v1787_v15 }
 0x281   : > { %v1946_v27 = vmul.f32 %v5583_v62, %v1925_v34 }
 0x282   : > { %2153 = vrot.lane.b32.xlu2 %v7148_v55, %s3895_s12  ;;  %v1465_v55 = vadd.f32 %v1449_v28, %v1332_v29  ;;  %s3507_s12 = scalar_lea.hbm %s7051_s8, %s3689_s18 }
 0x283   : > { %v5857_v3 = vpop.permute.xlu1 %2165  ;;  %s3510_s9 = sshll.u32 %s3507_s12, 4  ;;  %s3511_s9 = int_to_ptr.hbm [resolvable:$true] %s3510_s9 }
 0x284   : > { %v5855_v13 = vpop.permute.xlu0 %2149  ;;  %v1598_v1 = vadd.f32 %v1582_v9, %v1465_v55  ;;  %v7165_v55 = vld [vmem:[#allocation20_spill] sm:$0xff]  ;;  %s3837_s26 = sshra.s32 %s3511_s9, 4  ;;  %s3838_s26 = int_to_ptr.hbm [resolvable:$true] %s3837_s26 }
 0x285   : > { %s3839_s10 = scalar_lea.hbm %s3838_s26, 64  ;;  %p3844_p0 = scmp.lt.s32.totalorder %s3838_s26, %s7051_s8 }
 0x286   : > { %v1731_v29 = vadd.f32 %v5363_v49, %v1598_v1  ;;  %p3840_p11 = scmp.ne.s32.totalorder %s3838_s26, %s3839_s10  ;;  %p3845_p1 = scmp.lt.s32.totalorder %s3843_s21, %s3839_s10 }
 0x288   : > { %v5859_v47 = vpop.permute.xlu2 %1903  ;;  %p3841_p12 = pnand %p3840_p11, %p3981_p5  ;;  %p3846_p2 = por %p3845_p1, %p3844_p0 }
 0x28a   : > { %3033 = vperm.xlu2 %3742, %v3025_v50   ;;  %p3842_p13 = pneg %p3841_p12 }
 0x28b   : > { %v5882_v20 = vpop.permute.xlu1 %1967 }
 0x28c   : > { %v1830_v22 = vpop.permute.xlu0 %1829  ;;  %v1986_v50 = vmul.f32 %v5882_v20, %v1945_v31  ;;  %v1987_v12 = vmul.f32 %v5882_v20, %v1946_v27  ;;  %v5927_v27 = vperm.slane %v5701_v40, 0  ;;  %p3847_p3 = pnand %p3846_p2, %p3842_p13 }
 0x28d   : > { %v1847_v10 = vmul.f32 %v1830_v22, %v1806_v25  ;;  %v1848_v5 = vmul.f32 %v1830_v22, %v5671_v14  ;;  %v1849_v28 = vmul.f32 %v1830_v22, %v5674_v43  ;;  %v1850_v41 = vmul.f32 %v1830_v22, %v5647_v45 }
 0x28e   : > { %v2002_v4 = vadd.f32 %v1986_v50, %v5727_v52  ;;  %v2003_v14 = vadd.f32 %v1987_v12, %v5741_v53 }
 0x28f   : > { %v5890_v49 = vadd.f32 %v1847_v10, %v5373_v11  ;;  %v5892_v46 = vadd.f32 %v1848_v5, %v1731_v29  ;;  %v1865_v9 = vadd.f32 %v1849_v28, %v5378_v60  ;;  %v1866_v15 = vadd.f32 %v1850_v41, %v7165_v55 }
 0x290   : > { %v2039_v0 = vpop.permute.xlu2 %2038  ;;  %v2047_v29 = vsel %vm2044_vm7, %v5706_v16, %v5682_v61 }
 0x291   : > { %v2082_v22 = vmul.f32 %v5711_v8, %v2047_v29 }
 0x293   : > { %v1892_v45 = vpop.permute.xlu1 %1891 }
 0x294   : > { %v5898_v43 = vpop.permute.xlu0 %2243  ;;  %v1918_v11 = vsel %vm1911_vm6, %v1892_v45, %v5553_v32  ;;  %v1922_v1 = vsel %vm1911_vm6, %v5576_v21, %v1892_v45  ;;  %v2059_v32 = vsel %vm2044_vm7, %v5682_v61, %v5663_v2 }
 0x295   : > { %v1947_v60 = vmul.f32 %v5792_v58, %v1922_v1  ;;  %v1948_v25 = vmul.f32 %v5795_v26, %v1918_v11  ;;  %v2083_v10 = vmul.f32 %v5718_v24, %v2059_v32 }
 0x297   : > { %v1988_v52 = vmul.f32 %v5801_v23, %v1947_v60  ;;  %v1989_v53 = vmul.f32 %v5801_v23, %v1948_v25  ;;  %v5930_v23 = vperm.slane %v5701_v40, 1 }
 0x298   : > { %v5900_v34 = vpop.permute.xlu2 %2173 }
 0x299   : > { %v5921_v21 = vadd.f32 %v1988_v52, %v5786_v7  ;;  %v5924_v31 = vadd.f32 %v1989_v53, %v5789_v35 }
 0x29b   : > { %v5934_v28 = vpop.permute.xlu1 %2028 }
 0x29c   : > { %v2027_v5 = vpop.permute.xlu0 %2026 }
 0x29d   : > { %v2052_v7 = vsel %vm2044_vm7, %v2027_v5, %v5572_v59  ;;  %v2056_v35 = vsel %vm2044_vm7, %v5604_v56, %v2027_v5 }
 0x29e   : > { %v2084_v40 = vmul.f32 %v5927_v27, %v2056_v35  ;;  %v2085_v12 = vmul.f32 %v5930_v23, %v2052_v7 }
 0x2a0   : > { %v2106_v61 = vpop.permute.xlu2 %2105  ;;  %v2125_v11 = vmul.f32 %v5747_v33, %v2084_v40  ;;  %v2126_v59 = vmul.f32 %v5747_v33, %v2085_v12  ;;  %v1912_v33 = vsel %vm1911_vm6, %v5799_v39, %v5859_v47 }
 0x2a1   : > { %v2123_v41 = vmul.f32 %v2106_v61, %v2082_v22  ;;  %v2124_v50 = vmul.f32 %v2106_v61, %v2083_v10  ;;  %v1941_v53 = vmul.f32 %v5580_v44, %v1912_v33 }
 0x2a2   : > { %v5953_v1 = vadd.f32 %v2125_v11, %v5828_v57  ;;  %v5956_v56 = vadd.f32 %v2126_v59, %v5831_v63  ;;  %v2046_v57 = vsel %vm2044_vm7, %v5836_v6, %v2039_v0 }
 0x2a3   : > { %v5945_v55 = vadd.f32 %v2123_v41, %v5814_v38  ;;  %v5948_v45 = vadd.f32 %v2124_v50, %v5817_v19  ;;  %v5960_v25 = vpop.permute.xlu1 %2163  ;;  %v1924_v38 = vsel %vm1911_vm6, %v5859_v47, %v5838_v30  ;;  %v2058_v19 = vsel %vm2044_vm7, %v2039_v0, %v5834_v42 }
 0x2a4   : > { %v5958_v60 = vpop.permute.xlu0 %2147  ;;  %v1942_v63 = vmul.f32 %v5583_v62, %v1924_v38  ;;  %v2079_v29 = vmul.f32 %v5718_v24, %v2058_v19  ;;  %v2078_v32 = vmul.f32 %v5711_v8, %v2046_v57 }
 0x2a8   : > { %v5962_v52 = vpop.permute.xlu2 %2012 }
 0x2ab   : > { %v5984_v10 = vpop.permute.xlu1 %2100 }
 0x2ac   : > { %v5982_v22 = vpop.permute.xlu0 %1962  ;;  %v2119_v35 = vmul.f32 %v5984_v10, %v2078_v32  ;;  %v2120_v0 = vmul.f32 %v5984_v10, %v2079_v29  ;;  %v2180_v29 = vsel %vm2177_vm8, %v5857_v3, %v5900_v34 }
 0x2ad   : > { %v1982_v5 = vmul.f32 %v5982_v22, %v1941_v53  ;;  %v1983_v7 = vmul.f32 %v5982_v22, %v1942_v63  ;;  %v2192_v53 = vsel %vm2177_vm8, %v5900_v34, %v5855_v13 }
 0x2ae   : > { %v5997_v50 = vadd.f32 %v2119_v35, %v2002_v4  ;;  %v5999_v40 = vadd.f32 %v2120_v0, %v2003_v14 }
 0x2af   : > { %v5993_v62 = vadd.f32 %v1982_v5, %v1865_v9  ;;  %v5995_v41 = vadd.f32 %v1983_v7, %v1866_v15 }
 0x2b0   : > { %v2037_v47 = vpop.permute.xlu2 %2036 }
 0x2b1   : > { %v2057_v44 = vsel %vm2044_vm7, %v2037_v47, %v5962_v52 }
 0x2b3   : > { %v2025_v11 = vpop.permute.xlu1 %2024 }
 0x2b4   : > { %v1890_v12 = vpop.permute.xlu0 %1889  ;;  %v2051_v15 = vsel %vm2044_vm7, %v2025_v11, %v5706_v16  ;;  %v2055_v4 = vsel %vm2044_vm7, %v5663_v2, %v2025_v11  ;;  %v6029_v16 = vld [vmem:[%s7050_s7 + $0x1c] sm:$0xf] }
 0x2b5   : > { %v1917_v38 = vsel %vm1911_vm6, %v1890_v12, %v5686_v48  ;;  %v1921_v9 = vsel %vm1911_vm6, %v5632_v17, %v1890_v12  ;;  %v2080_v2 = vmul.f32 %v5927_v27, %v2055_v4  ;;  %v2081_v19 = vmul.f32 %v5930_v23, %v2051_v15 }
 0x2b6   : > { %v1943_v17 = vmul.f32 %v5792_v58, %v1921_v9  ;;  %v1944_v33 = vmul.f32 %v5795_v26, %v1917_v38  ;;  %v6044_v7 = vperm.slane %v6029_v16, 2  ;;  %v6047_v35 = vperm.slane %v6029_v16, 3 }
 0x2b7   : > { %v2121_v32 = vmul.f32 %v2106_v61, %v2080_v2  ;;  %v2122_v5 = vmul.f32 %v2106_v61, %v2081_v19  ;;  %v2193_v4 = vsel %vm2177_vm8, %v5703_v51, %v5684_v37 }
 0x2b8   : > { %v2172_v59 = vpop.permute.xlu2 %2171  ;;  %v1984_v57 = vmul.f32 %v5882_v20, %v1943_v17  ;;  %v1985_v63 = vmul.f32 %v5882_v20, %v1944_v33  ;;  %v2216_v34 = vmul.f32 %v6047_v35, %v2192_v53  ;;  %v2215_v61 = vmul.f32 %v6044_v7, %v2180_v29 }
 0x2b9   : > { %v6017_v14 = vsel %vm2177_vm8, %v2172_v59, %v5958_v60  ;;  %v6022_v48 = vsel %vm2177_vm8, %v5960_v25, %v2172_v59  ;;  %v6052_v12 = vadd.f32 %v2121_v32, %v5921_v21  ;;  %v6055_v11 = vadd.f32 %v2122_v5, %v5924_v31 }
 0x2ba   : > { %v2000_v20 = vadd.f32 %v1984_v57, %v5721_v18  ;;  %v2001_v0 = vadd.f32 %v1985_v63, %v5724_v54  ;;  %v2045_v17 = vsel %vm2044_vm7, %v5934_v28, %v2037_v47  ;;  %v2220_v33 = vmul.f32 %v6047_v35, %v2193_v4 }
 0x2bb   : > { %v6061_v38 = vpop.permute.xlu1 %2161  ;;  %v2074_v19 = vmul.f32 %v5711_v8, %v2045_v17  ;;  %v2075_v4 = vmul.f32 %v5718_v24, %v2057_v44 }
 0x2bc   : > { %v6059_v59 = vpop.permute.xlu0 %2159  ;;  %v2261_v2 = vmul.f32 %v5898_v43, %v2220_v33 }
 0x2c0   : > { %v6063_v9 = vpop.permute.xlu2 %2238 }
 0x2c1   : > { %v2256_v18 = vmul.f32 %v6063_v9, %v2215_v61  ;;  %v2257_v54 = vmul.f32 %v6063_v9, %v2216_v34  ;;  %v7166_v61 = vld [vmem:[#allocation25_spill] sm:$0xff] }
 0x2c3   : > { %v6069_v21 = vpop.permute.xlu1 %2233 }
 0x2c4   : > { %v6067_v15 = vpop.permute.xlu0 %2095 }
 0x2c5   : > { %v2115_v33 = vmul.f32 %v6067_v15, %v2074_v19 }
 0x2c8   : > { %v6071_v31 = vpop.permute.xlu2 %2145 }
 0x2cb   : > { %v2023_v63 = vpop.permute.xlu1 %2022 }
 0x2cc   : > { %v1888_v57 = vpop.permute.xlu0 %1887  ;;  %v2050_v47 = vsel %vm2044_vm7, %v2023_v63, %v5836_v6  ;;  %v2054_v5 = vsel %vm2044_vm7, %v5834_v42, %v2023_v63  ;;  %v2181_v6 = vsel %vm2177_vm8, %v7166_v61, %v5703_v51 }
 0x2cd   : > { %v1916_v29 = vsel %vm1911_vm6, %v1888_v57, %v5799_v39  ;;  %v1920_v32 = vsel %vm1911_vm6, %v5838_v30, %v1888_v57  ;;  %v2076_v42 = vmul.f32 %v5927_v27, %v2054_v5  ;;  %v2077_v17 = vmul.f32 %v5930_v23, %v2050_v47 }
 0x2ce   : > { %v1939_v34 = vmul.f32 %v5792_v58, %v1920_v32  ;;  %v1940_v30 = vmul.f32 %v5795_v26, %v1916_v29  ;;  %v2116_v58 = vmul.f32 %v6067_v15, %v2075_v4  ;;  %v7167_v29 = vld [vmem:[#allocation26_spill] sm:$0xff]  ;;  %v2219_v24 = vmul.f32 %v6044_v7, %v2181_v6 }
 0x2cf   : > { %v2117_v26 = vmul.f32 %v5984_v10, %v2076_v42  ;;  %v6117_v51 = vadd.f32 %v2261_v2, %v7167_v29  ;;  %v6142_v42 = vadd.f32 %v2257_v54, %v5948_v45 }
 0x2d0   : > { %v2170_v53 = vpop.permute.xlu2 %2169  ;;  %v1980_v57 = vmul.f32 %v5982_v22, %v1939_v34  ;;  %v1981_v63 = vmul.f32 %v5982_v22, %v1940_v30  ;;  %v2260_v34 = vmul.f32 %v5898_v43, %v2219_v24 }
 0x2d1   : > { %v2190_v8 = vsel %vm2177_vm8, %v2170_v53, %v6071_v31  ;;  %v2178_v39 = vsel %vm2177_vm8, %v6061_v38, %v2170_v53  ;;  %v2118_v53 = vmul.f32 %v5984_v10, %v2077_v17  ;;  %v2133_v22 = vadd.f32 %v2117_v26, %v2000_v20  ;;  %v7168_v20 = vld [vmem:[#allocation21_spill] sm:$0xff] }
 0x2d2   : > { %v1996_v44 = vadd.f32 %v1980_v57, %v5890_v49  ;;  %v1997_v32 = vadd.f32 %v1981_v63, %v5892_v46  ;;  %v2208_v19 = vmul.f32 %v6047_v35, %v2190_v8  ;;  %v2207_v47 = vmul.f32 %v6044_v7, %v2178_v39 }
 0x2d3   : > { %v2134_v5 = vadd.f32 %v2118_v53, %v2001_v0  ;;  %v2131_v49 = vadd.f32 %v2115_v33, %v5993_v62  ;;  %v2132_v46 = vadd.f32 %v2116_v58, %v5995_v41  ;;  %v2276_v0 = vadd.f32 %v2260_v34, %v7168_v20 }
 0x2d4   : > { %v6125_v30 = vpop.permute.xlu0 %2228  ;;  %v6139_v39 = vadd.f32 %v2256_v18, %v5945_v55  ;;  %v2197_v17 = vperm.slane %v6029_v16, 0  ;;  %v2198_v57 = vperm.slane %v6029_v16, 1 }
 0x2d5   : > { %v2248_v2 = vmul.f32 %v6125_v30, %v2207_v47  ;;  %v2249_v6 = vmul.f32 %v6125_v30, %v2208_v19 }
 0x2d7   : > { %v6133_v4 = vadd.f32 %v2248_v2, %v2131_v49  ;;  %v6135_v8 = vadd.f32 %v2249_v6, %v2132_v46 }
 0x2d8   : > { %v6127_v10 = vpop.permute.xlu2 %2299 }
 0x2d9   : > { %v6147_v62 = vadd.f32 %v6127_v10, %v2276_v0 }
 0x2db   : > { %v6156_v45 = vmul.f32 0.70710677, %v6147_v62 }
 0x2dc   : > { %v2156_v41 = vpop.permute.xlu0 %2155 }
 0x2dd   : > { %v2183_v63 = vsel %vm2177_vm8, %v2156_v41, %v5960_v25  ;;  %v2187_v55 = vsel %vm2177_vm8, %v5958_v60, %v2156_v41  ;;  %v2910_v25 = vmul.f32 %v6156_v45, %v6156_v45 }
 0x2de   : > { %v2209_v54 = vmul.f32 %v2197_v17, %v2187_v55  ;;  %v2210_v58 = vmul.f32 %v2198_v57, %v2183_v63 }
 0x2e0   : > { %v2158_v33 = vpop.permute.xlu2 %2157  ;;  %v2250_v60 = vmul.f32 %v6069_v21, %v2209_v54  ;;  %v2251_v29 = vmul.f32 %v6069_v21, %v2210_v58 }
 0x2e1   : > { %v2184_v16 = vsel %vm2177_vm8, %v2158_v33, %v5857_v3  ;;  %v2188_v18 = vsel %vm2177_vm8, %v5855_v13, %v2158_v33  ;;  %v2911_v3 = vmin.f32 %v2910_v25, 16.0  ;;  %v6206_v25 = vadd.f32 %v6127_v10, %v6117_v51 }
 0x2e2   : > { %v2213_v26 = vmul.f32 %v2197_v17, %v2188_v18  ;;  %v2214_v53 = vmul.f32 %v2198_v57, %v2184_v16  ;;  %v6170_v47 = vadd.f32 %v2250_v60, %v2133_v22  ;;  %v6172_v34 = vadd.f32 %v2251_v29, %v2134_v5 }
 0x2e3   : > { %v2912_v6 = vmul.f32 2.1237322e-06, %v2911_v3  ;;  %v2923_v49 = vmul.f32 3.8918573e-05, %v2911_v3 }
 0x2e4   : > { %v2254_v24 = vmul.f32 %v6063_v9, %v2213_v26  ;;  %v2255_v19 = vmul.f32 %v6063_v9, %v2214_v53 }
 0x2e5   : > { %v2913_v20 = vadd.f32 0.00028619796, %v2912_v6  ;;  %v2924_v0 = vadd.f32 0.001143296, %v2923_v49 }
 0x2e6   : > { %v6175_v13 = vadd.f32 %v2254_v24, %v6052_v12  ;;  %v6178_v2 = vadd.f32 %v2255_v19, %v6055_v11 }
 0x2e7   : > { %v2914_v41 = vmul.f32 %v2913_v20, %v2911_v3  ;;  %v2925_v11 = vmul.f32 %v2924_v0, %v2911_v3 }
 0x2e8   : > { %v2021_v46 = vpop.permute.xlu2 %2020 }
 0x2e9   : > { %v2049_v9 = vsel %vm2044_vm7, %v2021_v46, %v5934_v28  ;;  %v2053_v22 = vsel %vm2044_vm7, %v5962_v52, %v2021_v46  ;;  %v2915_v55 = vadd.f32 0.0036580483, %v2914_v41  ;;  %v2926_v16 = vadd.f32 0.014752088, %v2925_v11 }
 0x2ea   : > { %v2072_v5 = vmul.f32 %v5927_v27, %v2053_v22  ;;  %v2073_v12 = vmul.f32 %v5930_v23, %v2049_v9  ;;  %v2185_v27 = vsel %vm2177_vm8, %v6059_v59, %v7166_v61 }
 0x2eb   : > { %v2916_v58 = vmul.f32 %v2915_v55, %v2911_v3  ;;  %v2927_v28 = vmul.f32 %v2926_v16, %v2911_v3  ;;  %v2218_v19 = vmul.f32 %v2198_v57, %v2185_v27 }
 0x2ec   : > { %v2113_v33 = vmul.f32 %v6067_v15, %v2072_v5  ;;  %v2114_v63 = vmul.f32 %v6067_v15, %v2073_v12 }
 0x2ed   : > { %v2928_v15 = vadd.f32 0.112945676, %v2927_v28  ;;  %v2917_v61 = vadd.f32 0.05243302, %v2916_v58 }
 0x2ee   : > { %v2129_v18 = vadd.f32 %v2113_v33, %v1996_v44  ;;  %v2130_v54 = vadd.f32 %v2114_v63, %v1997_v32  ;;  %v2189_v44 = vsel %vm2177_vm8, %v5684_v37, %v6059_v59 }
 0x2ef   : > { %v2929_v60 = vmul.f32 %v2928_v15, %v2911_v3  ;;  %v2217_v24 = vmul.f32 %v2197_v17, %v2189_v44  ;;  %v2918_v51 = vmul.f32 %v2917_v61, %v2911_v3 }
 0x2f0   : > { %v2154_v26 = vpop.permute.xlu2 %2153 }
 0x2f1   : > { %v2182_v23 = vsel %vm2177_vm8, %v2154_v26, %v6061_v38  ;;  %v2186_v52 = vsel %vm2177_vm8, %v6071_v31, %v2154_v26  ;;  %v6211_v31 = vmul.f32 0.70710677, %v6206_v25  ;;  %v2930_v6 = vadd.f32 0.4994258, %v2929_v60 }
 0x2f2   : > { %v2205_v32 = vmul.f32 %v2197_v17, %v2186_v52  ;;  %v2206_v53 = vmul.f32 %v2198_v57, %v2182_v23  ;;  %v2258_v20 = vmul.f32 %v5898_v43, %v2217_v24  ;;  %v2919_v57 = vadd.f32 0.18741608, %v2918_v51  ;;  %v6244_v23 = vpop.permute.xlu0 %2284 }
 0x2f3   : > { %v2950_v59 = vmul.f32 %v6211_v31, %v6211_v31  ;;  %v2931_v49 = vmul.f32 %v2930_v6, %v2911_v3  ;;  %v6257_v61 = vadd.f32 %v6244_v23, %v6133_v4 }
 0x2f4   : > { %v2246_v38 = vmul.f32 %v6125_v30, %v2205_v32  ;;  %v2247_v29 = vmul.f32 %v6125_v30, %v2206_v53  ;;  %v2259_v30 = vmul.f32 %v5898_v43, %v2218_v19  ;;  %v2274_v22 = vadd.f32 %v2258_v20, %v5953_v1 }
 0x2f5   : > { %v6219_v46 = vmin.f32 %v2950_v59, 16.0  ;;  %v2932_v0 = vadd.f32 1.0, %v2931_v49  ;;  %v2920_v11 = vmul.f32 %v2919_v57, %v2911_v3  ;;  %v2211_v1 = vmul.f32 %v6044_v7, %v6022_v48 }
 0x2f6   : > { %v6213_v36 = vadd.f32 %v2246_v38, %v2129_v18  ;;  %v6215_v37 = vadd.f32 %v2247_v29, %v2130_v54  ;;  %v2275_v5 = vadd.f32 %v2259_v30, %v5956_v56  ;;  %v6230_v16 = vadd.f32 %v6127_v10, %v2274_v22 }
 0x2f7   : > { %v2952_v17 = vmul.f32 2.1237322e-06, %v6219_v46  ;;  %3775 = vrcp.f32 %v2932_v0  ;;  %v2963_v12 = vmul.f32 3.8918573e-05, %v6219_v46  ;;  %v2212_v3 = vmul.f32 %v6047_v35, %v6017_v14 }
 0x2f8   : > { %v6233_v18 = vadd.f32 %v6127_v10, %v2275_v5  ;;  %v2921_v58 = vadd.f32 1.1283791, %v2920_v11  ;;  %v6241_v26 = vmul.f32 0.70710677, %v6230_v16  ;;  %v2252_v27 = vmul.f32 %v6069_v21, %v2211_v1 }
 0x2f9   : > { %v2953_v9 = vadd.f32 0.00028619796, %v2952_v17  ;;  %v2964_v33 = vadd.f32 0.001143296, %v2963_v12  ;;  %v2253_v48 = vmul.f32 %v6069_v21, %v2212_v3  ;;  %v2944_v7 = vand.u32 2147483648, %v2932_v0 }
 0x2fa   : > { %v6247_v15 = vmul.f32 0.70710677, %v6233_v18  ;;  %v2830_v14 = vmul.f32 %v6241_v26, %v6241_v26  ;;  %v2942_v32 = vand.u32 2147483647, %v2932_v0  ;;  %v2922_v60 = vmul.f32 %v2921_v58, %v6156_v45 }
 0x2fb   : > { %v2954_v41 = vmul.f32 %v2953_v9, %v6219_v46  ;;  %v2965_v43 = vmul.f32 %v2964_v33, %v6219_v46  ;;  %vm2938_vm10 = vweird.f32 %v2932_v0  ;;  %v2945_v6 = vor.u32 1.1754944e-38, %v2944_v7 }
 0x2fc   : > { %v2870_v53 = vmul.f32 %v6247_v15, %v6247_v15  ;;  %v6260_v21 = vmin.f32 %v2830_v14, 16.0  ;;  %vm2943_vm12 = vcmp.eq.f32.partialorder %v2942_v32, 8.507059e+37  ;;  %v6281_v58 = vadd.f32 %v2253_v48, %v5999_v40 }
 0x2fd   : > { %v2955_v63 = vadd.f32 0.0036580483, %v2954_v41  ;;  %v3776_v55 = vpop.eup %3775  ;;  %v2966_v28 = vadd.f32 0.014752088, %v2965_v43 }
 0x2fe   : > { %v2934_v56 = vmul.f32 %v3776_v55, %v2932_v0  ;;  %vm2939_vm9 = vweird.f32 %v3776_v55  ;;  %v6263_v19 = vmin.f32 %v2870_v53, 16.0  ;;  %v2832_v51 = vmul.f32 2.1237322e-06, %v6260_v21 }
 0x2ff   : > { %v2956_v54 = vmul.f32 %v2955_v63, %v6219_v46  ;;  %v2967_v44 = vmul.f32 %v2966_v28, %v6219_v46  ;;  %vm2940_vm11 = vmor %vm2938_vm10, %vm2939_vm9  ;;  %v2843_v4 = vmul.f32 3.8918573e-05, %v6260_v21  ;;  %v6274_v63 = vadd.f32 %v2252_v27, %v5997_v50  ;;  %v6283_v28 = vpop.permute.xlu1 %2294 }
 0x300   : > { %v2935_v10 = vsub.f32 1.0, %v2934_v56  ;;  %v2872_v45 = vmul.f32 2.1237322e-06, %v6263_v19  ;;  %v2883_v20 = vmul.f32 3.8918573e-05, %v6263_v19  ;;  %v6288_v27 = vadd.f32 %v6244_v23, %v6135_v8 }
 0x301   : > { %v2957_v52 = vadd.f32 0.05243302, %v2956_v54  ;;  %v2968_v38 = vadd.f32 0.112945676, %v2967_v44  ;;  %v2833_v17 = vadd.f32 0.00028619796, %v2832_v51  ;;  %v6301_v8 = vadd.f32 %v6283_v28, %v6175_v13 }
 0x302   : > { %v2936_v35 = vmul.f32 %v3776_v55, %v2935_v10  ;;  %v2844_v57 = vadd.f32 0.001143296, %v2843_v4  ;;  %v2873_v5 = vadd.f32 0.00028619796, %v2872_v45  ;;  %v2884_v12 = vadd.f32 0.001143296, %v2883_v20 }
 0x303   : > { %v2958_v24 = vmul.f32 %v2957_v52, %v6219_v46  ;;  %v2969_v59 = vmul.f32 %v2968_v38, %v6219_v46  ;;  %v2834_v11 = vmul.f32 %v2833_v17, %v6260_v21  ;;  %v2332_v10 = vmul.f32 0.5, %v6147_v62 }
 0x304   : > { %v2937_v29 = vadd.f32 %v3776_v55, %v2936_v35  ;;  %v2845_v33 = vmul.f32 %v2844_v57, %v6260_v21  ;;  %v2874_v43 = vmul.f32 %v2873_v5, %v6263_v19  ;;  %v2885_v1 = vmul.f32 %v2884_v12, %v6263_v19 }
 0x305   : > { %v2970_v0 = vadd.f32 0.4994258, %v2969_v59  ;;  %v2959_v22 = vadd.f32 0.18741608, %v2958_v24  ;;  %v2835_v54 = vadd.f32 0.0036580483, %v2834_v11 }
 0x306   : > { %v2941_v49 = vsel %vm2940_vm11, %v3776_v55, %v2937_v29  ;;  %v2846_v3 = vadd.f32 0.014752088, %v2845_v33  ;;  %v2875_v7 = vadd.f32 0.0036580483, %v2874_v43  ;;  %v2886_v50 = vadd.f32 0.014752088, %v2885_v1 }
 0x307   : > { %v2946_v30 = vsel %vm2943_vm12, %v2945_v6, %v2941_v49  ;;  %v2971_v41 = vmul.f32 %v2970_v0, %v6219_v46  ;;  %v6291_v44 = vmul.f32 0.70710677, %v6257_v61  ;;  %v2960_v14 = vmul.f32 %v2959_v22, %v6219_v46 }
 0x308   : > { %v2947_v9 = vmul.f32 %v2946_v30, %v2922_v60  ;;  %v2836_v48 = vmul.f32 %v2835_v54, %v6260_v21  ;;  %v2847_v35 = vmul.f32 %v2846_v3, %v6260_v21  ;;  %v2876_v62 = vmul.f32 %v2875_v7, %v6263_v19 }
 0x309   : > { %v6278_v56 = vadd.f32 1.0, %v2971_v41  ;;  %v2887_v32 = vmul.f32 %v2886_v50, %v6263_v19  ;;  %v6305_v46 = vadd.f32 %v6283_v28, %v6178_v2  ;;  %v6308_v29 = vmul.f32 0.70710677, %v6288_v27 }
 0x30a   : > { %v3665_v55 = vclamps-f32 %v2947_v9, 1.0  ;;  %v2837_v53 = vadd.f32 0.05243302, %v2836_v48  ;;  %v2848_v60 = vadd.f32 0.112945676, %v2847_v35  ;;  %v6312_v24 = vmul.f32 %v6291_v44, %v6291_v44 }
 0x30b   : > { %3777 = vrcp.f32 %v6278_v56  ;;  %v2877_v38 = vadd.f32 0.05243302, %v2876_v62  ;;  %v2888_v6 = vadd.f32 0.112945676, %v2887_v32  ;;  %v6315_v59 = vmul.f32 0.70710677, %v6301_v8 }
 0x30c   : > { %v3004_v52 = vadd.f32 1.0, %v3665_v55  ;;  %v2961_v13 = vadd.f32 1.1283791, %v2960_v14  ;;  %v2838_v51 = vmul.f32 %v2837_v53, %v6260_v21  ;;  %v2849_v4 = vmul.f32 %v2848_v60, %v6260_v21 }
 0x30d   : > { %v2878_v49 = vmul.f32 %v2877_v38, %v6263_v19  ;;  %v2982_v45 = vand.u32 2147483647, %v6278_v56  ;;  %v2889_v20 = vmul.f32 %v2888_v6, %v6263_v19  ;;  %v2670_v30 = vmul.f32 %v6315_v59, %v6315_v59 }
 0x30e   : > { %v3020_v40 = vmul.f32 %v3004_v52, %v2332_v10  ;;  %v6325_v0 = vmul.f32 0.70710677, %v6305_v46  ;;  %v2839_v57 = vadd.f32 0.18741608, %v2838_v51  ;;  %v2850_v9 = vadd.f32 0.4994258, %v2849_v4 }
 0x30f   : > { %v6330_v22 = vadd.f32 %v6283_v28, %v6139_v39  ;;  %v6333_v5 = vmul.f32 0.5, %v6206_v25  ;;  %v2879_v12 = vadd.f32 0.18741608, %v2878_v49  ;;  %v2890_v41 = vadd.f32 0.4994258, %v2889_v20 }
 0x310   : > { %3101 = vmatpush.msrb.mxu2 %v3020_v40  ;;  %v6335_v11 = vmin.f32 %v2670_v30, 16.0  ;;  %v2984_v55 = vand.u32 2147483648, %v6278_v56  ;;  %v2840_v43 = vmul.f32 %v2839_v57, %v6260_v21  ;;  %v2851_v1 = vmul.f32 %v2850_v9, %v6260_v21 }
 0x311   : > { %v3778_v2 = vpop.eup %3777  ;;  %v2880_v54 = vmul.f32 %v2879_v12, %v6263_v19  ;;  %v2891_v3 = vmul.f32 %v2890_v41, %v6263_v19  ;;  %v2710_v25 = vmul.f32 %v6325_v0, %v6325_v0  ;;  %v6348_v7 = vmul.f32 0.70710677, %v6330_v22 }
 0x312   : > { %v2974_v17 = vmul.f32 %v3778_v2, %v6278_v56  ;;  %v2672_v39 = vmul.f32 2.1237322e-06, %v6335_v11  ;;  %vm2979_vm13 = vweird.f32 %v3778_v2  ;;  %v6345_v52 = vadd.f32 1.0, %v2851_v1 }
 0x313   : > { %v2962_v50 = vmul.f32 %v2961_v13, %v6211_v31  ;;  %v2841_v14 = vadd.f32 1.1283791, %v2840_v43  ;;  %v6351_v21 = vadd.f32 1.0, %v2891_v3  ;;  %vm2978_vm14 = vweird.f32 %v6278_v56 }
 0x314   : > { %v2975_v33 = vsub.f32 1.0, %v2974_v17  ;;  %v2673_v40 = vadd.f32 0.00028619796, %v2672_v39  ;;  %3779 = vrcp.f32 %v6345_v52  ;;  %v2683_v19 = vmul.f32 3.8918573e-05, %v6335_v11  ;;  %vm2980_vm15 = vmor %vm2978_vm14, %vm2979_vm13 }
 0x315   : > { %v2985_v35 = vor.u32 1.1754944e-38, %v2984_v55  ;;  %v2881_v62 = vadd.f32 1.1283791, %v2880_v54  ;;  %3781 = vrcp.f32 %v6351_v21  ;;  %v6357_v32 = vmin.f32 %v2710_v25, 16.0 }
 0x316   : > { %v2976_v10 = vmul.f32 %v3778_v2, %v2975_v33  ;;  %vm2983_vm0 = vcmp.eq.f32.partialorder %v2982_v45, 8.507059e+37  ;;  %v2864_v31 = vand.u32 2147483648, %v6345_v52  ;;  %v2750_v60 = vmul.f32 %v6348_v7, %v6348_v7 }
 0x317   : > { %v6363_v56 = vmul.f32 %v2841_v14, %v6241_v26  ;;  %v2862_v6 = vand.u32 2147483647, %v6345_v52  ;;  %v2674_v13 = vmul.f32 %v2673_v40, %v6335_v11  ;;  %v2902_v4 = vand.u32 2147483647, %v6351_v21 }
 0x318   : > { %v2977_v48 = vadd.f32 %v3778_v2, %v2976_v10  ;;  %v2904_v49 = vand.u32 2147483648, %v6351_v21  ;;  %vm2858_vm1 = vweird.f32 %v6345_v52  ;;  %v2882_v45 = vmul.f32 %v2881_v62, %v6247_v15 }
 0x319   : > { %v2675_v20 = vadd.f32 0.0036580483, %v2674_v13  ;;  %v2712_v30 = vmul.f32 2.1237322e-06, %v6357_v32  ;;  %v2723_v26 = vmul.f32 3.8918573e-05, %v6357_v32  ;;  %vm2898_vm2 = vweird.f32 %v6351_v21 }
 0x31a   : > { %v2981_v53 = vsel %vm2980_vm15, %v3778_v2, %v2977_v48  ;;  %v2684_v2 = vadd.f32 0.001143296, %v2683_v19  ;;  %v3780_v17 = vpop.eup %3779  ;;  %v2865_v9 = vor.u32 1.1754944e-38, %v2864_v31  ;;  %v6375_v41 = vmin.f32 %v2750_v60, 16.0 }
 0x31b   : > { %v2986_v38 = vsel %vm2983_vm0, %v2985_v35, %v2981_v53  ;;  %v3782_v33 = vpop.eup %3781  ;;  %v2854_v55 = vmul.f32 %v3780_v17, %v6345_v52  ;;  %vm2859_vm3 = vweird.f32 %v3780_v17  ;;  %vm6378_vm4 = vcmp.eq.f32.partialorder %v2862_v6, 8.507059e+37 }
 0x31c   : > { %v2987_v51 = vmul.f32 %v2986_v38, %v2962_v50  ;;  %v2685_v12 = vmul.f32 %v2684_v2, %v6335_v11  ;;  %v2676_v43 = vmul.f32 %v2675_v20, %v6335_v11  ;;  %v2713_v1 = vadd.f32 0.00028619796, %v2712_v30  ;;  %vm2860_vm7 = vmor %vm2858_vm1, %vm2859_vm3 }
 0x31d   : > { %v2894_v3 = vmul.f32 %v3782_v33, %v6351_v21  ;;  %vm2899_vm5 = vweird.f32 %v3782_v33  ;;  %vm6384_vm6 = vcmp.eq.f32.partialorder %v2902_v4, 8.507059e+37  ;;  %v2855_v10 = vsub.f32 1.0, %v2854_v55 }
 0x31e   : > { %v3666_v57 = vclamps-f32 %v2987_v51, 1.0  ;;  %v2686_v25 = vadd.f32 0.014752088, %v2685_v12  ;;  %v2677_v50 = vadd.f32 0.05243302, %v2676_v43  ;;  %v2714_v14 = vmul.f32 %v2713_v1, %v6357_v32  ;;  %vm2900_vm8 = vmor %vm2898_vm2, %vm2899_vm5 }
 0x31f   : > { %v2724_v40 = vadd.f32 0.001143296, %v2723_v26  ;;  %v2895_v19 = vsub.f32 1.0, %v2894_v3  ;;  %v2752_v62 = vmul.f32 2.1237322e-06, %v6375_v41  ;;  %v2856_v53 = vmul.f32 %v3780_v17, %v2855_v10 }
 0x320   : > { %v3005_v54 = vadd.f32 1.0, %v3666_v57  ;;  %v2687_v35 = vmul.f32 %v2686_v25, %v6335_v11  ;;  %v2678_v31 = vmul.f32 %v2677_v50, %v6335_v11  ;;  %v2715_v60 = vadd.f32 0.0036580483, %v2714_v14 }
 0x321   : > { %v2725_v38 = vmul.f32 %v2724_v40, %v6357_v32  ;;  %v2896_v6 = vmul.f32 %v3782_v33, %v2895_v19  ;;  %v2753_v51 = vadd.f32 0.00028619796, %v2752_v62  ;;  %v2763_v4 = vmul.f32 3.8918573e-05, %v6375_v41 }
 0x322   : > { %v3021_v48 = vmul.f32 %v3005_v54, %v6333_v5  ;;  %v2688_v13 = vadd.f32 0.112945676, %v2687_v35  ;;  %v2857_v2 = vadd.f32 %v3780_v17, %v2856_v53  ;;  %v2905_v20 = vor.u32 1.1754944e-38, %v2904_v49  ;;  %v6420_v53 = vpop.permute.xlu1 %2289 }
 0x323   : > { %v2716_v5 = vmul.f32 %v2715_v60, %v6357_v32  ;;  %v2726_v30 = vadd.f32 0.014752088, %v2725_v38  ;;  %v2897_v26 = vadd.f32 %v3782_v33, %v2896_v6  ;;  %v2679_v57 = vadd.f32 0.18741608, %v2678_v31 }
 0x324   : > { %3124 = vmatpush.msrb.mxu3 %v3021_v48  ;;  %v2689_v12 = vmul.f32 %v2688_v13, %v6335_v11  ;;  %v2754_v55 = vmul.f32 %v2753_v51, %v6375_v41  ;;  %v2861_v43 = vsel %vm2860_vm7, %v3780_v17, %v2857_v2  ;;  %v2764_v54 = vadd.f32 0.001143296, %v2763_v4 }
 0x325   : > { %v2717_v1 = vadd.f32 0.05243302, %v2716_v5  ;;  %v2727_v49 = vmul.f32 %v2726_v30, %v6357_v32  ;;  %v2866_v3 = vsel %vm6378_vm4, %v2865_v9, %v2861_v43  ;;  %v2901_v52 = vsel %vm2900_vm8, %v3782_v33, %v2897_v26 }
 0x326   : > { %v2690_v25 = vadd.f32 0.4994258, %v2689_v12  ;;  %v2755_v10 = vadd.f32 0.0036580483, %v2754_v55  ;;  %v6409_v50 = vmul.f32 %v6308_v29, %v6308_v29  ;;  %v2867_v17 = vmul.f32 %v2866_v3, %v6363_v56 }
 0x327   : > { %v2906_v21 = vsel %vm6384_vm6, %v2905_v20, %v2901_v52  ;;  %v2718_v14 = vmul.f32 %v2717_v1, %v6357_v32  ;;  %v2728_v19 = vadd.f32 0.112945676, %v2727_v49  ;;  %v2330_v33 = vmul.f32 0.5, %v6230_v16 }
 0x328   : > { %v2907_v40 = vmul.f32 %v2906_v21, %v2882_v45  ;;  %v2691_v48 = vmul.f32 %v2690_v25, %v6335_v11  ;;  %v2756_v9 = vmul.f32 %v2755_v10, %v6375_v41  ;;  %v3663_v15 = vclamps-f32 %v2867_v17, 1.0 }
 0x329   : > { %v2680_v35 = vmul.f32 %v2679_v57, %v6335_v11  ;;  %v2765_v62 = vmul.f32 %v2764_v54, %v6375_v41  ;;  %v2729_v31 = vmul.f32 %v2728_v19, %v6357_v32  ;;  %v2719_v38 = vadd.f32 0.18741608, %v2718_v14 }
 0x32a   : > { %v3664_v56 = vclamps-f32 %v2907_v40, 1.0  ;;  %v6422_v39 = vadd.f32 1.0, %v2691_v48  ;;  %v2757_v45 = vadd.f32 0.05243302, %v2756_v9  ;;  %v3002_v60 = vadd.f32 1.0, %v3663_v15 }
 0x32b   : > { %v2766_v6 = vadd.f32 0.014752088, %v2765_v62  ;;  %v6427_v13 = vadd.f32 %v6283_v28, %v6142_v42  ;;  %v6431_v16 = vadd.f32 %v6244_v23, %v6213_v36  ;;  %v2331_v11 = vmul.f32 0.5, %v6233_v18 }
 0x32c   : > { %v3003_v51 = vadd.f32 1.0, %v3664_v56  ;;  %3783 = vrcp.f32 %v6422_v39  ;;  %v3018_v4 = vmul.f32 %v3002_v60, %v2330_v33  ;;  %v6436_v2 = vmul.f32 0.5, %v6301_v8 }
 0x32d   : > { %v2730_v20 = vadd.f32 0.4994258, %v2729_v31  ;;  %v6440_v5 = vadd.f32 %v6420_v53, %v6274_v63  ;;  %v2681_v28 = vadd.f32 1.1283791, %v2680_v35  ;;  %v2758_v30 = vmul.f32 %v2757_v45, %v6375_v41 }
 0x32e   : > { %v3019_v42 = vmul.f32 %v3003_v51, %v2331_v11  ;;  %v2767_v36 = vmul.f32 %v2766_v6, %v6375_v41  ;;  %3055 = vmatpush.msrb.mxu0 %v3018_v4  ;;  %v2702_v18 = vand.u32 2147483647, %v6422_v39  ;;  %v2720_v26 = vmul.f32 %v2719_v38, %v6357_v32 }
 0x32f   : > { %v2731_v57 = vmul.f32 %v2730_v20, %v6357_v32  ;;  %v6448_v8 = vmul.f32 0.70710677, %v6427_v13  ;;  %v2704_v63 = vand.u32 2147483648, %v6422_v39  ;;  %v2759_v12 = vadd.f32 0.18741608, %v2758_v30 }
 0x330   : > { %3078 = vmatpush.msrb.mxu1 %v3019_v42  ;;  %v2768_v55 = vadd.f32 0.112945676, %v2767_v36  ;;  %v6453_v43 = vadd.f32 %v6420_v53, %v6281_v58  ;;  %v6456_v1 = vmul.f32 0.5, %v6305_v46  ;;  %v6463_v54 = vmul.f32 0.70710677, %v6440_v5 }
 0x331   : > { %v6458_v49 = vadd.f32 1.0, %v2731_v57  ;;  %v2790_v32 = vmul.f32 %v6448_v8, %v6448_v8  ;;  %v2682_v52 = vmul.f32 %v2681_v28, %v6315_v59  ;;  %v2760_v25 = vmul.f32 %v2759_v12, %v6375_v41 }
 0x332   : > { %v3784_v3 = vpop.eup %3783  ;;  %v2769_v10 = vmul.f32 %v2768_v55, %v6375_v41  ;;  %v6469_v58 = vmul.f32 0.70710677, %v6453_v43  ;;  %vm2698_vm9 = vweird.f32 %v6422_v39  ;;  %v2721_v17 = vadd.f32 1.1283791, %v2720_v26 }
 0x333   : > { %v2694_v46 = vmul.f32 %v3784_v3, %v6422_v39  ;;  %3785 = vrcp.f32 %v6458_v49  ;;  %vm2699_vm10 = vweird.f32 %v3784_v3  ;;  %vm6474_vm11 = vcmp.eq.f32.partialorder %v2702_v18, 8.507059e+37 }
 0x334   : > { %v2705_v59 = vor.u32 1.1754944e-38, %v2704_v63  ;;  %v6478_v14 = vmin.f32 %v2790_v32, 16.0  ;;  %v2742_v48 = vand.u32 2147483647, %v6458_v49  ;;  %v2770_v19 = vadd.f32 0.4994258, %v2769_v10  ;;  %vm2700_vm13 = vmor %vm2698_vm9, %vm2699_vm10 }
 0x335   : > { %v2695_v40 = vsub.f32 1.0, %v2694_v46  ;;  %v2590_v9 = vmul.f32 %v6463_v54, %v6463_v54  ;;  %v2744_v33 = vand.u32 2147483648, %v6458_v49  ;;  %v2761_v15 = vadd.f32 1.1283791, %v2760_v25 }
 0x336   : > { %v2792_v35 = vmul.f32 2.1237322e-06, %v6478_v14  ;;  %v2630_v62 = vmul.f32 %v6469_v58, %v6469_v58  ;;  %v2771_v31 = vmul.f32 %v2770_v19, %v6375_v41  ;;  %v2803_v45 = vmul.f32 3.8918573e-05, %v6478_v14 }
 0x337   : > { %v2696_v56 = vmul.f32 %v3784_v3, %v2695_v40  ;;  %v6489_v60 = vmin.f32 %v2590_v9, 16.0  ;;  %v2722_v38 = vmul.f32 %v2721_v17, %v6325_v0  ;;  %vm2738_vm12 = vweird.f32 %v6458_v49 }
 0x338   : > { %v2793_v6 = vadd.f32 0.00028619796, %v2792_v35  ;;  %v6495_v11 = vadd.f32 %v6420_v53, %v6170_v47  ;;  %v6497_v20 = vadd.f32 1.0, %v2771_v31  ;;  %v2804_v42 = vadd.f32 0.001143296, %v2803_v45 }
 0x339   : > { %v3786_v51 = vpop.eup %3785  ;;  %v2697_v4 = vadd.f32 %v3784_v3, %v2696_v56  ;;  %v2592_v41 = vmul.f32 2.1237322e-06, %v6489_v60  ;;  %vm6504_vm14 = vcmp.eq.f32.partialorder %v2742_v48, 8.507059e+37  ;;  %v2745_v30 = vor.u32 1.1754944e-38, %v2744_v33 }
 0x33a   : > { %v2734_v0 = vmul.f32 %v3786_v51, %v6458_v49  ;;  %v2794_v47 = vmul.f32 %v2793_v6, %v6478_v14  ;;  %v2603_v36 = vmul.f32 3.8918573e-05, %v6489_v60  ;;  %v6511_v26 = vmul.f32 %v2761_v15, %v6348_v7 }
 0x33b   : > { %v2701_v18 = vsel %vm2700_vm13, %v3784_v3, %v2697_v4  ;;  %3787 = vrcp.f32 %v6497_v20  ;;  %v6514_v57 = vmin.f32 %v2630_v62, 16.0  ;;  %v6519_v55 = vmul.f32 0.70710677, %v6495_v11 }
 0x33c   : > { %v2706_v39 = vsel %vm6474_vm11, %v2705_v59, %v2701_v18  ;;  %v2735_v63 = vsub.f32 1.0, %v2734_v0  ;;  %v2795_v12 = vadd.f32 0.0036580483, %v2794_v47  ;;  %vm2739_vm15 = vweird.f32 %v3786_v51 }
 0x33d   : > { %v2707_v32 = vmul.f32 %v2706_v39, %v2682_v52  ;;  %v2805_v25 = vmul.f32 %v2804_v42, %v6478_v14  ;;  %v2593_v3 = vadd.f32 0.00028619796, %v2592_v41  ;;  %v2782_v7 = vand.u32 2147483647, %v6497_v20  ;;  %vm2740_vm0 = vmor %vm2738_vm12, %vm2739_vm15 }
 0x33e   : > { %v2736_v10 = vmul.f32 %v3786_v51, %v2735_v63  ;;  %v2796_v46 = vmul.f32 %v2795_v12, %v6478_v14  ;;  %v2604_v17 = vadd.f32 0.001143296, %v2603_v36  ;;  %v2632_v59 = vmul.f32 2.1237322e-06, %v6514_v57 }
 0x33f   : > { %v3659_v40 = vclamps-f32 %v2707_v32, 1.0  ;;  %v2806_v48 = vadd.f32 0.014752088, %v2805_v25  ;;  %v2594_v21 = vmul.f32 %v2593_v3, %v6489_v60  ;;  %v2643_v33 = vmul.f32 3.8918573e-05, %v6514_v57 }
 0x340   : > { %v2737_v19 = vadd.f32 %v3786_v51, %v2736_v10  ;;  %v2797_v9 = vadd.f32 0.05243302, %v2796_v46  ;;  %v2605_v52 = vmul.f32 %v2604_v17, %v6489_v60  ;;  %v2633_v31 = vadd.f32 0.00028619796, %v2632_v59 }
 0x341   : > { %v3788_v15 = vpop.eup %3787  ;;  %v2998_v35 = vadd.f32 1.0, %v3659_v40  ;;  %v2807_v62 = vmul.f32 %v2806_v48, %v6478_v14  ;;  %v2595_v56 = vadd.f32 0.0036580483, %v2594_v21  ;;  %v2784_v4 = vand.u32 2147483648, %v6497_v20 }
 0x342   : > { %v2741_v45 = vsel %vm2740_vm0, %v3786_v51, %v2737_v19  ;;  %v2774_v6 = vmul.f32 %v3788_v15, %v6497_v20  ;;  %v2798_v42 = vmul.f32 %v2797_v9, %v6478_v14  ;;  %vm2779_vm1 = vweird.f32 %v3788_v15 }
 0x343   : > { %v3014_v41 = vmul.f32 %v2998_v35, %v6436_v2  ;;  %v2746_v0 = vsel %vm6504_vm14, %v2745_v30, %v2741_v45  ;;  %v2808_v47 = vadd.f32 0.112945676, %v2807_v62  ;;  %v2596_v49 = vmul.f32 %v2595_v56, %v6489_v60 }
 0x344   : > { %v2747_v36 = vmul.f32 %v2746_v0, %v2722_v38  ;;  %v2775_v18 = vsub.f32 1.0, %v2774_v6  ;;  %v2606_v39 = vadd.f32 0.014752088, %v2605_v52  ;;  %v2634_v12 = vmul.f32 %v2633_v31, %v6514_v57 }
 0x345   : > { %3056 = vmatpush.msrb.mxu0 %v3014_v41  ;;  %v2809_v51 = vmul.f32 %v2808_v47, %v6478_v14  ;;  %v2597_v63 = vadd.f32 0.05243302, %v2596_v49  ;;  %v2644_v32 = vadd.f32 0.001143296, %v2643_v33  ;;  %v2799_v2 = vadd.f32 0.18741608, %v2798_v42 }
 0x346   : > { %v3660_v25 = vclamps-f32 %v2747_v36, 1.0  ;;  %v2776_v3 = vmul.f32 %v3788_v15, %v2775_v18  ;;  %v2607_v28 = vmul.f32 %v2606_v39, %v6489_v60  ;;  %v2635_v46 = vadd.f32 0.0036580483, %v2634_v12 }
 0x347   : > { %v2810_v30 = vadd.f32 0.4994258, %v2809_v51  ;;  %v2598_v10 = vmul.f32 %v2597_v63, %v6489_v60  ;;  %v2645_v38 = vmul.f32 %v2644_v32, %v6514_v57  ;;  %vm2778_vm2 = vweird.f32 %v6497_v20 }
 0x348   : > { %v2999_v17 = vadd.f32 1.0, %v3660_v25  ;;  %v2777_v40 = vadd.f32 %v3788_v15, %v2776_v3  ;;  %v2608_v48 = vadd.f32 0.112945676, %v2607_v28  ;;  %vm2780_vm3 = vmor %vm2778_vm2, %vm2779_vm1  ;;  %vm2783_vm4 = vcmp.eq.f32.partialorder %v2782_v7, 8.507059e+37 }
 0x349   : > { %v2785_v21 = vor.u32 1.1754944e-38, %v2784_v4  ;;  %v2811_v59 = vmul.f32 %v2810_v30, %v6478_v14  ;;  %v2646_v19 = vadd.f32 0.014752088, %v2645_v38  ;;  %v2636_v35 = vmul.f32 %v2635_v46, %v6514_v57 }
 0x34a   : > { %v3015_v9 = vmul.f32 %v2999_v17, %v6456_v1  ;;  %v2781_v52 = vsel %vm2780_vm3, %v3788_v15, %v2777_v40  ;;  %v2609_v33 = vmul.f32 %v2608_v48, %v6489_v60  ;;  %v2800_v56 = vmul.f32 %v2799_v2, %v6478_v14 }
 0x34b   : > { %v2786_v62 = vsel %vm2783_vm4, %v2785_v21, %v2781_v52  ;;  %v6551_v31 = vadd.f32 1.0, %v2811_v59  ;;  %v2599_v20 = vadd.f32 0.18741608, %v2598_v10  ;;  %v2647_v6 = vmul.f32 %v2646_v19, %v6514_v57 }
 0x34c   : > { %3079 = vmatpush.msrb.mxu1 %v3015_v9  ;;  %v2787_v7 = vmul.f32 %v2786_v62, %v6511_v26  ;;  %v2610_v45 = vadd.f32 0.4994258, %v2609_v33  ;;  %v2510_v1 = vmul.f32 %v6519_v55, %v6519_v55  ;;  %v6559_v15 = vadd.f32 %v6244_v23, %v6215_v37 }
 0x34d   : > { %v6562_v4 = vmin.f32 %v6312_v24, 16.0  ;;  %v6565_v14 = vmin.f32 %v6409_v50, 16.0  ;;  %3789 = vrcp.f32 %v6551_v31  ;;  %v6569_v26 = vmul.f32 0.70710677, %v6431_v16 }
 0x34e   : > { %v3661_v42 = vclamps-f32 %v2787_v7, 1.0  ;;  %v2611_v41 = vmul.f32 %v2610_v45, %v6489_v60  ;;  %v2637_v0 = vadd.f32 0.05243302, %v2636_v35  ;;  %v2328_v47 = vmul.f32 0.5, %v6330_v22 }
 0x34f   : > { %v6574_v37 = vmul.f32 0.5, %v6427_v13  ;;  %v2648_v23 = vadd.f32 0.112945676, %v2647_v6  ;;  %v6576_v24 = vmin.f32 %v2510_v1, 16.0  ;;  %v2801_v50 = vadd.f32 1.1283791, %v2800_v56 }
 0x350   : > { %v3000_v49 = vadd.f32 1.0, %v3661_v42  ;;  %v2600_v36 = vmul.f32 %v2599_v20, %v6489_v60  ;;  %v6579_v18 = vadd.f32 1.0, %v2611_v41  ;;  %v2822_v39 = vand.u32 2147483647, %v6551_v31 }
 0x351   : > { %v2649_v51 = vmul.f32 %v2648_v23, %v6514_v57  ;;  %v2512_v63 = vmul.f32 2.1237322e-06, %v6576_v24  ;;  %v2523_v22 = vmul.f32 3.8918573e-05, %v6576_v24  ;;  %v2638_v13 = vmul.f32 %v2637_v0, %v6514_v57 }
 0x352   : > { %v3016_v12 = vmul.f32 %v3000_v49, %v2328_v47  ;;  %3791 = vrcp.f32 %v6579_v18  ;;  %v6589_v32 = vadd.f32 %v6420_v53, %v6172_v34  ;;  %v2824_v25 = vand.u32 2147483648, %v6551_v31 }
 0x353   : > { %v3790_v60 = vpop.eup %3789  ;;  %v6593_v3 = vmul.f32 0.5, %v6440_v5  ;;  %v2650_v2 = vadd.f32 0.4994258, %v2649_v51  ;;  %v2513_v28 = vadd.f32 0.00028619796, %v2512_v63  ;;  %v2802_v30 = vmul.f32 %v2801_v50, %v6448_v8 }
 0x354   : > { %3102 = vmatpush.msrb.mxu2 %v3016_v12  ;;  %v2814_v10 = vmul.f32 %v3790_v60, %v6551_v31  ;;  %vm2818_vm5 = vweird.f32 %v6551_v31  ;;  %v2524_v46 = vadd.f32 0.001143296, %v2523_v22  ;;  %vm6598_vm6 = vcmp.eq.f32.partialorder %v2822_v39, 8.507059e+37 }
 0x355   : > { %v2601_v34 = vadd.f32 1.1283791, %v2600_v36  ;;  %v2651_v53 = vmul.f32 %v2650_v2, %v6514_v57  ;;  %v2514_v5 = vmul.f32 %v2513_v28, %v6576_v24  ;;  %v2639_v40 = vadd.f32 0.18741608, %v2638_v13 }
 0x356   : > { %v2815_v17 = vsub.f32 1.0, %v2814_v10  ;;  %v2525_v48 = vmul.f32 %v2524_v46, %v6576_v24  ;;  %v6606_v8 = vmul.f32 0.70710677, %v6589_v32  ;;  %v2825_v21 = vor.u32 1.1754944e-38, %v2824_v25 }
 0x357   : > { %v2622_v59 = vand.u32 2147483647, %v6579_v18  ;;  %v6609_v19 = vadd.f32 1.0, %v2651_v53  ;;  %v2515_v9 = vadd.f32 0.0036580483, %v2514_v5  ;;  %vm2819_vm7 = vweird.f32 %v3790_v60 }
 0x358   : > { %v3792_v52 = vpop.eup %3791  ;;  %v2816_v33 = vmul.f32 %v3790_v60, %v2815_v17  ;;  %v2526_v35 = vadd.f32 0.014752088, %v2525_v48  ;;  %v2550_v62 = vmul.f32 %v6606_v8, %v6606_v8  ;;  %v2602_v56 = vmul.f32 %v2601_v34, %v6463_v54  ;;  %vm2820_vm9 = vmor %vm2818_vm5, %vm2819_vm7 }
 0x359   : > { %v2614_v20 = vmul.f32 %v3792_v52, %v6579_v18  ;;  %vm2618_vm8 = vweird.f32 %v6579_v18  ;;  %3793 = vrcp.f32 %v6609_v19  ;;  %v2624_v45 = vand.u32 2147483648, %v6579_v18 }
 0x35a   : > { %v2817_v7 = vadd.f32 %v3790_v60, %v2816_v33  ;;  %v2640_v6 = vmul.f32 %v2639_v40, %v6514_v57  ;;  %v2516_v1 = vmul.f32 %v2515_v9, %v6576_v24  ;;  %vm6622_vm10 = vcmp.eq.f32.partialorder %v2622_v59, 8.507059e+37 }
 0x35b   : > { %v2615_v42 = vsub.f32 1.0, %v2614_v20  ;;  %v2527_v54 = vmul.f32 %v2526_v35, %v6576_v24  ;;  %v6627_v0 = vmin.f32 %v2550_v62, 16.0  ;;  %vm2619_vm11 = vweird.f32 %v3792_v52 }
 0x35c   : > { %v2821_v47 = vsel %vm2820_vm9, %v3790_v60, %v2817_v7  ;;  %v2517_v23 = vadd.f32 0.05243302, %v2516_v1  ;;  %v2432_v49 = vmul.f32 2.1237322e-06, %v6562_v4  ;;  %v2625_v51 = vor.u32 1.1754944e-38, %v2624_v45  ;;  %vm2620_vm12 = vmor %vm2618_vm8, %vm2619_vm11 }
 0x35d   : > { %v2826_v57 = vsel %vm6598_vm6, %v2825_v21, %v2821_v47  ;;  %v2616_v50 = vmul.f32 %v3792_v52, %v2615_v42  ;;  %v2528_v31 = vadd.f32 0.112945676, %v2527_v54  ;;  %v2552_v36 = vmul.f32 2.1237322e-06, %v6627_v0 }
 0x35e   : > { %v2827_v39 = vmul.f32 %v2826_v57, %v2802_v30  ;;  %v2641_v63 = vadd.f32 1.1283791, %v2640_v6  ;;  %v2563_v22 = vmul.f32 3.8918573e-05, %v6627_v0  ;;  %v2518_v60 = vmul.f32 %v2517_v23, %v6576_v24 }
 0x35f   : > { %v3794_v12 = vpop.eup %3793  ;;  %v2617_v13 = vadd.f32 %v3792_v52, %v2616_v50  ;;  %v2529_v25 = vmul.f32 %v2528_v31, %v6576_v24  ;;  %v2553_v2 = vadd.f32 0.00028619796, %v2552_v36  ;;  %v2664_v30 = vand.u32 2147483648, %v6609_v19 }
 0x360   : > { %v3662_v28 = vclamps-f32 %v2827_v39, 1.0  ;;  %v2654_v10 = vmul.f32 %v3794_v12, %v6609_v19  ;;  %v2433_v46 = vadd.f32 0.00028619796, %v2432_v49  ;;  %v2564_v5 = vadd.f32 0.001143296, %v2563_v22 }
 0x361   : > { %v2621_v38 = vsel %vm2620_vm12, %v3792_v52, %v2617_v13  ;;  %v2530_v34 = vadd.f32 0.4994258, %v2529_v25  ;;  %v2554_v53 = vmul.f32 %v2553_v2, %v6627_v0  ;;  %v2443_v21 = vmul.f32 3.8918573e-05, %v6562_v4 }
 0x362   : > { %v3001_v17 = vadd.f32 1.0, %v3662_v28  ;;  %v2626_v40 = vsel %vm6622_vm10, %v2625_v51, %v2621_v38  ;;  %v2655_v48 = vsub.f32 1.0, %v2654_v10  ;;  %v2519_v18 = vadd.f32 0.18741608, %v2518_v60 }
 0x363   : > { %v2627_v59 = vmul.f32 %v2626_v40, %v2602_v56  ;;  %v2531_v9 = vmul.f32 %v2530_v34, %v6576_v24  ;;  %v2565_v33 = vmul.f32 %v2564_v5, %v6627_v0  ;;  %vm2659_vm13 = vweird.f32 %v3794_v12 }
 0x364   : > { %v3017_v35 = vmul.f32 %v3001_v17, %v6574_v37  ;;  %v2656_v52 = vmul.f32 %v3794_v12, %v2655_v48  ;;  %v2662_v62 = vand.u32 2147483647, %v6609_v19  ;;  %v2555_v45 = vadd.f32 0.0036580483, %v2554_v53 }
 0x365   : > { %v3657_v20 = vclamps-f32 %v2627_v59, 1.0  ;;  %v6649_v7 = vadd.f32 1.0, %v2531_v9  ;;  %v2566_v6 = vadd.f32 0.014752088, %v2565_v33  ;;  %vm2658_vm14 = vweird.f32 %v6609_v19 }
 0x366   : > { %3125 = vmatpush.msrb.mxu3 %v3017_v35  ;;  %v2657_v1 = vadd.f32 %v3794_v12, %v2656_v52  ;;  %v2665_v56 = vor.u32 1.1754944e-38, %v2664_v30  ;;  %v2434_v42 = vmul.f32 %v2433_v46, %v6562_v4  ;;  %vm2660_vm15 = vmor %vm2658_vm14, %vm2659_vm13  ;;  %v2520_v37 = vmul.f32 %v2519_v18, %v6576_v24 }
 0x367   : > { %v2996_v41 = vadd.f32 1.0, %v3657_v20  ;;  %3795 = vrcp.f32 %v6649_v7  ;;  %v2444_v54 = vadd.f32 0.001143296, %v2443_v21  ;;  %v2642_v47 = vmul.f32 %v2641_v63, %v6469_v58 }
 0x368   : > { %v2661_v23 = vsel %vm2660_vm15, %v3794_v12, %v2657_v1  ;;  %vm2663_vm0 = vcmp.eq.f32.partialorder %v2662_v62, 8.507059e+37  ;;  %v2567_v49 = vmul.f32 %v2566_v6, %v6627_v0  ;;  %v6658_v57 = vmul.f32 0.70710677, %v6559_v15 }
 0x369   : > { %v3012_v19 = vmul.f32 %v2996_v41, %v6593_v3  ;;  %v2666_v50 = vsel %vm2663_vm0, %v2665_v56, %v2661_v23  ;;  %v2556_v31 = vmul.f32 %v2555_v45, %v6627_v0  ;;  %v2350_v24 = vmul.f32 %v6569_v26, %v6569_v26 }
 0x36a   : > { %v2667_v36 = vmul.f32 %v2666_v50, %v2642_v47  ;;  %v2568_v39 = vadd.f32 0.112945676, %v2567_v49  ;;  %v2521_v51 = vadd.f32 1.1283791, %v2520_v37  ;;  %v2435_v58 = vadd.f32 0.0036580483, %v2434_v42 }
 0x36b   : > { %3103 = vmatpush.msrb.mxu2 %v3012_v19  ;;  %v2445_v63 = vmul.f32 %v2444_v54, %v6562_v4  ;;  %v2472_v22 = vmul.f32 2.1237322e-06, %v6565_v14  ;;  %v2483_v3 = vmul.f32 3.8918573e-05, %v6565_v14  ;;  %v2390_v25 = vmul.f32 %v6658_v57, %v6658_v57 }
 0x36c   : > { %v3658_v12 = vclamps-f32 %v2667_v36, 1.0  ;;  %v2569_v13 = vmul.f32 %v2568_v39, %v6627_v0  ;;  %v2557_v2 = vadd.f32 0.05243302, %v2556_v31  ;;  %v6670_v30 = vmin.f32 %v2350_v24, 16.0 }
 0x36d   : > { %v3796_v60 = vpop.eup %3795  ;;  %v2446_v28 = vadd.f32 0.014752088, %v2445_v63  ;;  %v2473_v10 = vadd.f32 0.00028619796, %v2472_v22  ;;  %v2325_v46 = vmul.f32 0.5, %v6453_v43  ;;  %v2522_v53 = vmul.f32 %v2521_v51, %v6519_v55 }
 0x36e   : > { %v2997_v38 = vadd.f32 1.0, %v3658_v12  ;;  %v2534_v34 = vmul.f32 %v3796_v60, %v6649_v7  ;;  %v2570_v5 = vadd.f32 0.4994258, %v2569_v13  ;;  %v2436_v17 = vmul.f32 %v2435_v58, %v6562_v4 }
 0x36f   : > { %v2447_v40 = vmul.f32 %v2446_v28, %v6562_v4  ;;  %v2544_v59 = vand.u32 2147483648, %v6649_v7  ;;  %v2484_v18 = vadd.f32 0.001143296, %v2483_v3  ;;  %v2558_v9 = vmul.f32 %v2557_v2, %v6627_v0 }
 0x370   : > { %v3013_v48 = vmul.f32 %v2997_v38, %v2325_v46  ;;  %v2535_v21 = vsub.f32 1.0, %v2534_v34  ;;  %v2571_v33 = vmul.f32 %v2570_v5, %v6627_v0  ;;  %v2474_v35 = vmul.f32 %v2473_v10, %v6565_v14 }
 0x371   : > { %v2448_v43 = vadd.f32 0.112945676, %v2447_v40  ;;  %vm2539_vm1 = vweird.f32 %v3796_v60  ;;  %v2542_v55 = vand.u32 2147483647, %v6649_v7  ;;  %v2485_v62 = vmul.f32 %v2484_v18, %v6565_v14 }
 0x372   : > { %3126 = vmatpush.msrb.mxu3 %v3013_v48  ;;  %v2536_v52 = vmul.f32 %v3796_v60, %v2535_v21  ;;  %vm2538_vm2 = vweird.f32 %v6649_v7  ;;  %v6684_v20 = vadd.f32 1.0, %v2571_v33  ;;  %v2437_v45 = vadd.f32 0.05243302, %v2436_v17 }
 0x373   : > { %v2449_v6 = vmul.f32 %v2448_v43, %v6562_v4  ;;  %v2545_v56 = vor.u32 1.1754944e-38, %v2544_v59  ;;  %v2486_v42 = vadd.f32 0.014752088, %v2485_v62  ;;  %v2352_v41 = vmul.f32 2.1237322e-06, %v6670_v30  ;;  %vm2540_vm3 = vmor %vm2538_vm2, %vm2539_vm1 }
 0x374   : > { %v2537_v1 = vadd.f32 %v3796_v60, %v2536_v52  ;;  %v2559_v37 = vadd.f32 0.18741608, %v2558_v9  ;;  %3797 = vrcp.f32 %v6684_v20  ;;  %v2475_v54 = vadd.f32 0.0036580483, %v2474_v35 }
 0x375   : > { %v2363_v47 = vmul.f32 3.8918573e-05, %v6670_v30  ;;  %vm2543_vm4 = vcmp.eq.f32.partialorder %v2542_v55, 8.507059e+37  ;;  %v2450_v7 = vadd.f32 0.4994258, %v2449_v6  ;;  %v2487_v49 = vmul.f32 %v2486_v42, %v6565_v14 }
 0x376   : > { %v2541_v23 = vsel %vm2540_vm3, %v3796_v60, %v2537_v1  ;;  %v2438_v50 = vmul.f32 %v2437_v45, %v6562_v4  ;;  %v2353_v39 = vadd.f32 0.00028619796, %v2352_v41  ;;  %v6693_v51 = vmin.f32 %v2390_v25, 16.0 }
 0x377   : > { %v2546_v19 = vsel %vm2543_vm4, %v2545_v56, %v2541_v23  ;;  %v2451_v24 = vmul.f32 %v2450_v7, %v6562_v4  ;;  %v2488_v36 = vadd.f32 0.112945676, %v2487_v49  ;;  %v2560_v58 = vmul.f32 %v2559_v37, %v6627_v0 }
 0x378   : > { %v2547_v31 = vmul.f32 %v2546_v19, %v2522_v53  ;;  %v2476_v63 = vmul.f32 %v2475_v54, %v6565_v14  ;;  %v2364_v22 = vadd.f32 0.001143296, %v2363_v47  ;;  %v2322_v2 = vmul.f32 0.5, %v6495_v11 }
 0x379   : > { %v6697_v13 = vadd.f32 1.0, %v2451_v24  ;;  %v2489_v3 = vmul.f32 %v2488_v36, %v6565_v14  ;;  %v2439_v28 = vadd.f32 0.18741608, %v2438_v50  ;;  %v2354_v0 = vmul.f32 %v2353_v39, %v6670_v30 }
 0x37a   : > { %v3655_v12 = vclamps-f32 %v2547_v31, 1.0  ;;  %v3798_v60 = vpop.eup %3797  ;;  %v2365_v10 = vmul.f32 %v2364_v22, %v6670_v30  ;;  %v2561_v38 = vadd.f32 1.1283791, %v2560_v58  ;;  %v2477_v34 = vadd.f32 0.05243302, %v2476_v63 }
 0x37b   : > { %v2574_v25 = vmul.f32 %v3798_v60, %v6684_v20  ;;  %3799 = vrcp.f32 %v6697_v13  ;;  %v2403_v53 = vmul.f32 3.8918573e-05, %v6693_v51  ;;  %v2490_v40 = vadd.f32 0.4994258, %v2489_v3 }
 0x37c   : > { %v2994_v46 = vadd.f32 1.0, %v3655_v12  ;;  %v2392_v48 = vmul.f32 2.1237322e-06, %v6693_v51  ;;  %v2582_v11 = vand.u32 2147483647, %v6684_v20  ;;  %v2584_v21 = vand.u32 2147483648, %v6684_v20 }
 0x37d   : > { %v2575_v17 = vsub.f32 1.0, %v2574_v25  ;;  %v2440_v59 = vmul.f32 %v2439_v28, %v6562_v4  ;;  %v2366_v18 = vadd.f32 0.014752088, %v2365_v10  ;;  %vm2579_vm5 = vweird.f32 %v3798_v60 }
 0x37e   : > { %v3010_v5 = vmul.f32 %v2994_v46, %v2322_v2  ;;  %v2491_v33 = vmul.f32 %v2490_v40, %v6565_v14  ;;  %v2355_v43 = vadd.f32 0.0036580483, %v2354_v0  ;;  %v2562_v35 = vmul.f32 %v2561_v38, %v6606_v8 }
 0x37f   : > { %v2576_v9 = vmul.f32 %v3798_v60, %v2575_v17  ;;  %v2478_v52 = vmul.f32 %v2477_v34, %v6565_v14  ;;  %v2367_v55 = vmul.f32 %v2366_v18, %v6670_v30  ;;  %v2404_v62 = vadd.f32 0.001143296, %v2403_v53 }
 0x380   : > { %3057 = vmatpush.msrb.mxu0 %v3010_v5  ;;  %vm2578_vm6 = vweird.f32 %v6684_v20  ;;  %v6715_v1 = vadd.f32 1.0, %v2491_v33  ;;  %v2393_v4 = vadd.f32 0.00028619796, %v2392_v48  ;;  %v2585_v56 = vor.u32 1.1754944e-38, %v2584_v21 }
 0x381   : > { %v3800_v45 = vpop.eup %3799  ;;  %v2577_v6 = vadd.f32 %v3798_v60, %v2576_v9  ;;  %vm2580_vm7 = vmor %vm2578_vm6, %vm2579_vm5  ;;  %v2368_v41 = vadd.f32 0.112945676, %v2367_v55  ;;  %v2405_v37 = vmul.f32 %v2404_v62, %v6693_v51  ;;  %vm2583_vm8 = vcmp.eq.f32.partialorder %v2582_v11, 8.507059e+37 }
 0x382   : > { %v2454_v42 = vmul.f32 %v3800_v45, %v6697_v13  ;;  %3801 = vrcp.f32 %v6715_v1  ;;  %v2356_v54 = vmul.f32 %v2355_v43, %v6670_v30  ;;  %v2441_v23 = vadd.f32 1.1283791, %v2440_v59 }
 0x383   : > { %v2581_v8 = vsel %vm2580_vm7, %v3798_v60, %v2577_v6  ;;  %v2479_v20 = vadd.f32 0.18741608, %v2478_v52  ;;  %v2464_v19 = vand.u32 2147483648, %v6697_v13  ;;  %v2369_v50 = vmul.f32 %v2368_v41, %v6670_v30 }
 0x384   : > { %v2586_v47 = vsel %vm2583_vm8, %v2585_v56, %v2581_v8  ;;  %v2455_v7 = vsub.f32 1.0, %v2454_v42  ;;  %v2394_v31 = vmul.f32 %v2393_v4, %v6693_v51  ;;  %vm2459_vm9 = vweird.f32 %v3800_v45 }
 0x385   : > { %v2587_v49 = vmul.f32 %v2586_v47, %v2562_v35  ;;  %v2462_v36 = vand.u32 2147483647, %v6697_v13  ;;  %v2406_v39 = vadd.f32 0.014752088, %v2405_v37  ;;  %v2323_v58 = vmul.f32 0.5, %v6589_v32 }
 0x386   : > { %v2456_v24 = vmul.f32 %v3800_v45, %v2455_v7  ;;  %v2357_v22 = vadd.f32 0.05243302, %v2356_v54  ;;  %v2370_v12 = vadd.f32 0.4994258, %v2369_v50  ;;  %vm2458_vm10 = vweird.f32 %v6697_v13 }
 0x387   : > { %v3656_v63 = vclamps-f32 %v2587_v49, 1.0  ;;  %v2480_v60 = vmul.f32 %v2479_v20, %v6565_v14  ;;  %v2407_v2 = vmul.f32 %v2406_v39, %v6693_v51  ;;  %vm2460_vm11 = vmor %vm2458_vm10, %vm2459_vm9  ;;  %v2465_v46 = vor.u32 1.1754944e-38, %v2464_v19 }
 0x388   : > { %v2457_v3 = vadd.f32 %v3800_v45, %v2456_v24  ;;  %v3802_v28 = vpop.eup %3801  ;;  %v2371_v25 = vmul.f32 %v2370_v12, %v6670_v30  ;;  %v2395_v0 = vadd.f32 0.0036580483, %v2394_v31  ;;  %v2442_v38 = vmul.f32 %v2441_v23, %v6291_v44 }
 0x389   : > { %v2995_v10 = vadd.f32 1.0, %v3656_v63  ;;  %vm2463_vm12 = vcmp.eq.f32.partialorder %v2462_v36, 8.507059e+37  ;;  %v2494_v34 = vmul.f32 %v3802_v28, %v6715_v1  ;;  %v2358_v13 = vmul.f32 %v2357_v22, %v6670_v30  ;;  %v3023_v63 = vld [vmem:[%s7048_s5 + $0x8] sm:$0xff] }
 0x38a   : > { %v2461_v32 = vsel %vm2460_vm11, %v3800_v45, %v2457_v3  ;;  %v2372_v14 = vadd.f32 1.0, %v2371_v25  ;;  %v2481_v40 = vadd.f32 1.1283791, %v2480_v60  ;;  %v2408_v11 = vadd.f32 0.112945676, %v2407_v2 }
 0x38b   : > { %v3011_v53 = vmul.f32 %v2995_v10, %v2323_v58  ;;  %v2466_v5 = vsel %vm2463_vm12, %v2465_v46, %v2461_v32  ;;  %v2495_v48 = vsub.f32 1.0, %v2494_v34  ;;  %v2502_v21 = vand.u32 2147483647, %v6715_v1 }
 0x38c   : > { %v2467_v17 = vmul.f32 %v2466_v5, %v2442_v38  ;;  %v2504_v59 = vand.u32 2147483648, %v6715_v1  ;;  %3803 = vrcp.f32 %v2372_v14  ;;  %v2396_v44 = vmul.f32 %v2395_v0, %v6693_v51 }
 0x38d   : > { %3080 = vmatpush.msrb.mxu1 %v3011_v53  ;;  %v2496_v9 = vmul.f32 %v3802_v28, %v2495_v48  ;;  %vm2499_vm13 = vweird.f32 %v3802_v28  ;;  %v2409_v33 = vmul.f32 %v2408_v11, %v6693_v51  ;;  %v2320_v43 = vmul.f32 0.5, %v6257_v61  ;;  %v6744_v61 = vld [vmem:[%s7048_s5] sm:$0xff] }
 0x38e   : > { %v3653_v18 = vclamps-f32 %v2467_v17, 1.0  ;;  %v2359_v35 = vadd.f32 0.18741608, %v2358_v13  ;;  %vm2498_vm14 = vweird.f32 %v6715_v1  ;;  %v2482_v45 = vmul.f32 %v2481_v40, %v6308_v29 }
 0x38f   : > { %v2497_v55 = vadd.f32 %v3802_v28, %v2496_v9  ;;  %v2410_v62 = vadd.f32 0.4994258, %v2409_v33  ;;  %vm2500_vm15 = vmor %vm2498_vm14, %vm2499_vm13  ;;  %vm2503_vm0 = vcmp.eq.f32.partialorder %v2502_v21, 8.507059e+37  ;;  %v2505_v6 = vor.u32 1.1754944e-38, %v2504_v59 }
 0x390   : > { %v2992_v52 = vadd.f32 1.0, %v3653_v18  ;;  %v2397_v4 = vadd.f32 0.05243302, %v2396_v44  ;;  %vm3036_vm1 = vcmask 261120   ;;  %v2360_v1 = vmul.f32 %v2359_v35, %v6670_v30 }
 0x391   : > { %v2501_v42 = vsel %vm2500_vm15, %v3802_v28, %v2497_v55  ;;  %v2411_v41 = vmul.f32 %v2410_v62, %v6693_v51  ;;  %v2321_v49 = vmul.f32 0.5, %v6288_v27  ;;  %v2384_v50 = vand.u32 2147483648, %v2372_v14 }
 0x392   : > { %v3008_v56 = vmul.f32 %v2992_v52, %v2320_v43  ;;  %v3804_v37 = vpop.eup %3803  ;;  %v2506_v8 = vsel %vm2503_vm0, %v2505_v6, %v2501_v42  ;;  %v2398_v23 = vmul.f32 %v2397_v4, %v6693_v51  ;;  %v2361_v19 = vadd.f32 1.1283791, %v2360_v1 }
 0x393   : > { %v2507_v29 = vmul.f32 %v2506_v8, %v2482_v45  ;;  %v2374_v54 = vmul.f32 %v3804_v37, %v2372_v14  ;;  %v2412_v47 = vadd.f32 1.0, %v2411_v41  ;;  %vm2379_vm2 = vweird.f32 %v3804_v37 }
 0x394   : > { %3104 = vmatpush.msrb.mxu2 %v3008_v56  ;;  %v2382_v30 = vand.u32 2147483647, %v2372_v14  ;;  %v2399_v36 = vadd.f32 0.18741608, %v2398_v23  ;;  %vm2378_vm3 = vweird.f32 %v2372_v14  ;;  %v2385_v22 = vor.u32 1.1754944e-38, %v2384_v50  ;;  %v6796_v50 = vpop.permute.xlu2 %3033 }
 0x395   : > { %3671 = vmatmul.msk.f32.vlgmr.msrb.gmra.mxu2 %vm3036_vm1, %v6744_v61  ;;  %v3654_v7 = vclamps-f32 %v2507_v29, 1.0  ;;  %v2375_v20 = vsub.f32 1.0, %v2374_v54  ;;  %3805 = vrcp.f32 %v2412_v47  ;;  %vm2380_vm4 = vmor %vm2378_vm3, %vm2379_vm2  ;;  %v2362_v27 = vmul.f32 %v2361_v19, %v6569_v26 }
 0x396   : > { %vm2383_vm5 = vcmp.eq.f32.partialorder %v2382_v30, 8.507059e+37  ;;  %v2400_v2 = vmul.f32 %v2399_v36, %v6693_v51  ;;  %v2424_v0 = vand.u32 2147483648, %v2412_v47  ;;  %v2422_v34 = vand.u32 2147483647, %v2412_v47 }
 0x397   : > { %v2993_v31 = vadd.f32 1.0, %v3654_v7  ;;  %v2376_v24 = vmul.f32 %v3804_v37, %v2375_v20  ;;  %v2318_v26 = vmul.f32 0.5, %v6431_v16  ;;  %vm2418_vm7 = vweird.f32 %v2412_v47 }
 0x398   : > { %v2401_v38 = vadd.f32 1.1283791, %v2400_v2  ;;  %v2425_v13 = vor.u32 1.1754944e-38, %v2424_v0  ;;  %vm2423_vm9 = vcmp.eq.f32.partialorder %v2422_v34, 8.507059e+37  ;;  %v2319_v16 = vmul.f32 0.5, %v6559_v15 }
 0x399   : > { %v3009_v39 = vmul.f32 %v2993_v31, %v2321_v49  ;;  %v2377_v58 = vadd.f32 %v3804_v37, %v2376_v24 }
 0x39a   : > { %v2402_v14 = vmul.f32 %v2401_v38, %v6658_v57  ;;  %v3029_v57 = vpop.permute.xlu1 %3028 }
 0x39b   : > { %v3806_v12 = vpop.eup %3805  ;;  %3127 = vmatpush.msrb.mxu3 %v3009_v39  ;;  %v2381_v3 = vsel %vm2380_vm4, %v3804_v37, %v2377_v58 }
 0x39c   : > { %v2386_v60 = vsel %vm2383_vm5, %v2385_v22, %v2381_v3  ;;  %v2414_v28 = vmul.f32 %v3806_v12, %v2412_v47  ;;  %3673 = vmatmul.msk.f32.vlgmr.msrb.gmra.mxu3 %vm3036_vm1, %v6744_v61  ;;  %vm2419_vm6 = vweird.f32 %v3806_v12 }
 0x39d   : > { %3672 = vmatmul.msk.f32.gmra.mxu2 %vm3036_vm1, %v3023_v63  ;;  %v2387_v10 = vmul.f32 %v2386_v60, %v2362_v27  ;;  %vm2420_vm8 = vmor %vm2418_vm7, %vm2419_vm6 }
 0x39e   : > { %v2415_v46 = vsub.f32 1.0, %v2414_v28 }
 0x39f   : > { %v3651_v25 = vclamps-f32 %v2387_v10, 1.0 }
 0x3a0   : > { %v2416_v32 = vmul.f32 %v3806_v12, %v2415_v46 }
 0x3a1   : > { %v2990_v53 = vadd.f32 1.0, %v3651_v25 }
 0x3a2   : > { %v2417_v5 = vadd.f32 %v3806_v12, %v2416_v32 }
 0x3a3   : > { %v3006_v51 = vmul.f32 %v2990_v53, %v2318_v26 }
 0x3a4   : > { %v2421_v17 = vsel %vm2420_vm8, %v3806_v12, %v2417_v5  ;;  %3674 = vmatmul.msk.f32.gmra.mxu3 %vm3036_vm1, %v3023_v63 }
 0x3a5   : > { %3058 = vmatpush.msrb.mxu0 %v3006_v51  ;;  %v2426_v40 = vsel %vm2423_vm9, %v2425_v13, %v2421_v17 }
 0x3a6   : > { %v2427_v48 = vmul.f32 %v2426_v40, %v2402_v14  ;;  %3667 = vmatmul.msk.f32.vlgmr.msrb.gmra.mxu0 %vm3036_vm1, %v6744_v61 }
 0x3a8   : > { %v3652_v11 = vclamps-f32 %v2427_v48, 1.0 }
 0x3aa   : > { %v2991_v21 = vadd.f32 1.0, %v3652_v11 }
 0x3ac   : > { %v3007_v59 = vmul.f32 %v2991_v21, %v2319_v16 }
 0x3ae   : > { %3081 = vmatpush.msrb.mxu1 %v3007_v59  ;;  %3668 = vmatmul.msk.f32.gmra.mxu0 %vm3036_vm1, %v3023_v63 }
 0x3af   : > { %3669 = vmatmul.msk.f32.vlgmr.msrb.gmra.mxu1 %vm3036_vm1, %v6744_v61 }
 0x3b7   : > { %3670 = vmatmul.msk.f32.gmra.mxu1 %vm3036_vm1, %v3023_v63 }
 0x418   : > { %v3106_v44 = vpop.f32.mrf.mxu2 }
 0x419   : > { %v6769_v18 = vadd.f32 %v3106_v44, %v3029_v57 }
 0x41b   : > { %v6772_v9 = vmul.f32 0.70710677, %v6769_v18 }
 0x41d   : > { %v3231_v15 = vmul.f32 %v6772_v9, %v6772_v9 }
 0x41f   : > { %v3232_v33 = vmin.f32 %v3231_v15, 16.0  ;;  %v3129_v43 = vpop.f32.mrf.mxu3 }
 0x420   : > { %v6776_v55 = vadd.f32 %v3129_v43, %v3029_v57 }
 0x421   : > { %v3233_v35 = vmul.f32 2.1237322e-06, %v3232_v33  ;;  %v3244_v52 = vmul.f32 3.8918573e-05, %v3232_v33 }
 0x422   : > { %v6779_v4 = vmul.f32 0.70710677, %v6776_v55 }
 0x423   : > { %v3234_v62 = vadd.f32 0.00028619796, %v3233_v35  ;;  %v3245_v45 = vadd.f32 0.001143296, %v3244_v52  ;;  %v3060_v6 = vpop.f32.mrf.mxu0 }
 0x424   : > { %v6781_v56 = vadd.f32 %v3060_v6, %v3029_v57  ;;  %v3271_v61 = vmul.f32 %v6779_v4, %v6779_v4 }
 0x425   : > { %v3235_v42 = vmul.f32 %v3234_v62, %v3232_v33  ;;  %v3246_v41 = vmul.f32 %v3245_v45, %v3232_v33 }
 0x426   : > { %v6786_v37 = vmul.f32 0.70710677, %v6781_v56  ;;  %v6788_v29 = vmin.f32 %v3271_v61, 16.0 }
 0x427   : > { %v3236_v8 = vadd.f32 0.0036580483, %v3235_v42  ;;  %v3247_v1 = vadd.f32 0.014752088, %v3246_v41 }
 0x428   : > { %v3151_v54 = vmul.f32 %v6786_v37, %v6786_v37  ;;  %v3273_v7 = vmul.f32 2.1237322e-06, %v6788_v29  ;;  %v3284_v20 = vmul.f32 3.8918573e-05, %v6788_v29 }
 0x429   : > { %v3237_v47 = vmul.f32 %v3236_v8, %v3232_v33  ;;  %v3248_v23 = vmul.f32 %v3247_v1, %v3232_v33 }
 0x42a   : > { %v6794_v49 = vmin.f32 %v3151_v54, 16.0  ;;  %v3274_v24 = vadd.f32 0.00028619796, %v3273_v7  ;;  %v3285_v30 = vadd.f32 0.001143296, %v3284_v20  ;;  %v6838_v7 = vmul.f32 0.5, %v6769_v18 }
 0x42b   : > { %v3238_v19 = vadd.f32 0.05243302, %v3237_v47  ;;  %v3249_v31 = vadd.f32 0.112945676, %v3248_v23  ;;  %v3063_v36 = vpop.f32.mrf.mxu0  ;;  %v6841_v20 = vmul.f32 0.5, %v6776_v55 }
 0x42c   : > { %v3153_v39 = vmul.f32 2.1237322e-06, %v6794_v49  ;;  %v3164_v58 = vmul.f32 3.8918573e-05, %v6794_v49  ;;  %v3083_v63 = vpop.f32.mrf.mxu1  ;;  %v6801_v12 = vadd.f32 %v3063_v36, %v6796_v50  ;;  %v3275_v60 = vmul.f32 %v3274_v24, %v6788_v29 }
 0x42d   : > { %v3239_v22 = vmul.f32 %v3238_v19, %v3232_v33  ;;  %v6803_v27 = vadd.f32 %v3083_v63, %v3029_v57  ;;  %v3250_v3 = vmul.f32 %v3249_v31, %v3232_v33  ;;  %v3286_v2 = vmul.f32 %v3285_v30, %v6788_v29 }
 0x42e   : > { %v3154_v28 = vadd.f32 0.00028619796, %v3153_v39  ;;  %v3165_v10 = vadd.f32 0.001143296, %v3164_v58  ;;  %v3276_v34 = vadd.f32 0.0036580483, %v3275_v60 }
 0x42f   : > { %v6808_v46 = vmul.f32 0.70710677, %v6803_v27  ;;  %v3251_v25 = vadd.f32 0.4994258, %v3250_v3  ;;  %v3240_v32 = vadd.f32 0.18741608, %v3239_v22 }
 0x430   : > { %v3155_v0 = vmul.f32 %v3154_v28, %v6794_v49  ;;  %v3166_v38 = vmul.f32 %v3165_v10, %v6794_v49  ;;  %v3287_v5 = vadd.f32 0.014752088, %v3286_v2  ;;  %v6815_v51 = vmul.f32 0.70710677, %v6801_v12 }
 0x431   : > { %v3191_v26 = vmul.f32 %v6808_v46, %v6808_v46  ;;  %v3252_v53 = vmul.f32 %v3251_v25, %v3232_v33  ;;  %v3277_v17 = vmul.f32 %v3276_v34, %v6788_v29  ;;  %v3241_v59 = vmul.f32 %v3240_v32, %v3232_v33 }
 0x432   : > { %v3156_v13 = vadd.f32 0.0036580483, %v3155_v0  ;;  %v3167_v14 = vadd.f32 0.014752088, %v3166_v38  ;;  %v3311_v11 = vmul.f32 %v6815_v51, %v6815_v51  ;;  %v3288_v43 = vmul.f32 %v3287_v5, %v6788_v29 }
 0x433   : > { %v6818_v40 = vmin.f32 %v3191_v26, 16.0  ;;  %v6820_v48 = vadd.f32 1.0, %v3252_v53  ;;  %v3278_v57 = vadd.f32 0.05243302, %v3277_v17  ;;  %v3242_v54 = vadd.f32 1.1283791, %v3241_v59 }
 0x434   : > { %v3157_v16 = vmul.f32 %v3156_v13, %v6794_v49  ;;  %v3168_v21 = vmul.f32 %v3167_v14, %v6794_v49  ;;  %v6831_v42 = vmin.f32 %v3311_v11, 16.0  ;;  %v3289_v47 = vadd.f32 0.112945676, %v3288_v43 }
 0x435   : > { %v3193_v44 = vmul.f32 2.1237322e-06, %v6818_v40  ;;  %v3204_v15 = vmul.f32 3.8918573e-05, %v6818_v40  ;;  %3807 = vrcp.f32 %v6820_v48  ;;  %v3279_v62 = vmul.f32 %v3278_v57, %v6788_v29 }
 0x436   : > { %v3158_v35 = vadd.f32 0.05243302, %v3157_v16  ;;  %v3169_v52 = vadd.f32 0.112945676, %v3168_v21  ;;  %v3313_v19 = vmul.f32 2.1237322e-06, %v6831_v42  ;;  %v3290_v39 = vmul.f32 %v3289_v47, %v6788_v29 }
 0x437   : > { %v3194_v45 = vadd.f32 0.00028619796, %v3193_v44  ;;  %v3205_v6 = vadd.f32 0.001143296, %v3204_v15  ;;  %v3280_v61 = vadd.f32 0.18741608, %v3279_v62  ;;  %v3243_v60 = vmul.f32 %v3242_v54, %v6772_v9 }
 0x438   : > { %v3159_v41 = vmul.f32 %v3158_v35, %v6794_v49  ;;  %v3170_v33 = vmul.f32 %v3169_v52, %v6794_v49  ;;  %v6846_v58 = vmul.f32 0.5, %v6781_v56  ;;  %v3291_v2 = vadd.f32 0.4994258, %v3290_v39 }
 0x439   : > { %v3195_v8 = vmul.f32 %v3194_v45, %v6818_v40  ;;  %v3206_v1 = vmul.f32 %v3205_v6, %v6818_v40  ;;  %v3281_v18 = vmul.f32 %v3280_v61, %v6788_v29  ;;  %v3314_v25 = vadd.f32 0.00028619796, %v3313_v19 }
 0x43a   : > { %v3171_v23 = vadd.f32 0.4994258, %v3170_v33  ;;  %v3160_v24 = vadd.f32 0.18741608, %v3159_v41  ;;  %v3324_v56 = vmul.f32 3.8918573e-05, %v6831_v42  ;;  %v3292_v34 = vmul.f32 %v3291_v2, %v6788_v29 }
 0x43b   : > { %v3808_v31 = vpop.eup %3807  ;;  %v3196_v30 = vadd.f32 0.0036580483, %v3195_v8  ;;  %v3207_v36 = vadd.f32 0.014752088, %v3206_v1  ;;  %v3263_v26 = vand.u32 2147483647, %v6820_v48  ;;  %vm3259_vm11 = vweird.f32 %v6820_v48  ;;  %v3086_v8 = vpop.f32.mrf.mxu1 }
 0x43c   : > { %v3172_v63 = vmul.f32 %v3171_v23, %v6794_v49  ;;  %v3255_v22 = vmul.f32 %v3808_v31, %v6820_v48  ;;  %v3161_v0 = vmul.f32 %v3160_v24, %v6794_v49  ;;  %v3265_v53 = vand.u32 2147483648, %v6820_v48 }
 0x43d   : > { %v3197_v55 = vmul.f32 %v3196_v30, %v6818_v40  ;;  %v3208_v3 = vmul.f32 %v3207_v36, %v6818_v40  ;;  %v3282_v9 = vadd.f32 1.1283791, %v3281_v18  ;;  %vm3260_vm10 = vweird.f32 %v3808_v31 }
 0x43e   : > { %v6854_v28 = vadd.f32 1.0, %v3172_v63  ;;  %v3256_v10 = vsub.f32 1.0, %v3255_v22  ;;  %v6865_v49 = vadd.f32 1.0, %v3292_v34  ;;  %v3315_v17 = vmul.f32 %v3314_v25, %v6831_v42  ;;  %vm3261_vm12 = vmor %vm3259_vm11, %vm3260_vm10 }
 0x43f   : > { %v3198_v38 = vadd.f32 0.05243302, %v3197_v55  ;;  %v3209_v32 = vadd.f32 0.112945676, %v3208_v3  ;;  %v3325_v29 = vadd.f32 0.001143296, %v3324_v56  ;;  %v6869_v44 = vmul.f32 %v3282_v9, %v6779_v4  ;;  %v3109_v55 = vpop.f32.mrf.mxu2 }
 0x440   : > { %3809 = vrcp.f32 %v6854_v28  ;;  %v3257_v14 = vmul.f32 %v3808_v31, %v3256_v10  ;;  %v3162_v11 = vadd.f32 1.1283791, %v3161_v0  ;;  %vm3264_vm13 = vcmp.eq.f32.partialorder %v3263_v26, 8.507059e+37 }
 0x441   : > { %v3199_v5 = vmul.f32 %v3198_v38, %v6818_v40  ;;  %v3210_v13 = vmul.f32 %v3209_v32, %v6818_v40  ;;  %v3266_v57 = vor.u32 1.1754944e-38, %v3265_v53  ;;  %3811 = vrcp.f32 %v6865_v49 }
 0x442   : > { %v3258_v59 = vadd.f32 %v3808_v31, %v3257_v14  ;;  %v3183_v15 = vand.u32 2147483647, %v6854_v28  ;;  %v3185_v62 = vand.u32 2147483648, %v6854_v28  ;;  %v3316_v6 = vadd.f32 0.0036580483, %v3315_v17 }
 0x443   : > { %v3200_v16 = vadd.f32 0.18741608, %v3199_v5  ;;  %v3211_v21 = vadd.f32 0.4994258, %v3210_v13  ;;  %v3326_v41 = vmul.f32 %v3325_v29, %v6831_v42  ;;  %v3163_v4 = vmul.f32 %v3162_v11, %v6786_v37 }
 0x444   : > { %v3262_v35 = vsel %vm3261_vm12, %v3808_v31, %v3258_v59  ;;  %vm3179_vm14 = vweird.f32 %v6854_v28  ;;  %v3305_v54 = vand.u32 2147483648, %v6865_v49  ;;  %vm6885_vm15 = vcmp.eq.f32.partialorder %v3183_v15, 8.507059e+37 }
 0x445   : > { %v3201_v48 = vmul.f32 %v3200_v16, %v6818_v40  ;;  %v3212_v43 = vmul.f32 %v3211_v21, %v6818_v40  ;;  %v3267_v45 = vsel %vm3264_vm13, %v3266_v57, %v3262_v35  ;;  %v3303_v40 = vand.u32 2147483647, %v6865_v49 }
 0x446   : > { %v3810_v52 = vpop.eup %3809  ;;  %v3268_v1 = vmul.f32 %v3267_v45, %v3243_v60  ;;  %v3327_v47 = vadd.f32 0.014752088, %v3326_v41  ;;  %v3186_v24 = vor.u32 1.1754944e-38, %v3185_v62  ;;  %v3317_v36 = vmul.f32 %v3316_v6, %v6831_v42 }
 0x447   : > { %v3175_v33 = vmul.f32 %v3810_v52, %v6854_v28  ;;  %v6880_v61 = vadd.f32 1.0, %v3212_v43  ;;  %v3202_v37 = vadd.f32 1.1283791, %v3201_v48  ;;  %v3812_v31 = vpop.eup %3811  ;;  %v6892_v39 = vadd.f32 %v3086_v8, %v6796_v50 }
 0x448   : > { %v3677_v30 = vclamps-f32 %v3268_v1, 1.0  ;;  %vm3180_vm0 = vweird.f32 %v3810_v52  ;;  %v3295_v22 = vmul.f32 %v3812_v31, %v6865_v49  ;;  %v3328_v18 = vmul.f32 %v3327_v47, %v6831_v42 }
 0x449   : > { %v3176_v23 = vsub.f32 1.0, %v3175_v33  ;;  %3813 = vrcp.f32 %v6880_v61  ;;  %vm3299_vm1 = vweird.f32 %v6865_v49  ;;  %vm6899_vm2 = vcmp.eq.f32.partialorder %v3303_v40, 8.507059e+37  ;;  %vm3181_vm3 = vmor %vm3179_vm14, %vm3180_vm0  ;;  %v3132_v33 = vpop.f32.mrf.mxu3 }
 0x44a   : > { %v3473_v3 = vadd.f32 1.0, %v3677_v30  ;;  %v3306_v2 = vor.u32 1.1754944e-38, %v3305_v54  ;;  %v3203_v25 = vmul.f32 %v3202_v37, %v6808_v46  ;;  %v3296_v56 = vsub.f32 1.0, %v3295_v22 }
 0x44b   : > { %v3177_v63 = vmul.f32 %v3810_v52, %v3176_v23  ;;  %v3329_v0 = vadd.f32 0.112945676, %v3328_v18  ;;  %v3318_v32 = vadd.f32 0.05243302, %v3317_v36  ;;  %v6908_v34 = vmul.f32 0.70710677, %v6892_v39 }
 0x44c   : > { %v3481_v38 = vmul.f32 %v3473_v3, %v6838_v7  ;;  %v6911_v26 = vadd.f32 %v3109_v55, %v6796_v50  ;;  %v3297_v5 = vmul.f32 %v3812_v31, %v3296_v56  ;;  %vm3300_vm4 = vweird.f32 %v3812_v31 }
 0x44d   : > { %v3178_v10 = vadd.f32 %v3810_v52, %v3177_v63  ;;  %v3330_v46 = vmul.f32 %v3329_v0, %v6831_v42  ;;  %vm3219_vm5 = vweird.f32 %v6880_v61  ;;  %v3223_v7 = vand.u32 2147483647, %v6880_v61  ;;  %vm3301_vm6 = vmor %vm3299_vm1, %vm3300_vm4 }
 0x44e   : > { %3489 = vst [vmem:[%s6919_s22 + $0x10] sm:$0xff] %v3481_v38  ;;  %v3298_v17 = vadd.f32 %v3812_v31, %v3297_v5  ;;  %v3351_v11 = vmul.f32 %v6908_v34, %v6908_v34  ;;  %v3225_v21 = vand.u32 2147483648, %v6880_v61  ;;  %v3319_v59 = vmul.f32 %v3318_v32, %v6831_v42 }
 0x44f   : > { %v3814_v53 = vpop.eup %3813  ;;  %v3182_v9 = vsel %vm3181_vm3, %v3810_v52, %v3178_v10  ;;  %v3331_v29 = vadd.f32 0.4994258, %v3330_v46  ;;  %v6929_v57 = vmul.f32 0.70710677, %v6911_v26  ;;  %vm3224_vm9 = vcmp.eq.f32.partialorder %v3223_v7, 8.507059e+37 }
 0x450   : > { %v3187_v13 = vsel %vm6885_vm15, %v3186_v24, %v3182_v9  ;;  %v3215_v28 = vmul.f32 %v3814_v53, %v6880_v61  ;;  %v3302_v48 = vsel %vm3301_vm6, %v3812_v31, %v3298_v17  ;;  %v6932_v35 = vmin.f32 %v3351_v11, 16.0 }
 0x451   : > { %v3188_v14 = vmul.f32 %v3187_v13, %v3163_v4  ;;  %v3332_v43 = vmul.f32 %v3331_v29, %v6831_v42  ;;  %vm3220_vm7 = vweird.f32 %v3814_v53  ;;  %v3307_v62 = vsel %vm6899_vm2, %v3306_v2, %v3302_v48 }
 0x452   : > { %v3216_v16 = vsub.f32 1.0, %v3215_v28  ;;  %v3391_v49 = vmul.f32 %v6929_v57, %v6929_v57  ;;  %v3308_v6 = vmul.f32 %v3307_v62, %v6869_v44  ;;  %v3353_v4 = vmul.f32 2.1237322e-06, %v6932_v35  ;;  %vm3221_vm8 = vmor %vm3219_vm5, %vm3220_vm7 }
 0x453   : > { %v3675_v15 = vclamps-f32 %v3188_v14, 1.0  ;;  %v6939_v41 = vadd.f32 1.0, %v3332_v43  ;;  %v3320_v1 = vadd.f32 0.18741608, %v3319_v59  ;;  %v3364_v40 = vmul.f32 3.8918573e-05, %v6932_v35 }
 0x454   : > { %v3217_v52 = vmul.f32 %v3814_v53, %v3216_v16  ;;  %v6943_v54 = vmin.f32 %v3391_v49, 16.0  ;;  %v3226_v23 = vor.u32 1.1754944e-38, %v3225_v21  ;;  %v3678_v19 = vclamps-f32 %v3308_v6, 1.0 }
 0x455   : > { %v3471_v45 = vadd.f32 1.0, %v3675_v15  ;;  %3815 = vrcp.f32 %v6939_v41  ;;  %v3354_v37 = vadd.f32 0.00028619796, %v3353_v4  ;;  %v6950_v31 = vadd.f32 %v3132_v33, %v6796_v50 }
 0x456   : > { %v3218_v8 = vadd.f32 %v3814_v53, %v3217_v52  ;;  %v3474_v30 = vadd.f32 1.0, %v3678_v19  ;;  %v3365_v36 = vadd.f32 0.001143296, %v3364_v40  ;;  %v3321_v61 = vmul.f32 %v3320_v1, %v6831_v42 }
 0x457   : > { %v3479_v47 = vmul.f32 %v3471_v45, %v6846_v58  ;;  %v3393_v58 = vmul.f32 2.1237322e-06, %v6943_v54  ;;  %v3355_v22 = vmul.f32 %v3354_v37, %v6932_v35  ;;  %v3404_v50 = vmul.f32 3.8918573e-05, %v6943_v54 }
 0x458   : > { %v3222_v44 = vsel %vm3221_vm8, %v3814_v53, %v3218_v8  ;;  %v3482_v18 = vmul.f32 %v3474_v30, %v6841_v20  ;;  %v3366_v55 = vmul.f32 %v3365_v36, %v6932_v35  ;;  %v6960_v10 = vmul.f32 0.70710677, %v6950_v31 }
 0x459   : > { %3487 = vst [vmem:[%s6919_s22] sm:$0xff] %v3479_v47  ;;  %v3227_v24 = vsel %vm3224_vm9, %v3226_v23, %v3222_v44  ;;  %v3394_v3 = vadd.f32 0.00028619796, %v3393_v58  ;;  %v3356_v2 = vadd.f32 0.0036580483, %v3355_v22  ;;  %v3136_v42 = vmul.f32 0.5, %v6803_v27 }
 0x45a   : > { %v3228_v63 = vmul.f32 %v3227_v24, %v3203_v25  ;;  %3490 = vst [vmem:[%s6919_s22 + $0x18] sm:$0xff] %v3482_v18  ;;  %v3367_v0 = vadd.f32 0.014752088, %v3366_v55  ;;  %v3405_v25 = vadd.f32 0.001143296, %v3404_v50  ;;  %v3431_v46 = vmul.f32 %v6960_v10, %v6960_v10 }
 0x45b   : > { %v3816_v56 = vpop.eup %3815  ;;  %v3395_v32 = vmul.f32 %v3394_v3, %v6943_v54  ;;  %v3322_v53 = vadd.f32 1.1283791, %v3321_v61  ;;  %v3345_v7 = vand.u32 2147483648, %v6939_v41  ;;  %v3357_v14 = vmul.f32 %v3356_v2, %v6932_v35 }
 0x45c   : > { %v3676_v60 = vclamps-f32 %v3228_v63, 1.0  ;;  %v3335_v20 = vmul.f32 %v3816_v56, %v6939_v41  ;;  %v3368_v9 = vmul.f32 %v3367_v0, %v6932_v35  ;;  %v3406_v5 = vmul.f32 %v3405_v25, %v6943_v54 }
 0x45d   : > { %v6972_v29 = vmin.f32 %v3431_v46, 16.0  ;;  %vm3340_vm10 = vweird.f32 %v3816_v56  ;;  %v3343_v16 = vand.u32 2147483647, %v6939_v41  ;;  %v3396_v21 = vadd.f32 0.0036580483, %v3395_v32 }
 0x45e   : > { %v3472_v38 = vadd.f32 1.0, %v3676_v60  ;;  %v3336_v28 = vsub.f32 1.0, %v3335_v20  ;;  %v3369_v27 = vadd.f32 0.112945676, %v3368_v9  ;;  %v3407_v17 = vadd.f32 0.014752088, %v3406_v5 }
 0x45f   : > { %vm3339_vm11 = vweird.f32 %v6939_v41  ;;  %v3433_v48 = vmul.f32 2.1237322e-06, %v6972_v29  ;;  %v3346_v52 = vor.u32 1.1754944e-38, %v3345_v7  ;;  %v3358_v62 = vadd.f32 0.05243302, %v3357_v14 }
 0x460   : > { %v3480_v13 = vmul.f32 %v3472_v38, %v3136_v42  ;;  %v3337_v11 = vmul.f32 %v3816_v56, %v3336_v28  ;;  %v3370_v59 = vmul.f32 %v3369_v27, %v6932_v35  ;;  %v3408_v15 = vmul.f32 %v3407_v17, %v6943_v54  ;;  %vm3341_vm12 = vmor %vm3339_vm11, %vm3340_vm10 }
 0x461   : > { %v3444_v49 = vmul.f32 3.8918573e-05, %v6972_v29  ;;  %v3323_v45 = vmul.f32 %v3322_v53, %v6815_v51  ;;  %v3434_v33 = vadd.f32 0.00028619796, %v3433_v48  ;;  %vm3344_vm13 = vcmp.eq.f32.partialorder %v3343_v16, 8.507059e+37 }
 0x462   : > { %3488 = vst [vmem:[%s6919_s22 + $0x8] sm:$0xff] %v3480_v13  ;;  %v3338_v43 = vadd.f32 %v3816_v56, %v3337_v11  ;;  %v3371_v6 = vadd.f32 0.4994258, %v3370_v59  ;;  %v3409_v4 = vadd.f32 0.112945676, %v3408_v15  ;;  %v3397_v41 = vmul.f32 %v3396_v21, %v6943_v54 }
 0x463   : > { %v3445_v1 = vadd.f32 0.001143296, %v3444_v49  ;;  %v3435_v44 = vmul.f32 %v3434_v33, %v6972_v29  ;;  %v3359_v51 = vmul.f32 %v3358_v62, %v6932_v35  ;;  %v3139_v61 = vmul.f32 0.5, %v6801_v12 }
 0x464   : > { %v3342_v8 = vsel %vm3341_vm12, %v3816_v56, %v3338_v43  ;;  %v3372_v47 = vmul.f32 %v3371_v6, %v6932_v35  ;;  %v3410_v23 = vmul.f32 %v3409_v4, %v6943_v54  ;;  %v3398_v58 = vadd.f32 0.05243302, %v3397_v41 }
 0x465   : > { %v3347_v40 = vsel %vm3344_vm13, %v3346_v52, %v3342_v8  ;;  %v3446_v37 = vmul.f32 %v3445_v1, %v6972_v29  ;;  %v3436_v55 = vadd.f32 0.0036580483, %v3435_v44  ;;  %v3360_v3 = vadd.f32 0.18741608, %v3359_v51 }
 0x466   : > { %v3348_v19 = vmul.f32 %v3347_v40, %v3323_v45  ;;  %v3373_v24 = vadd.f32 1.0, %v3372_v47  ;;  %v3411_v30 = vadd.f32 0.4994258, %v3410_v23  ;;  %v3399_v2 = vmul.f32 %v3398_v58, %v6943_v54 }
 0x467   : > { %v3447_v63 = vadd.f32 0.014752088, %v3446_v37  ;;  %v3437_v25 = vmul.f32 %v3436_v55, %v6972_v29  ;;  %v3361_v38 = vmul.f32 %v3360_v3, %v6932_v35  ;;  %v3140_v1 = vmul.f32 0.5, %v6892_v39 }
 0x468   : > { %v3679_v36 = vclamps-f32 %v3348_v19, 1.0  ;;  %3817 = vrcp.f32 %v3373_v24  ;;  %v3412_v18 = vmul.f32 %v3411_v30, %v6943_v54  ;;  %v3400_v32 = vadd.f32 0.18741608, %v3399_v2 }
 0x469   : > { %v3448_v50 = vmul.f32 %v3447_v63, %v6972_v29  ;;  %v3438_v5 = vadd.f32 0.05243302, %v3437_v25  ;;  %v3362_v46 = vadd.f32 1.1283791, %v3361_v38  ;;  %v3385_v13 = vand.u32 2147483648, %v3373_v24 }
 0x46a   : > { %v3475_v22 = vadd.f32 1.0, %v3679_v36  ;;  %v3413_v56 = vadd.f32 1.0, %v3412_v18  ;;  %v3383_v27 = vand.u32 2147483647, %v3373_v24  ;;  %v3401_v17 = vmul.f32 %v3400_v32, %v6943_v54 }
 0x46b   : > { %v3449_v0 = vadd.f32 0.112945676, %v3448_v50  ;;  %vm3379_vm15 = vweird.f32 %v3373_v24  ;;  %v3439_v21 = vmul.f32 %v3438_v5, %v6972_v29  ;;  %v3363_v59 = vmul.f32 %v3362_v46, %v6908_v34 }
 0x46c   : > { %v3483_v60 = vmul.f32 %v3475_v22, %v3139_v61  ;;  %3819 = vrcp.f32 %v3413_v56  ;;  %v3386_v15 = vor.u32 1.1754944e-38, %v3385_v13  ;;  %vm3384_vm1 = vcmp.eq.f32.partialorder %v3383_v27, 8.507059e+37 }
 0x46d   : > { %v3450_v12 = vmul.f32 %v3449_v0, %v6972_v29  ;;  %v3402_v52 = vadd.f32 1.1283791, %v3401_v17  ;;  %v3425_v62 = vand.u32 2147483648, %v3413_v56  ;;  %v3423_v54 = vand.u32 2147483647, %v3413_v56 }
 0x46e   : > { %3491 = vst [vmem:[%s6919_s22 + $0x20] sm:$0xff] %v3483_v60  ;;  %v3818_v42 = vpop.eup %3817  ;;  %v3440_v4 = vadd.f32 0.18741608, %v3439_v21  ;;  %vm3419_vm3 = vweird.f32 %v3413_v56 }
 0x46f   : > { %v3375_v20 = vmul.f32 %v3818_v42, %v3373_v24  ;;  %v3451_v53 = vadd.f32 0.4994258, %v3450_v12  ;;  %vm3380_vm14 = vweird.f32 %v3818_v42  ;;  %v3426_v34 = vor.u32 1.1754944e-38, %v3425_v62 }
 0x470   : > { %vm3381_vm0 = vmor %vm3379_vm15, %vm3380_vm14  ;;  %v3403_v40 = vmul.f32 %v3402_v52, %v6929_v57  ;;  %vm3424_vm5 = vcmp.eq.f32.partialorder %v3423_v54, 8.507059e+37  ;;  %v3441_v44 = vmul.f32 %v3440_v4, %v6972_v29  ;;  %v3141_v57 = vmul.f32 0.5, %v6911_v26 }
 0x471   : > { %v3376_v9 = vsub.f32 1.0, %v3375_v20  ;;  %v3452_v28 = vmul.f32 %v3451_v53, %v6972_v29 }
 0x472   : > { %v3820_v7 = vpop.eup %3819  ;;  %v3442_v63 = vadd.f32 1.1283791, %v3441_v44 }
 0x473   : > { %v3377_v14 = vmul.f32 %v3818_v42, %v3376_v9  ;;  %v3415_v11 = vmul.f32 %v3820_v7, %v3413_v56  ;;  %v3453_v16 = vadd.f32 1.0, %v3452_v28  ;;  %vm3420_vm2 = vweird.f32 %v3820_v7 }
 0x474   : > { %vm3421_vm4 = vmor %vm3419_vm3, %vm3420_vm2  ;;  %v3443_v3 = vmul.f32 %v3442_v63, %v6960_v10  ;;  %v3142_v56 = vmul.f32 0.5, %v6950_v31 }
 0x475   : > { %v3378_v35 = vadd.f32 %v3818_v42, %v3377_v14  ;;  %v3416_v48 = vsub.f32 1.0, %v3415_v11  ;;  %3821 = vrcp.f32 %v3453_v16  ;;  %v3465_v58 = vand.u32 2147483648, %v3453_v16 }
 0x476   : > { %v3463_v39 = vand.u32 2147483647, %v3453_v16  ;;  %vm3459_vm7 = vweird.f32 %v3453_v16 }
 0x477   : > { %v3382_v43 = vsel %vm3381_vm0, %v3818_v42, %v3378_v35  ;;  %v3417_v45 = vmul.f32 %v3820_v7, %v3416_v48  ;;  %v3466_v55 = vor.u32 1.1754944e-38, %v3465_v58 }
 0x478   : > { %v3387_v49 = vsel %vm3384_vm1, %v3386_v15, %v3382_v43  ;;  %vm3464_vm9 = vcmp.eq.f32.partialorder %v3463_v39, 8.507059e+37 }
 0x479   : > { %v3388_v6 = vmul.f32 %v3387_v49, %v3363_v59  ;;  %v3418_v33 = vadd.f32 %v3820_v7, %v3417_v45 }
 0x47b   : > { %v3680_v8 = vclamps-f32 %v3388_v6, 1.0  ;;  %v3822_v41 = vpop.eup %3821  ;;  %v3422_v47 = vsel %vm3421_vm4, %v3820_v7, %v3418_v33 }
 0x47c   : > { %v3427_v19 = vsel %vm3424_vm5, %v3426_v34, %v3422_v47  ;;  %v3455_v37 = vmul.f32 %v3822_v41, %v3453_v16  ;;  %vm3460_vm6 = vweird.f32 %v3822_v41 }
 0x47d   : > { %v3476_v23 = vadd.f32 1.0, %v3680_v8  ;;  %v3428_v51 = vmul.f32 %v3427_v19, %v3403_v40  ;;  %vm3461_vm8 = vmor %vm3459_vm7, %vm3460_vm6 }
 0x47e   : > { %v3456_v30 = vsub.f32 1.0, %v3455_v37 }
 0x47f   : > { %v3484_v24 = vmul.f32 %v3476_v23, %v3140_v1  ;;  %v3681_v36 = vclamps-f32 %v3428_v51, 1.0 }
 0x480   : > { %v3457_v61 = vmul.f32 %v3822_v41, %v3456_v30 }
 0x481   : > { %3492 = vst [vmem:[%s6919_s22 + $0x28] sm:$0xff] %v3484_v24  ;;  %v3477_v22 = vadd.f32 1.0, %v3681_v36 }
 0x482   : > { %v3458_v18 = vadd.f32 %v3822_v41, %v3457_v61 }
 0x483   : > { %v3485_v29 = vmul.f32 %v3477_v22, %v3141_v57 }
 0x484   : > { %v3462_v50 = vsel %vm3461_vm8, %v3822_v41, %v3458_v18 }
 0x485   : > { %3493 = vst [vmem:[%s6919_s22 + $0x30] sm:$0xff] %v3485_v29  ;;  %v3467_v60 = vsel %vm3464_vm9, %v3466_v55, %v3462_v50 }
 0x486   : > { %v3468_v26 = vmul.f32 %v3467_v60, %v3443_v3 }
 0x488   : > { %v3682_v2 = vclamps-f32 %v3468_v26, 1.0 }
 0x48a   : > { %v3478_v0 = vadd.f32 1.0, %v3682_v2 }
 0x48c   : > { %v3486_v10 = vmul.f32 %v3478_v0, %v3142_v56 }
 0x48e   : > { %3494 = vst [vmem:[%s6919_s22 + $0x38] sm:$0xff] %v3486_v10 }
 0x48f   : > { %3850 = shalt.err (!%p3847_p3)
}
 0x490   : > { %s3896_s20 = smov 512   ;;  %s3897_s22 = smov 32  }
 0x491   : > { %3690 = dma.vmem_to_hbm [thread:$0]  (%p3981_p5), %s3509_s25, 1024, %s3511_s9, %s3496_s24, %s3896_s20, %s3896_s20, %s3897_s22  }
 0x492 PF: > { %p3696_p4 = scmp.ge.s32.totalorder %s3885_s30, 2  ;;  %s3525_s13 = sand.u32 1, %s3873_s27  }
 0x493   : > { %s3526_s12 = scalar_lea.sflag [#allocation3], %s3525_s13 }
 0x494   : > { %p3693_p7 = pnand %p3696_p4, %p3985_p6 }
 0x496   : > { %p3694_p8 = pneg %p3693_p7 }
 0x498   : > { %3868 = dma.done.wait (%p3694_p8), %s3526_s12, 1024  }
 0x499   : > { %3870 = vsyncadd (%p3694_p8), %s3526_s12, 4294966272  ;;  %p18_p9 = scmp.ge.s32.totalorder %s3968_s11, 4   ;;  %s7185_s27 = smov %s3877_s28 }
 0x49a   : > { %s7186_s28 = smov %s3881_s29  ;;  %s7187_s29 = smov %s3979_s14 }
 0x49b   : > { %s7188_s30 = smov %s3968_s11  ;;  %20 = sbr.rel (!%p18_p9) target bundleno = 3 (0x3), region = 102 }
 0x4a0   :  { %3532 = vsyncpa [#allocation3], 1 }
 0x4a1   :  { %3534 = vsyncpa [#allocation3 + $0x1], 1 }

</bundles_post_ra>
